<compile_context>
chip_gen: v7x
topology: tpu7x:2x2x1
jax: 0.10.0
libtpu: 0.0.40
codegen_flags: <defaults>
</compile_context>

<pallas_src>
import functools

import numpy as np

import jax
import jax.numpy as jnp
from jax.experimental import pallas as pl
from jax.experimental.pallas import tpu as pltpu


def _round_up(x, m):
    return ((x + m - 1) // m) * m


def _pool_select_mats(oh, ow, flat_w, n_cols):
    """0/1 matrices gathering the 4 elements of every 2x2 max-pool window.

    Pool input is a conv output stored as (C, oh*flat_w) with flat index
    r = row*flat_w + col (only col < ow is valid).  Matrix t picks window
    element (di, dj) of window (a, b) and drops it into output column
    a*(ow//2) + b; extra columns (>= (oh//2)*(ow//2)) stay zero (padding for
    the next conv's shifted slices).
    """
    ph, pw = oh // 2, ow // 2
    mats = np.zeros((4, oh * flat_w, n_cols), np.float32)
    for idx, (di, dj) in enumerate(((0, 0), (0, 1), (1, 0), (1, 1))):
        for a in range(ph):
            for b in range(pw):
                mats[idx, (2 * a + di) * flat_w + (2 * b + dj), a * pw + b] = 1.0
    return jnp.asarray(mats)


# ----------------------------------------------------------------------------
# The fused kernel: one grid step == one image, everything stays in VMEM.
# ----------------------------------------------------------------------------

def _net_kernel(x_ref, w1_ref, b1_ref, s1_ref, w2_ref, b2_ref, s2_ref,
                wfc1_ref, bfc1_ref, wfc2_ref, bfc2_ref, out_ref,
                *, in_w, l1, mid_w, l2):
    f32 = jnp.float32
    x = x_ref[0]                                            # (3, xpad)

    # ---- conv1 + bias + relu: 25 shifted MXU matmuls -> (8, l1) lane-dense --
    acc = None
    for t in range(25):
        ki, kj = divmod(t, 5)
        off = ki * in_w + kj
        d = jnp.dot(w1_ref[t], x[:, off:off + l1], preferred_element_type=f32)
        acc = d if acc is None else acc + d
    y1 = jnp.maximum(acc + b1_ref[...], 0.0)                # (8, l1)

    # ---- maxpool1 (2x2): max of 4 selection matmuls -> (8, x2pad) -----------
    x2 = None
    for t in range(4):
        sel = jnp.dot(y1, s1_ref[t], preferred_element_type=f32)
        x2 = sel if x2 is None else jnp.maximum(x2, sel)

    # ---- conv2 + bias + relu: 25 shifted MXU matmuls -> (16, l2) ------------
    acc = None
    for t in range(25):
        ki, kj = divmod(t, 5)
        off = ki * mid_w + kj
        d = jnp.dot(w2_ref[t], x2[:, off:off + l2], preferred_element_type=f32)
        acc = d if acc is None else acc + d
    y2 = jnp.maximum(acc + b2_ref[...], 0.0)                # (16, l2)

    # ---- maxpool2 (2x2): rows = channels => matches PyTorch (C,H,W) flatten -
    p2 = None
    for t in range(4):
        sel = jnp.dot(y2, s2_ref[t], preferred_element_type=f32)
        p2 = sel if p2 is None else jnp.maximum(p2, sel)    # (16, ph2*pw2)

    # ---- fc1 + relu: contract over (channel, spatial) as 16 small matmuls ---
    h = None
    for c in range(p2.shape[0]):
        d = jnp.dot(p2[c:c + 1, :], wfc1_ref[c], preferred_element_type=f32)
        h = d if h is None else h + d
    h = jnp.maximum(h + bfc1_ref[...], 0.0)                 # (1, 16)

    # ---- fc2 + softmax (exact) ----------------------------------------------
    logits = jnp.dot(h, wfc2_ref[...], preferred_element_type=f32) + bfc2_ref[...]
    m = jnp.max(logits, axis=-1, keepdims=True)
    e = jnp.exp(logits - m)
    out_ref[0] = e / jnp.sum(e, axis=-1, keepdims=True)     # (1, n_classes)


# ----------------------------------------------------------------------------
# Host side: parameter init, one-time weight packing, forward wrapper.
# ----------------------------------------------------------------------------

def init_params(key, width, height):
    w = (width - 4) // 2
    h = (height - 4) // 2
    w = (w - 4) // 2
    h = (h - 4) // 2
    linear_input = 16 * int(w) * int(h)

    ks = jax.random.split(key, 8)
    p = {
        "conv1_w": jax.random.normal(ks[0], (8, 3, 5, 5), jnp.float32) * 0.1,
        "conv1_b": jax.random.normal(ks[1], (8,), jnp.float32) * 0.1,
        "conv2_w": jax.random.normal(ks[2], (16, 8, 5, 5), jnp.float32) * 0.1,
        "conv2_b": jax.random.normal(ks[3], (16,), jnp.float32) * 0.1,
        "fc1_w": jax.random.normal(ks[4], (16, linear_input), jnp.float32) * 0.05,
        "fc1_b": jax.random.normal(ks[5], (16,), jnp.float32) * 0.05,
        "fc2_w": jax.random.normal(ks[6], (13, 16), jnp.float32) * 0.05,
        "fc2_b": jax.random.normal(ks[7], (13,), jnp.float32) * 0.05,
    }
    return p, linear_input


def pack_params(params, width, height):
    """One-time repack of the PyTorch-layout weights for the fused kernel."""
    oh1, ow1 = height - 4, width - 4
    ph1, pw1 = oh1 // 2, ow1 // 2
    oh2, ow2 = ph1 - 4, pw1 - 4
    ph2, pw2 = oh2 // 2, ow2 // 2
    # conv2's shifted slices read up to 4*pw1 + 4 + oh2*pw1 columns of x2.
    x2pad = _round_up(4 * pw1 + 4 + oh2 * pw1, 32)
    return {
        # per-tap (C_out, C_in) weight slices, tap index t = ki*5 + kj
        "w1": jnp.transpose(params["conv1_w"], (2, 3, 0, 1)).reshape(25, 8, 3),
        "b1": params["conv1_b"].reshape(8, 1),
        "s1": _pool_select_mats(oh1, ow1, width, x2pad),
        "w2": jnp.transpose(params["conv2_w"], (2, 3, 0, 1)).reshape(25, 16, 8),
        "b2": params["conv2_b"].reshape(16, 1),
        "s2": _pool_select_mats(oh2, ow2, pw1, ph2 * pw2),
        # fc1 weight as (C, spatial, out) so the kernel contracts in
        # PyTorch's (C, H, W) flatten order without any in-kernel reshape.
        "wfc1": jnp.transpose(params["fc1_w"].reshape(16, 16, ph2 * pw2),
                              (1, 2, 0)),
        "bfc1": params["fc1_b"].reshape(1, 16),
        "wfc2": jnp.transpose(params["fc2_w"]),             # (16, 13)
        "bfc2": params["fc2_b"].reshape(1, 13),
    }


@jax.jit
def net_forward(packed, x_nchw):
    n, cin, h, w = x_nchw.shape
    oh1, ow1 = h - 4, w - 4
    ph1, pw1 = oh1 // 2, ow1 // 2
    oh2 = ph1 - 4
    l1 = oh1 * w                  # conv1 output flat length (width-w rows)
    l2 = oh2 * pw1                # conv2 output flat length (width-pw1 rows)
    xpad = _round_up(h * w + 4, 128)
    n_classes = packed["bfc2"].shape[1]

    # NCHW -> (N, C, H*W) + lane padding; the only host-side prep (cheap).
    x = x_nchw.astype(jnp.float32).reshape(n, cin, h * w)
    x = jnp.pad(x, ((0, 0), (0, 0), (0, xpad - h * w)))

    kernel = functools.partial(_net_kernel, in_w=w, l1=l1, mid_w=pw1, l2=l2)

    def full(arr):
        nd = arr.ndim
        return pl.BlockSpec(arr.shape, lambda i: (0,) * nd)

    out = pl.pallas_call(
        kernel,
        out_shape=jax.ShapeDtypeStruct((n, 1, n_classes), jnp.float32),
        grid=(n,),
        in_specs=[
            pl.BlockSpec((1, cin, xpad), lambda i: (i, 0, 0)),
            full(packed["w1"]), full(packed["b1"]), full(packed["s1"]),
            full(packed["w2"]), full(packed["b2"]), full(packed["s2"]),
            full(packed["wfc1"]), full(packed["bfc1"]),
            full(packed["wfc2"]), full(packed["bfc2"]),
        ],
        out_specs=pl.BlockSpec((1, 1, n_classes), lambda i: (i, 0, 0)),
        compiler_params=pltpu.CompilerParams(
            dimension_semantics=("parallel",)),
    )(x, packed["w1"], packed["b1"], packed["s1"],
      packed["w2"], packed["b2"], packed["s2"],
      packed["wfc1"], packed["bfc1"], packed["wfc2"], packed["bfc2"])
    return out.reshape(n, n_classes)


# Pure-JAX reference (same math as the PyTorch module) for a correctness check.
def _reference_forward(params, x):
    dn = ("NCHW", "OIHW", "NCHW")
    y = jax.lax.conv_general_dilated(x, params["conv1_w"], (1, 1), "VALID",
                                     dimension_numbers=dn)
    y = jnp.maximum(y + params["conv1_b"][None, :, None, None], 0.0)
    y = jax.lax.reduce_window(y, -jnp.inf, jax.lax.max,
                              (1, 1, 2, 2), (1, 1, 2, 2), "VALID")
    y = jax.lax.conv_general_dilated(y, params["conv2_w"], (1, 1), "VALID",
                                     dimension_numbers=dn)
    y = jnp.maximum(y + params["conv2_b"][None, :, None, None], 0.0)
    y = jax.lax.reduce_window(y, -jnp.inf, jax.lax.max,
                              (1, 1, 2, 2), (1, 1, 2, 2), "VALID")
    y = y.reshape(y.shape[0], -1)                      # (N, C*H*W), PyTorch order
    y = jnp.maximum(y @ params["fc1_w"].T + params["fc1_b"], 0.0)
    y = y @ params["fc2_w"].T + params["fc2_b"]
    return jax.nn.softmax(y, axis=1)


if __name__ == "__main__":
    WIDTH, HEIGHT, BATCH = 28, 28, 2
    key = jax.random.PRNGKey(0)
    pkey, xkey = jax.random.split(key)

    params, linear_input = init_params(pkey, WIDTH, HEIGHT)
    packed = pack_params(params, WIDTH, HEIGHT)
    x = jax.random.normal(xkey, (BATCH, 3, HEIGHT, WIDTH), jnp.float32)

    out = net_forward(packed, x)
    out = jax.block_until_ready(out)

    assert out.shape == (BATCH, 13), out.shape
    # softmax rows sum to 1
    assert bool(jnp.all(jnp.abs(jnp.sum(out, axis=1) - 1.0) < 1e-5))
    # matches the plain-JAX (PyTorch-equivalent) reference
    ref = _reference_forward(params, x)
    assert bool(jnp.allclose(out, ref, rtol=1e-2, atol=1e-3)), (
        float(jnp.max(jnp.abs(out - ref))))

    print("KERNEL_OK")
</pallas_src>

<mosaic_0001>
module attributes {stable_mosaic.version = 11 : i64} {
  func.func @_net_kernel(%arg0: i32, %arg1: memref<1x3x896xf32, #tpu.memory_space<vmem>>, %arg2: memref<25x8x3xf32, #tpu.memory_space<vmem>>, %arg3: memref<8x1xf32, #tpu.memory_space<vmem>>, %arg4: memref<4x672x160xf32, #tpu.memory_space<vmem>>, %arg5: memref<25x16x8xf32, #tpu.memory_space<vmem>>, %arg6: memref<16x1xf32, #tpu.memory_space<vmem>>, %arg7: memref<4x96x16xf32, #tpu.memory_space<vmem>>, %arg8: memref<16x16x16xf32, #tpu.memory_space<vmem>>, %arg9: memref<1x16xf32, #tpu.memory_space<vmem>>, %arg10: memref<16x13xf32, #tpu.memory_space<vmem>>, %arg11: memref<1x13xf32, #tpu.memory_space<vmem>>, %arg12: memref<1x1x13xf32, #tpu.memory_space<vmem>>) attributes {dimension_semantics = [#tpu.dimension_semantics<parallel>], iteration_bounds = array<i64: 2>, scalar_prefetch = 0 : i64, scratch_operands = 0 : i64, tpu.core_type = #tpu.core_type<tc>, window_params = [{transform_indices = @transform_0, window_bounds = array<i64: 1, 3, 896>}, {pipeline_mode = #tpu.pipeline_mode<synchronous>, transform_indices = @transform_1, window_bounds = array<i64: 25, 8, 3>}, {pipeline_mode = #tpu.pipeline_mode<synchronous>, transform_indices = @transform_2, window_bounds = array<i64: 8, 1>}, {pipeline_mode = #tpu.pipeline_mode<synchronous>, transform_indices = @transform_3, window_bounds = array<i64: 4, 672, 160>}, {pipeline_mode = #tpu.pipeline_mode<synchronous>, transform_indices = @transform_4, window_bounds = array<i64: 25, 16, 8>}, {pipeline_mode = #tpu.pipeline_mode<synchronous>, transform_indices = @transform_5, window_bounds = array<i64: 16, 1>}, {pipeline_mode = #tpu.pipeline_mode<synchronous>, transform_indices = @transform_6, window_bounds = array<i64: 4, 96, 16>}, {pipeline_mode = #tpu.pipeline_mode<synchronous>, transform_indices = @transform_7, window_bounds = array<i64: 16, 16, 16>}, {pipeline_mode = #tpu.pipeline_mode<synchronous>, transform_indices = @transform_8, window_bounds = array<i64: 1, 16>}, {pipeline_mode = #tpu.pipeline_mode<synchronous>, transform_indices = @transform_9, window_bounds = array<i64: 16, 13>}, {pipeline_mode = #tpu.pipeline_mode<synchronous>, transform_indices = @transform_10, window_bounds = array<i64: 1, 13>}, {transform_indices = @transform_11, window_bounds = array<i64: 1, 1, 13>}]} {
    %c0 = arith.constant 0 : index
    %c0_0 = arith.constant 0 : index
    %c0_1 = arith.constant 0 : index
    %0 = vector.load %arg1[%c0, %c0_0, %c0_1] : memref<1x3x896xf32, #tpu.memory_space<vmem>>, vector<1x3x896xf32>
    %1 = vector.shape_cast %0 : vector<1x3x896xf32> to vector<3x896xf32>
    %c0_2 = arith.constant 0 : index
    %c0_3 = arith.constant 0 : index
    %c0_4 = arith.constant 0 : index
    %2 = vector.load %arg2[%c0_2, %c0_3, %c0_4] : memref<25x8x3xf32, #tpu.memory_space<vmem>>, vector<1x8x3xf32>
    %3 = vector.shape_cast %2 : vector<1x8x3xf32> to vector<8x3xf32>
    %4 = vector.extract_strided_slice %1 {offsets = [0, 0], sizes = [3, 672], strides = [1, 1]} : vector<3x896xf32> to vector<3x672xf32>
    %cst = arith.constant dense<0.000000e+00> : vector<8x672xf32>
    %5 = tpu.matmul %3, %4, %cst {dimension_numbers = #tpu.dot_dimension_numbers<[1], [0], [0], [1], [0, 0, 1, 1], [], []>} : vector<8x3xf32>, vector<3x672xf32>, vector<8x672xf32> -> vector<8x672xf32>
    %c1 = arith.constant 1 : index
    %c0_5 = arith.constant 0 : index
    %c0_6 = arith.constant 0 : index
    %6 = vector.load %arg2[%c1, %c0_5, %c0_6] : memref<25x8x3xf32, #tpu.memory_space<vmem>>, vector<1x8x3xf32>
    %7 = vector.shape_cast %6 : vector<1x8x3xf32> to vector<8x3xf32>
    %8 = vector.extract_strided_slice %1 {offsets = [0, 1], sizes = [3, 672], strides = [1, 1]} : vector<3x896xf32> to vector<3x672xf32>
    %cst_7 = arith.constant dense<0.000000e+00> : vector<8x672xf32>
    %9 = tpu.matmul %7, %8, %cst_7 {dimension_numbers = #tpu.dot_dimension_numbers<[1], [0], [0], [1], [0, 0, 1, 1], [], []>} : vector<8x3xf32>, vector<3x672xf32>, vector<8x672xf32> -> vector<8x672xf32>
    %10 = arith.addf %5, %9 : vector<8x672xf32>
    %c2 = arith.constant 2 : index
    %c0_8 = arith.constant 0 : index
    %c0_9 = arith.constant 0 : index
    %11 = vector.load %arg2[%c2, %c0_8, %c0_9] : memref<25x8x3xf32, #tpu.memory_space<vmem>>, vector<1x8x3xf32>
    %12 = vector.shape_cast %11 : vector<1x8x3xf32> to vector<8x3xf32>
    %13 = vector.extract_strided_slice %1 {offsets = [0, 2], sizes = [3, 672], strides = [1, 1]} : vector<3x896xf32> to vector<3x672xf32>
    %cst_10 = arith.constant dense<0.000000e+00> : vector<8x672xf32>
    %14 = tpu.matmul %12, %13, %cst_10 {dimension_numbers = #tpu.dot_dimension_numbers<[1], [0], [0], [1], [0, 0, 1, 1], [], []>} : vector<8x3xf32>, vector<3x672xf32>, vector<8x672xf32> -> vector<8x672xf32>
    %15 = arith.addf %10, %14 : vector<8x672xf32>
    %c3 = arith.constant 3 : index
    %c0_11 = arith.constant 0 : index
    %c0_12 = arith.constant 0 : index
    %16 = vector.load %arg2[%c3, %c0_11, %c0_12] : memref<25x8x3xf32, #tpu.memory_space<vmem>>, vector<1x8x3xf32>
    %17 = vector.shape_cast %16 : vector<1x8x3xf32> to vector<8x3xf32>
    %18 = vector.extract_strided_slice %1 {offsets = [0, 3], sizes = [3, 672], strides = [1, 1]} : vector<3x896xf32> to vector<3x672xf32>
    %cst_13 = arith.constant dense<0.000000e+00> : vector<8x672xf32>
    %19 = tpu.matmul %17, %18, %cst_13 {dimension_numbers = #tpu.dot_dimension_numbers<[1], [0], [0], [1], [0, 0, 1, 1], [], []>} : vector<8x3xf32>, vector<3x672xf32>, vector<8x672xf32> -> vector<8x672xf32>
    %20 = arith.addf %15, %19 : vector<8x672xf32>
    %c4 = arith.constant 4 : index
    %c0_14 = arith.constant 0 : index
    %c0_15 = arith.constant 0 : index
    %21 = vector.load %arg2[%c4, %c0_14, %c0_15] : memref<25x8x3xf32, #tpu.memory_space<vmem>>, vector<1x8x3xf32>
    %22 = vector.shape_cast %21 : vector<1x8x3xf32> to vector<8x3xf32>
    %23 = vector.extract_strided_slice %1 {offsets = [0, 4], sizes = [3, 672], strides = [1, 1]} : vector<3x896xf32> to vector<3x672xf32>
    %cst_16 = arith.constant dense<0.000000e+00> : vector<8x672xf32>
    %24 = tpu.matmul %22, %23, %cst_16 {dimension_numbers = #tpu.dot_dimension_numbers<[1], [0], [0], [1], [0, 0, 1, 1], [], []>} : vector<8x3xf32>, vector<3x672xf32>, vector<8x672xf32> -> vector<8x672xf32>
    %25 = arith.addf %20, %24 : vector<8x672xf32>
    %c5 = arith.constant 5 : index
    %c0_17 = arith.constant 0 : index
    %c0_18 = arith.constant 0 : index
    %26 = vector.load %arg2[%c5, %c0_17, %c0_18] : memref<25x8x3xf32, #tpu.memory_space<vmem>>, vector<1x8x3xf32>
    %27 = vector.shape_cast %26 : vector<1x8x3xf32> to vector<8x3xf32>
    %28 = vector.extract_strided_slice %1 {offsets = [0, 28], sizes = [3, 672], strides = [1, 1]} : vector<3x896xf32> to vector<3x672xf32>
    %cst_19 = arith.constant dense<0.000000e+00> : vector<8x672xf32>
    %29 = tpu.matmul %27, %28, %cst_19 {dimension_numbers = #tpu.dot_dimension_numbers<[1], [0], [0], [1], [0, 0, 1, 1], [], []>} : vector<8x3xf32>, vector<3x672xf32>, vector<8x672xf32> -> vector<8x672xf32>
    %30 = arith.addf %25, %29 : vector<8x672xf32>
    %c6 = arith.constant 6 : index
    %c0_20 = arith.constant 0 : index
    %c0_21 = arith.constant 0 : index
    %31 = vector.load %arg2[%c6, %c0_20, %c0_21] : memref<25x8x3xf32, #tpu.memory_space<vmem>>, vector<1x8x3xf32>
    %32 = vector.shape_cast %31 : vector<1x8x3xf32> to vector<8x3xf32>
    %33 = vector.extract_strided_slice %1 {offsets = [0, 29], sizes = [3, 672], strides = [1, 1]} : vector<3x896xf32> to vector<3x672xf32>
    %cst_22 = arith.constant dense<0.000000e+00> : vector<8x672xf32>
    %34 = tpu.matmul %32, %33, %cst_22 {dimension_numbers = #tpu.dot_dimension_numbers<[1], [0], [0], [1], [0, 0, 1, 1], [], []>} : vector<8x3xf32>, vector<3x672xf32>, vector<8x672xf32> -> vector<8x672xf32>
    %35 = arith.addf %30, %34 : vector<8x672xf32>
    %c7 = arith.constant 7 : index
    %c0_23 = arith.constant 0 : index
    %c0_24 = arith.constant 0 : index
    %36 = vector.load %arg2[%c7, %c0_23, %c0_24] : memref<25x8x3xf32, #tpu.memory_space<vmem>>, vector<1x8x3xf32>
    %37 = vector.shape_cast %36 : vector<1x8x3xf32> to vector<8x3xf32>
    %38 = vector.extract_strided_slice %1 {offsets = [0, 30], sizes = [3, 672], strides = [1, 1]} : vector<3x896xf32> to vector<3x672xf32>
    %cst_25 = arith.constant dense<0.000000e+00> : vector<8x672xf32>
    %39 = tpu.matmul %37, %38, %cst_25 {dimension_numbers = #tpu.dot_dimension_numbers<[1], [0], [0], [1], [0, 0, 1, 1], [], []>} : vector<8x3xf32>, vector<3x672xf32>, vector<8x672xf32> -> vector<8x672xf32>
    %40 = arith.addf %35, %39 : vector<8x672xf32>
    %c8 = arith.constant 8 : index
    %c0_26 = arith.constant 0 : index
    %c0_27 = arith.constant 0 : index
    %41 = vector.load %arg2[%c8, %c0_26, %c0_27] : memref<25x8x3xf32, #tpu.memory_space<vmem>>, vector<1x8x3xf32>
    %42 = vector.shape_cast %41 : vector<1x8x3xf32> to vector<8x3xf32>
    %43 = vector.extract_strided_slice %1 {offsets = [0, 31], sizes = [3, 672], strides = [1, 1]} : vector<3x896xf32> to vector<3x672xf32>
    %cst_28 = arith.constant dense<0.000000e+00> : vector<8x672xf32>
    %44 = tpu.matmul %42, %43, %cst_28 {dimension_numbers = #tpu.dot_dimension_numbers<[1], [0], [0], [1], [0, 0, 1, 1], [], []>} : vector<8x3xf32>, vector<3x672xf32>, vector<8x672xf32> -> vector<8x672xf32>
    %45 = arith.addf %40, %44 : vector<8x672xf32>
    %c9 = arith.constant 9 : index
    %c0_29 = arith.constant 0 : index
    %c0_30 = arith.constant 0 : index
    %46 = vector.load %arg2[%c9, %c0_29, %c0_30] : memref<25x8x3xf32, #tpu.memory_space<vmem>>, vector<1x8x3xf32>
    %47 = vector.shape_cast %46 : vector<1x8x3xf32> to vector<8x3xf32>
    %48 = vector.extract_strided_slice %1 {offsets = [0, 32], sizes = [3, 672], strides = [1, 1]} : vector<3x896xf32> to vector<3x672xf32>
    %cst_31 = arith.constant dense<0.000000e+00> : vector<8x672xf32>
    %49 = tpu.matmul %47, %48, %cst_31 {dimension_numbers = #tpu.dot_dimension_numbers<[1], [0], [0], [1], [0, 0, 1, 1], [], []>} : vector<8x3xf32>, vector<3x672xf32>, vector<8x672xf32> -> vector<8x672xf32>
    %50 = arith.addf %45, %49 : vector<8x672xf32>
    %c10 = arith.constant 10 : index
    %c0_32 = arith.constant 0 : index
    %c0_33 = arith.constant 0 : index
    %51 = vector.load %arg2[%c10, %c0_32, %c0_33] : memref<25x8x3xf32, #tpu.memory_space<vmem>>, vector<1x8x3xf32>
    %52 = vector.shape_cast %51 : vector<1x8x3xf32> to vector<8x3xf32>
    %53 = vector.extract_strided_slice %1 {offsets = [0, 56], sizes = [3, 672], strides = [1, 1]} : vector<3x896xf32> to vector<3x672xf32>
    %cst_34 = arith.constant dense<0.000000e+00> : vector<8x672xf32>
    %54 = tpu.matmul %52, %53, %cst_34 {dimension_numbers = #tpu.dot_dimension_numbers<[1], [0], [0], [1], [0, 0, 1, 1], [], []>} : vector<8x3xf32>, vector<3x672xf32>, vector<8x672xf32> -> vector<8x672xf32>
    %55 = arith.addf %50, %54 : vector<8x672xf32>
    %c11 = arith.constant 11 : index
    %c0_35 = arith.constant 0 : index
    %c0_36 = arith.constant 0 : index
    %56 = vector.load %arg2[%c11, %c0_35, %c0_36] : memref<25x8x3xf32, #tpu.memory_space<vmem>>, vector<1x8x3xf32>
    %57 = vector.shape_cast %56 : vector<1x8x3xf32> to vector<8x3xf32>
    %58 = vector.extract_strided_slice %1 {offsets = [0, 57], sizes = [3, 672], strides = [1, 1]} : vector<3x896xf32> to vector<3x672xf32>
    %cst_37 = arith.constant dense<0.000000e+00> : vector<8x672xf32>
    %59 = tpu.matmul %57, %58, %cst_37 {dimension_numbers = #tpu.dot_dimension_numbers<[1], [0], [0], [1], [0, 0, 1, 1], [], []>} : vector<8x3xf32>, vector<3x672xf32>, vector<8x672xf32> -> vector<8x672xf32>
    %60 = arith.addf %55, %59 : vector<8x672xf32>
    %c12 = arith.constant 12 : index
    %c0_38 = arith.constant 0 : index
    %c0_39 = arith.constant 0 : index
    %61 = vector.load %arg2[%c12, %c0_38, %c0_39] : memref<25x8x3xf32, #tpu.memory_space<vmem>>, vector<1x8x3xf32>
    %62 = vector.shape_cast %61 : vector<1x8x3xf32> to vector<8x3xf32>
    %63 = vector.extract_strided_slice %1 {offsets = [0, 58], sizes = [3, 672], strides = [1, 1]} : vector<3x896xf32> to vector<3x672xf32>
    %cst_40 = arith.constant dense<0.000000e+00> : vector<8x672xf32>
    %64 = tpu.matmul %62, %63, %cst_40 {dimension_numbers = #tpu.dot_dimension_numbers<[1], [0], [0], [1], [0, 0, 1, 1], [], []>} : vector<8x3xf32>, vector<3x672xf32>, vector<8x672xf32> -> vector<8x672xf32>
    %65 = arith.addf %60, %64 : vector<8x672xf32>
    %c13 = arith.constant 13 : index
    %c0_41 = arith.constant 0 : index
    %c0_42 = arith.constant 0 : index
    %66 = vector.load %arg2[%c13, %c0_41, %c0_42] : memref<25x8x3xf32, #tpu.memory_space<vmem>>, vector<1x8x3xf32>
    %67 = vector.shape_cast %66 : vector<1x8x3xf32> to vector<8x3xf32>
    %68 = vector.extract_strided_slice %1 {offsets = [0, 59], sizes = [3, 672], strides = [1, 1]} : vector<3x896xf32> to vector<3x672xf32>
    %cst_43 = arith.constant dense<0.000000e+00> : vector<8x672xf32>
    %69 = tpu.matmul %67, %68, %cst_43 {dimension_numbers = #tpu.dot_dimension_numbers<[1], [0], [0], [1], [0, 0, 1, 1], [], []>} : vector<8x3xf32>, vector<3x672xf32>, vector<8x672xf32> -> vector<8x672xf32>
    %70 = arith.addf %65, %69 : vector<8x672xf32>
    %c14 = arith.constant 14 : index
    %c0_44 = arith.constant 0 : index
    %c0_45 = arith.constant 0 : index
    %71 = vector.load %arg2[%c14, %c0_44, %c0_45] : memref<25x8x3xf32, #tpu.memory_space<vmem>>, vector<1x8x3xf32>
    %72 = vector.shape_cast %71 : vector<1x8x3xf32> to vector<8x3xf32>
    %73 = vector.extract_strided_slice %1 {offsets = [0, 60], sizes = [3, 672], strides = [1, 1]} : vector<3x896xf32> to vector<3x672xf32>
    %cst_46 = arith.constant dense<0.000000e+00> : vector<8x672xf32>
    %74 = tpu.matmul %72, %73, %cst_46 {dimension_numbers = #tpu.dot_dimension_numbers<[1], [0], [0], [1], [0, 0, 1, 1], [], []>} : vector<8x3xf32>, vector<3x672xf32>, vector<8x672xf32> -> vector<8x672xf32>
    %75 = arith.addf %70, %74 : vector<8x672xf32>
    %c15 = arith.constant 15 : index
    %c0_47 = arith.constant 0 : index
    %c0_48 = arith.constant 0 : index
    %76 = vector.load %arg2[%c15, %c0_47, %c0_48] : memref<25x8x3xf32, #tpu.memory_space<vmem>>, vector<1x8x3xf32>
    %77 = vector.shape_cast %76 : vector<1x8x3xf32> to vector<8x3xf32>
    %78 = vector.extract_strided_slice %1 {offsets = [0, 84], sizes = [3, 672], strides = [1, 1]} : vector<3x896xf32> to vector<3x672xf32>
    %cst_49 = arith.constant dense<0.000000e+00> : vector<8x672xf32>
    %79 = tpu.matmul %77, %78, %cst_49 {dimension_numbers = #tpu.dot_dimension_numbers<[1], [0], [0], [1], [0, 0, 1, 1], [], []>} : vector<8x3xf32>, vector<3x672xf32>, vector<8x672xf32> -> vector<8x672xf32>
    %80 = arith.addf %75, %79 : vector<8x672xf32>
    %c16 = arith.constant 16 : index
    %c0_50 = arith.constant 0 : index
    %c0_51 = arith.constant 0 : index
    %81 = vector.load %arg2[%c16, %c0_50, %c0_51] : memref<25x8x3xf32, #tpu.memory_space<vmem>>, vector<1x8x3xf32>
    %82 = vector.shape_cast %81 : vector<1x8x3xf32> to vector<8x3xf32>
    %83 = vector.extract_strided_slice %1 {offsets = [0, 85], sizes = [3, 672], strides = [1, 1]} : vector<3x896xf32> to vector<3x672xf32>
    %cst_52 = arith.constant dense<0.000000e+00> : vector<8x672xf32>
    %84 = tpu.matmul %82, %83, %cst_52 {dimension_numbers = #tpu.dot_dimension_numbers<[1], [0], [0], [1], [0, 0, 1, 1], [], []>} : vector<8x3xf32>, vector<3x672xf32>, vector<8x672xf32> -> vector<8x672xf32>
    %85 = arith.addf %80, %84 : vector<8x672xf32>
    %c17 = arith.constant 17 : index
    %c0_53 = arith.constant 0 : index
    %c0_54 = arith.constant 0 : index
    %86 = vector.load %arg2[%c17, %c0_53, %c0_54] : memref<25x8x3xf32, #tpu.memory_space<vmem>>, vector<1x8x3xf32>
    %87 = vector.shape_cast %86 : vector<1x8x3xf32> to vector<8x3xf32>
    %88 = vector.extract_strided_slice %1 {offsets = [0, 86], sizes = [3, 672], strides = [1, 1]} : vector<3x896xf32> to vector<3x672xf32>
    %cst_55 = arith.constant dense<0.000000e+00> : vector<8x672xf32>
    %89 = tpu.matmul %87, %88, %cst_55 {dimension_numbers = #tpu.dot_dimension_numbers<[1], [0], [0], [1], [0, 0, 1, 1], [], []>} : vector<8x3xf32>, vector<3x672xf32>, vector<8x672xf32> -> vector<8x672xf32>
    %90 = arith.addf %85, %89 : vector<8x672xf32>
    %c18 = arith.constant 18 : index
    %c0_56 = arith.constant 0 : index
    %c0_57 = arith.constant 0 : index
    %91 = vector.load %arg2[%c18, %c0_56, %c0_57] : memref<25x8x3xf32, #tpu.memory_space<vmem>>, vector<1x8x3xf32>
    %92 = vector.shape_cast %91 : vector<1x8x3xf32> to vector<8x3xf32>
    %93 = vector.extract_strided_slice %1 {offsets = [0, 87], sizes = [3, 672], strides = [1, 1]} : vector<3x896xf32> to vector<3x672xf32>
    %cst_58 = arith.constant dense<0.000000e+00> : vector<8x672xf32>
    %94 = tpu.matmul %92, %93, %cst_58 {dimension_numbers = #tpu.dot_dimension_numbers<[1], [0], [0], [1], [0, 0, 1, 1], [], []>} : vector<8x3xf32>, vector<3x672xf32>, vector<8x672xf32> -> vector<8x672xf32>
    %95 = arith.addf %90, %94 : vector<8x672xf32>
    %c19 = arith.constant 19 : index
    %c0_59 = arith.constant 0 : index
    %c0_60 = arith.constant 0 : index
    %96 = vector.load %arg2[%c19, %c0_59, %c0_60] : memref<25x8x3xf32, #tpu.memory_space<vmem>>, vector<1x8x3xf32>
    %97 = vector.shape_cast %96 : vector<1x8x3xf32> to vector<8x3xf32>
    %98 = vector.extract_strided_slice %1 {offsets = [0, 88], sizes = [3, 672], strides = [1, 1]} : vector<3x896xf32> to vector<3x672xf32>
    %cst_61 = arith.constant dense<0.000000e+00> : vector<8x672xf32>
    %99 = tpu.matmul %97, %98, %cst_61 {dimension_numbers = #tpu.dot_dimension_numbers<[1], [0], [0], [1], [0, 0, 1, 1], [], []>} : vector<8x3xf32>, vector<3x672xf32>, vector<8x672xf32> -> vector<8x672xf32>
    %100 = arith.addf %95, %99 : vector<8x672xf32>
    %c20 = arith.constant 20 : index
    %c0_62 = arith.constant 0 : index
    %c0_63 = arith.constant 0 : index
    %101 = vector.load %arg2[%c20, %c0_62, %c0_63] : memref<25x8x3xf32, #tpu.memory_space<vmem>>, vector<1x8x3xf32>
    %102 = vector.shape_cast %101 : vector<1x8x3xf32> to vector<8x3xf32>
    %103 = vector.extract_strided_slice %1 {offsets = [0, 112], sizes = [3, 672], strides = [1, 1]} : vector<3x896xf32> to vector<3x672xf32>
    %cst_64 = arith.constant dense<0.000000e+00> : vector<8x672xf32>
    %104 = tpu.matmul %102, %103, %cst_64 {dimension_numbers = #tpu.dot_dimension_numbers<[1], [0], [0], [1], [0, 0, 1, 1], [], []>} : vector<8x3xf32>, vector<3x672xf32>, vector<8x672xf32> -> vector<8x672xf32>
    %105 = arith.addf %100, %104 : vector<8x672xf32>
    %c21 = arith.constant 21 : index
    %c0_65 = arith.constant 0 : index
    %c0_66 = arith.constant 0 : index
    %106 = vector.load %arg2[%c21, %c0_65, %c0_66] : memref<25x8x3xf32, #tpu.memory_space<vmem>>, vector<1x8x3xf32>
    %107 = vector.shape_cast %106 : vector<1x8x3xf32> to vector<8x3xf32>
    %108 = vector.extract_strided_slice %1 {offsets = [0, 113], sizes = [3, 672], strides = [1, 1]} : vector<3x896xf32> to vector<3x672xf32>
    %cst_67 = arith.constant dense<0.000000e+00> : vector<8x672xf32>
    %109 = tpu.matmul %107, %108, %cst_67 {dimension_numbers = #tpu.dot_dimension_numbers<[1], [0], [0], [1], [0, 0, 1, 1], [], []>} : vector<8x3xf32>, vector<3x672xf32>, vector<8x672xf32> -> vector<8x672xf32>
    %110 = arith.addf %105, %109 : vector<8x672xf32>
    %c22 = arith.constant 22 : index
    %c0_68 = arith.constant 0 : index
    %c0_69 = arith.constant 0 : index
    %111 = vector.load %arg2[%c22, %c0_68, %c0_69] : memref<25x8x3xf32, #tpu.memory_space<vmem>>, vector<1x8x3xf32>
    %112 = vector.shape_cast %111 : vector<1x8x3xf32> to vector<8x3xf32>
    %113 = vector.extract_strided_slice %1 {offsets = [0, 114], sizes = [3, 672], strides = [1, 1]} : vector<3x896xf32> to vector<3x672xf32>
    %cst_70 = arith.constant dense<0.000000e+00> : vector<8x672xf32>
    %114 = tpu.matmul %112, %113, %cst_70 {dimension_numbers = #tpu.dot_dimension_numbers<[1], [0], [0], [1], [0, 0, 1, 1], [], []>} : vector<8x3xf32>, vector<3x672xf32>, vector<8x672xf32> -> vector<8x672xf32>
    %115 = arith.addf %110, %114 : vector<8x672xf32>
    %c23 = arith.constant 23 : index
    %c0_71 = arith.constant 0 : index
    %c0_72 = arith.constant 0 : index
    %116 = vector.load %arg2[%c23, %c0_71, %c0_72] : memref<25x8x3xf32, #tpu.memory_space<vmem>>, vector<1x8x3xf32>
    %117 = vector.shape_cast %116 : vector<1x8x3xf32> to vector<8x3xf32>
    %118 = vector.extract_strided_slice %1 {offsets = [0, 115], sizes = [3, 672], strides = [1, 1]} : vector<3x896xf32> to vector<3x672xf32>
    %cst_73 = arith.constant dense<0.000000e+00> : vector<8x672xf32>
    %119 = tpu.matmul %117, %118, %cst_73 {dimension_numbers = #tpu.dot_dimension_numbers<[1], [0], [0], [1], [0, 0, 1, 1], [], []>} : vector<8x3xf32>, vector<3x672xf32>, vector<8x672xf32> -> vector<8x672xf32>
    %120 = arith.addf %115, %119 : vector<8x672xf32>
    %c24 = arith.constant 24 : index
    %c0_74 = arith.constant 0 : index
    %c0_75 = arith.constant 0 : index
    %121 = vector.load %arg2[%c24, %c0_74, %c0_75] : memref<25x8x3xf32, #tpu.memory_space<vmem>>, vector<1x8x3xf32>
    %122 = vector.shape_cast %121 : vector<1x8x3xf32> to vector<8x3xf32>
    %123 = vector.extract_strided_slice %1 {offsets = [0, 116], sizes = [3, 672], strides = [1, 1]} : vector<3x896xf32> to vector<3x672xf32>
    %cst_76 = arith.constant dense<0.000000e+00> : vector<8x672xf32>
    %124 = tpu.matmul %122, %123, %cst_76 {dimension_numbers = #tpu.dot_dimension_numbers<[1], [0], [0], [1], [0, 0, 1, 1], [], []>} : vector<8x3xf32>, vector<3x672xf32>, vector<8x672xf32> -> vector<8x672xf32>
    %125 = arith.addf %120, %124 : vector<8x672xf32>
    %c0_77 = arith.constant 0 : index
    %c0_78 = arith.constant 0 : index
    %126 = vector.load %arg3[%c0_77, %c0_78] : memref<8x1xf32, #tpu.memory_space<vmem>>, vector<8x1xf32>
    %127 = vector.broadcast %126 : vector<8x1xf32> to vector<8x672xf32>
    %128 = arith.addf %125, %127 : vector<8x672xf32>
    %cst_79 = arith.constant 0.000000e+00 : f32
    %129 = vector.broadcast %cst_79 : f32 to vector<8x672xf32>
    %130 = arith.maximumf %128, %129 : vector<8x672xf32>
    %c0_80 = arith.constant 0 : index
    %c0_81 = arith.constant 0 : index
    %c0_82 = arith.constant 0 : index
    %131 = vector.load %arg4[%c0_80, %c0_81, %c0_82] : memref<4x672x160xf32, #tpu.memory_space<vmem>>, vector<1x672x160xf32>
    %132 = vector.shape_cast %131 : vector<1x672x160xf32> to vector<672x160xf32>
    %cst_83 = arith.constant dense<0.000000e+00> : vector<8x160xf32>
    %133 = tpu.matmul %130, %132, %cst_83 {dimension_numbers = #tpu.dot_dimension_numbers<[1], [0], [0], [1], [0, 0, 1, 1], [], []>} : vector<8x672xf32>, vector<672x160xf32>, vector<8x160xf32> -> vector<8x160xf32>
    %c1_84 = arith.constant 1 : index
    %c0_85 = arith.constant 0 : index
    %c0_86 = arith.constant 0 : index
    %134 = vector.load %arg4[%c1_84, %c0_85, %c0_86] : memref<4x672x160xf32, #tpu.memory_space<vmem>>, vector<1x672x160xf32>
    %135 = vector.shape_cast %134 : vector<1x672x160xf32> to vector<672x160xf32>
    %cst_87 = arith.constant dense<0.000000e+00> : vector<8x160xf32>
    %136 = tpu.matmul %130, %135, %cst_87 {dimension_numbers = #tpu.dot_dimension_numbers<[1], [0], [0], [1], [0, 0, 1, 1], [], []>} : vector<8x672xf32>, vector<672x160xf32>, vector<8x160xf32> -> vector<8x160xf32>
    %137 = arith.maximumf %133, %136 : vector<8x160xf32>
    %c2_88 = arith.constant 2 : index
    %c0_89 = arith.constant 0 : index
    %c0_90 = arith.constant 0 : index
    %138 = vector.load %arg4[%c2_88, %c0_89, %c0_90] : memref<4x672x160xf32, #tpu.memory_space<vmem>>, vector<1x672x160xf32>
    %139 = vector.shape_cast %138 : vector<1x672x160xf32> to vector<672x160xf32>
    %cst_91 = arith.constant dense<0.000000e+00> : vector<8x160xf32>
    %140 = tpu.matmul %130, %139, %cst_91 {dimension_numbers = #tpu.dot_dimension_numbers<[1], [0], [0], [1], [0, 0, 1, 1], [], []>} : vector<8x672xf32>, vector<672x160xf32>, vector<8x160xf32> -> vector<8x160xf32>
    %141 = arith.maximumf %137, %140 : vector<8x160xf32>
    %c3_92 = arith.constant 3 : index
    %c0_93 = arith.constant 0 : index
    %c0_94 = arith.constant 0 : index
    %142 = vector.load %arg4[%c3_92, %c0_93, %c0_94] : memref<4x672x160xf32, #tpu.memory_space<vmem>>, vector<1x672x160xf32>
    %143 = vector.shape_cast %142 : vector<1x672x160xf32> to vector<672x160xf32>
    %cst_95 = arith.constant dense<0.000000e+00> : vector<8x160xf32>
    %144 = tpu.matmul %130, %143, %cst_95 {dimension_numbers = #tpu.dot_dimension_numbers<[1], [0], [0], [1], [0, 0, 1, 1], [], []>} : vector<8x672xf32>, vector<672x160xf32>, vector<8x160xf32> -> vector<8x160xf32>
    %145 = arith.maximumf %141, %144 : vector<8x160xf32>
    %c0_96 = arith.constant 0 : index
    %c0_97 = arith.constant 0 : index
    %c0_98 = arith.constant 0 : index
    %146 = vector.load %arg5[%c0_96, %c0_97, %c0_98] : memref<25x16x8xf32, #tpu.memory_space<vmem>>, vector<1x16x8xf32>
    %147 = vector.shape_cast %146 : vector<1x16x8xf32> to vector<16x8xf32>
    %148 = vector.extract_strided_slice %145 {offsets = [0, 0], sizes = [8, 96], strides = [1, 1]} : vector<8x160xf32> to vector<8x96xf32>
    %cst_99 = arith.constant dense<0.000000e+00> : vector<16x96xf32>
    %149 = tpu.matmul %147, %148, %cst_99 {dimension_numbers = #tpu.dot_dimension_numbers<[1], [0], [0], [1], [0, 0, 1, 1], [], []>} : vector<16x8xf32>, vector<8x96xf32>, vector<16x96xf32> -> vector<16x96xf32>
    %c1_100 = arith.constant 1 : index
    %c0_101 = arith.constant 0 : index
    %c0_102 = arith.constant 0 : index
    %150 = vector.load %arg5[%c1_100, %c0_101, %c0_102] : memref<25x16x8xf32, #tpu.memory_space<vmem>>, vector<1x16x8xf32>
    %151 = vector.shape_cast %150 : vector<1x16x8xf32> to vector<16x8xf32>
    %152 = vector.extract_strided_slice %145 {offsets = [0, 1], sizes = [8, 96], strides = [1, 1]} : vector<8x160xf32> to vector<8x96xf32>
    %cst_103 = arith.constant dense<0.000000e+00> : vector<16x96xf32>
    %153 = tpu.matmul %151, %152, %cst_103 {dimension_numbers = #tpu.dot_dimension_numbers<[1], [0], [0], [1], [0, 0, 1, 1], [], []>} : vector<16x8xf32>, vector<8x96xf32>, vector<16x96xf32> -> vector<16x96xf32>
    %154 = arith.addf %149, %153 : vector<16x96xf32>
    %c2_104 = arith.constant 2 : index
    %c0_105 = arith.constant 0 : index
    %c0_106 = arith.constant 0 : index
    %155 = vector.load %arg5[%c2_104, %c0_105, %c0_106] : memref<25x16x8xf32, #tpu.memory_space<vmem>>, vector<1x16x8xf32>
    %156 = vector.shape_cast %155 : vector<1x16x8xf32> to vector<16x8xf32>
    %157 = vector.extract_strided_slice %145 {offsets = [0, 2], sizes = [8, 96], strides = [1, 1]} : vector<8x160xf32> to vector<8x96xf32>
    %cst_107 = arith.constant dense<0.000000e+00> : vector<16x96xf32>
    %158 = tpu.matmul %156, %157, %cst_107 {dimension_numbers = #tpu.dot_dimension_numbers<[1], [0], [0], [1], [0, 0, 1, 1], [], []>} : vector<16x8xf32>, vector<8x96xf32>, vector<16x96xf32> -> vector<16x96xf32>
    %159 = arith.addf %154, %158 : vector<16x96xf32>
    %c3_108 = arith.constant 3 : index
    %c0_109 = arith.constant 0 : index
    %c0_110 = arith.constant 0 : index
    %160 = vector.load %arg5[%c3_108, %c0_109, %c0_110] : memref<25x16x8xf32, #tpu.memory_space<vmem>>, vector<1x16x8xf32>
    %161 = vector.shape_cast %160 : vector<1x16x8xf32> to vector<16x8xf32>
    %162 = vector.extract_strided_slice %145 {offsets = [0, 3], sizes = [8, 96], strides = [1, 1]} : vector<8x160xf32> to vector<8x96xf32>
    %cst_111 = arith.constant dense<0.000000e+00> : vector<16x96xf32>
    %163 = tpu.matmul %161, %162, %cst_111 {dimension_numbers = #tpu.dot_dimension_numbers<[1], [0], [0], [1], [0, 0, 1, 1], [], []>} : vector<16x8xf32>, vector<8x96xf32>, vector<16x96xf32> -> vector<16x96xf32>
    %164 = arith.addf %159, %163 : vector<16x96xf32>
    %c4_112 = arith.constant 4 : index
    %c0_113 = arith.constant 0 : index
    %c0_114 = arith.constant 0 : index
    %165 = vector.load %arg5[%c4_112, %c0_113, %c0_114] : memref<25x16x8xf32, #tpu.memory_space<vmem>>, vector<1x16x8xf32>
    %166 = vector.shape_cast %165 : vector<1x16x8xf32> to vector<16x8xf32>
    %167 = vector.extract_strided_slice %145 {offsets = [0, 4], sizes = [8, 96], strides = [1, 1]} : vector<8x160xf32> to vector<8x96xf32>
    %cst_115 = arith.constant dense<0.000000e+00> : vector<16x96xf32>
    %168 = tpu.matmul %166, %167, %cst_115 {dimension_numbers = #tpu.dot_dimension_numbers<[1], [0], [0], [1], [0, 0, 1, 1], [], []>} : vector<16x8xf32>, vector<8x96xf32>, vector<16x96xf32> -> vector<16x96xf32>
    %169 = arith.addf %164, %168 : vector<16x96xf32>
    %c5_116 = arith.constant 5 : index
    %c0_117 = arith.constant 0 : index
    %c0_118 = arith.constant 0 : index
    %170 = vector.load %arg5[%c5_116, %c0_117, %c0_118] : memref<25x16x8xf32, #tpu.memory_space<vmem>>, vector<1x16x8xf32>
    %171 = vector.shape_cast %170 : vector<1x16x8xf32> to vector<16x8xf32>
    %172 = vector.extract_strided_slice %145 {offsets = [0, 12], sizes = [8, 96], strides = [1, 1]} : vector<8x160xf32> to vector<8x96xf32>
    %cst_119 = arith.constant dense<0.000000e+00> : vector<16x96xf32>
    %173 = tpu.matmul %171, %172, %cst_119 {dimension_numbers = #tpu.dot_dimension_numbers<[1], [0], [0], [1], [0, 0, 1, 1], [], []>} : vector<16x8xf32>, vector<8x96xf32>, vector<16x96xf32> -> vector<16x96xf32>
    %174 = arith.addf %169, %173 : vector<16x96xf32>
    %c6_120 = arith.constant 6 : index
    %c0_121 = arith.constant 0 : index
    %c0_122 = arith.constant 0 : index
    %175 = vector.load %arg5[%c6_120, %c0_121, %c0_122] : memref<25x16x8xf32, #tpu.memory_space<vmem>>, vector<1x16x8xf32>
    %176 = vector.shape_cast %175 : vector<1x16x8xf32> to vector<16x8xf32>
    %177 = vector.extract_strided_slice %145 {offsets = [0, 13], sizes = [8, 96], strides = [1, 1]} : vector<8x160xf32> to vector<8x96xf32>
    %cst_123 = arith.constant dense<0.000000e+00> : vector<16x96xf32>
    %178 = tpu.matmul %176, %177, %cst_123 {dimension_numbers = #tpu.dot_dimension_numbers<[1], [0], [0], [1], [0, 0, 1, 1], [], []>} : vector<16x8xf32>, vector<8x96xf32>, vector<16x96xf32> -> vector<16x96xf32>
    %179 = arith.addf %174, %178 : vector<16x96xf32>
    %c7_124 = arith.constant 7 : index
    %c0_125 = arith.constant 0 : index
    %c0_126 = arith.constant 0 : index
    %180 = vector.load %arg5[%c7_124, %c0_125, %c0_126] : memref<25x16x8xf32, #tpu.memory_space<vmem>>, vector<1x16x8xf32>
    %181 = vector.shape_cast %180 : vector<1x16x8xf32> to vector<16x8xf32>
    %182 = vector.extract_strided_slice %145 {offsets = [0, 14], sizes = [8, 96], strides = [1, 1]} : vector<8x160xf32> to vector<8x96xf32>
    %cst_127 = arith.constant dense<0.000000e+00> : vector<16x96xf32>
    %183 = tpu.matmul %181, %182, %cst_127 {dimension_numbers = #tpu.dot_dimension_numbers<[1], [0], [0], [1], [0, 0, 1, 1], [], []>} : vector<16x8xf32>, vector<8x96xf32>, vector<16x96xf32> -> vector<16x96xf32>
    %184 = arith.addf %179, %183 : vector<16x96xf32>
    %c8_128 = arith.constant 8 : index
    %c0_129 = arith.constant 0 : index
    %c0_130 = arith.constant 0 : index
    %185 = vector.load %arg5[%c8_128, %c0_129, %c0_130] : memref<25x16x8xf32, #tpu.memory_space<vmem>>, vector<1x16x8xf32>
    %186 = vector.shape_cast %185 : vector<1x16x8xf32> to vector<16x8xf32>
    %187 = vector.extract_strided_slice %145 {offsets = [0, 15], sizes = [8, 96], strides = [1, 1]} : vector<8x160xf32> to vector<8x96xf32>
    %cst_131 = arith.constant dense<0.000000e+00> : vector<16x96xf32>
    %188 = tpu.matmul %186, %187, %cst_131 {dimension_numbers = #tpu.dot_dimension_numbers<[1], [0], [0], [1], [0, 0, 1, 1], [], []>} : vector<16x8xf32>, vector<8x96xf32>, vector<16x96xf32> -> vector<16x96xf32>
    %189 = arith.addf %184, %188 : vector<16x96xf32>
    %c9_132 = arith.constant 9 : index
    %c0_133 = arith.constant 0 : index
    %c0_134 = arith.constant 0 : index
    %190 = vector.load %arg5[%c9_132, %c0_133, %c0_134] : memref<25x16x8xf32, #tpu.memory_space<vmem>>, vector<1x16x8xf32>
    %191 = vector.shape_cast %190 : vector<1x16x8xf32> to vector<16x8xf32>
    %192 = vector.extract_strided_slice %145 {offsets = [0, 16], sizes = [8, 96], strides = [1, 1]} : vector<8x160xf32> to vector<8x96xf32>
    %cst_135 = arith.constant dense<0.000000e+00> : vector<16x96xf32>
    %193 = tpu.matmul %191, %192, %cst_135 {dimension_numbers = #tpu.dot_dimension_numbers<[1], [0], [0], [1], [0, 0, 1, 1], [], []>} : vector<16x8xf32>, vector<8x96xf32>, vector<16x96xf32> -> vector<16x96xf32>
    %194 = arith.addf %189, %193 : vector<16x96xf32>
    %c10_136 = arith.constant 10 : index
    %c0_137 = arith.constant 0 : index
    %c0_138 = arith.constant 0 : index
    %195 = vector.load %arg5[%c10_136, %c0_137, %c0_138] : memref<25x16x8xf32, #tpu.memory_space<vmem>>, vector<1x16x8xf32>
    %196 = vector.shape_cast %195 : vector<1x16x8xf32> to vector<16x8xf32>
    %197 = vector.extract_strided_slice %145 {offsets = [0, 24], sizes = [8, 96], strides = [1, 1]} : vector<8x160xf32> to vector<8x96xf32>
    %cst_139 = arith.constant dense<0.000000e+00> : vector<16x96xf32>
    %198 = tpu.matmul %196, %197, %cst_139 {dimension_numbers = #tpu.dot_dimension_numbers<[1], [0], [0], [1], [0, 0, 1, 1], [], []>} : vector<16x8xf32>, vector<8x96xf32>, vector<16x96xf32> -> vector<16x96xf32>
    %199 = arith.addf %194, %198 : vector<16x96xf32>
    %c11_140 = arith.constant 11 : index
    %c0_141 = arith.constant 0 : index
    %c0_142 = arith.constant 0 : index
    %200 = vector.load %arg5[%c11_140, %c0_141, %c0_142] : memref<25x16x8xf32, #tpu.memory_space<vmem>>, vector<1x16x8xf32>
    %201 = vector.shape_cast %200 : vector<1x16x8xf32> to vector<16x8xf32>
    %202 = vector.extract_strided_slice %145 {offsets = [0, 25], sizes = [8, 96], strides = [1, 1]} : vector<8x160xf32> to vector<8x96xf32>
    %cst_143 = arith.constant dense<0.000000e+00> : vector<16x96xf32>
    %203 = tpu.matmul %201, %202, %cst_143 {dimension_numbers = #tpu.dot_dimension_numbers<[1], [0], [0], [1], [0, 0, 1, 1], [], []>} : vector<16x8xf32>, vector<8x96xf32>, vector<16x96xf32> -> vector<16x96xf32>
    %204 = arith.addf %199, %203 : vector<16x96xf32>
    %c12_144 = arith.constant 12 : index
    %c0_145 = arith.constant 0 : index
    %c0_146 = arith.constant 0 : index
    %205 = vector.load %arg5[%c12_144, %c0_145, %c0_146] : memref<25x16x8xf32, #tpu.memory_space<vmem>>, vector<1x16x8xf32>
    %206 = vector.shape_cast %205 : vector<1x16x8xf32> to vector<16x8xf32>
    %207 = vector.extract_strided_slice %145 {offsets = [0, 26], sizes = [8, 96], strides = [1, 1]} : vector<8x160xf32> to vector<8x96xf32>
    %cst_147 = arith.constant dense<0.000000e+00> : vector<16x96xf32>
    %208 = tpu.matmul %206, %207, %cst_147 {dimension_numbers = #tpu.dot_dimension_numbers<[1], [0], [0], [1], [0, 0, 1, 1], [], []>} : vector<16x8xf32>, vector<8x96xf32>, vector<16x96xf32> -> vector<16x96xf32>
    %209 = arith.addf %204, %208 : vector<16x96xf32>
    %c13_148 = arith.constant 13 : index
    %c0_149 = arith.constant 0 : index
    %c0_150 = arith.constant 0 : index
    %210 = vector.load %arg5[%c13_148, %c0_149, %c0_150] : memref<25x16x8xf32, #tpu.memory_space<vmem>>, vector<1x16x8xf32>
    %211 = vector.shape_cast %210 : vector<1x16x8xf32> to vector<16x8xf32>
    %212 = vector.extract_strided_slice %145 {offsets = [0, 27], sizes = [8, 96], strides = [1, 1]} : vector<8x160xf32> to vector<8x96xf32>
    %cst_151 = arith.constant dense<0.000000e+00> : vector<16x96xf32>
    %213 = tpu.matmul %211, %212, %cst_151 {dimension_numbers = #tpu.dot_dimension_numbers<[1], [0], [0], [1], [0, 0, 1, 1], [], []>} : vector<16x8xf32>, vector<8x96xf32>, vector<16x96xf32> -> vector<16x96xf32>
    %214 = arith.addf %209, %213 : vector<16x96xf32>
    %c14_152 = arith.constant 14 : index
    %c0_153 = arith.constant 0 : index
    %c0_154 = arith.constant 0 : index
    %215 = vector.load %arg5[%c14_152, %c0_153, %c0_154] : memref<25x16x8xf32, #tpu.memory_space<vmem>>, vector<1x16x8xf32>
    %216 = vector.shape_cast %215 : vector<1x16x8xf32> to vector<16x8xf32>
    %217 = vector.extract_strided_slice %145 {offsets = [0, 28], sizes = [8, 96], strides = [1, 1]} : vector<8x160xf32> to vector<8x96xf32>
    %cst_155 = arith.constant dense<0.000000e+00> : vector<16x96xf32>
    %218 = tpu.matmul %216, %217, %cst_155 {dimension_numbers = #tpu.dot_dimension_numbers<[1], [0], [0], [1], [0, 0, 1, 1], [], []>} : vector<16x8xf32>, vector<8x96xf32>, vector<16x96xf32> -> vector<16x96xf32>
    %219 = arith.addf %214, %218 : vector<16x96xf32>
    %c15_156 = arith.constant 15 : index
    %c0_157 = arith.constant 0 : index
    %c0_158 = arith.constant 0 : index
    %220 = vector.load %arg5[%c15_156, %c0_157, %c0_158] : memref<25x16x8xf32, #tpu.memory_space<vmem>>, vector<1x16x8xf32>
    %221 = vector.shape_cast %220 : vector<1x16x8xf32> to vector<16x8xf32>
    %222 = vector.extract_strided_slice %145 {offsets = [0, 36], sizes = [8, 96], strides = [1, 1]} : vector<8x160xf32> to vector<8x96xf32>
    %cst_159 = arith.constant dense<0.000000e+00> : vector<16x96xf32>
    %223 = tpu.matmul %221, %222, %cst_159 {dimension_numbers = #tpu.dot_dimension_numbers<[1], [0], [0], [1], [0, 0, 1, 1], [], []>} : vector<16x8xf32>, vector<8x96xf32>, vector<16x96xf32> -> vector<16x96xf32>
    %224 = arith.addf %219, %223 : vector<16x96xf32>
    %c16_160 = arith.constant 16 : index
    %c0_161 = arith.constant 0 : index
    %c0_162 = arith.constant 0 : index
    %225 = vector.load %arg5[%c16_160, %c0_161, %c0_162] : memref<25x16x8xf32, #tpu.memory_space<vmem>>, vector<1x16x8xf32>
    %226 = vector.shape_cast %225 : vector<1x16x8xf32> to vector<16x8xf32>
    %227 = vector.extract_strided_slice %145 {offsets = [0, 37], sizes = [8, 96], strides = [1, 1]} : vector<8x160xf32> to vector<8x96xf32>
    %cst_163 = arith.constant dense<0.000000e+00> : vector<16x96xf32>
    %228 = tpu.matmul %226, %227, %cst_163 {dimension_numbers = #tpu.dot_dimension_numbers<[1], [0], [0], [1], [0, 0, 1, 1], [], []>} : vector<16x8xf32>, vector<8x96xf32>, vector<16x96xf32> -> vector<16x96xf32>
    %229 = arith.addf %224, %228 : vector<16x96xf32>
    %c17_164 = arith.constant 17 : index
    %c0_165 = arith.constant 0 : index
    %c0_166 = arith.constant 0 : index
    %230 = vector.load %arg5[%c17_164, %c0_165, %c0_166] : memref<25x16x8xf32, #tpu.memory_space<vmem>>, vector<1x16x8xf32>
    %231 = vector.shape_cast %230 : vector<1x16x8xf32> to vector<16x8xf32>
    %232 = vector.extract_strided_slice %145 {offsets = [0, 38], sizes = [8, 96], strides = [1, 1]} : vector<8x160xf32> to vector<8x96xf32>
    %cst_167 = arith.constant dense<0.000000e+00> : vector<16x96xf32>
    %233 = tpu.matmul %231, %232, %cst_167 {dimension_numbers = #tpu.dot_dimension_numbers<[1], [0], [0], [1], [0, 0, 1, 1], [], []>} : vector<16x8xf32>, vector<8x96xf32>, vector<16x96xf32> -> vector<16x96xf32>
    %234 = arith.addf %229, %233 : vector<16x96xf32>
    %c18_168 = arith.constant 18 : index
    %c0_169 = arith.constant 0 : index
    %c0_170 = arith.constant 0 : index
    %235 = vector.load %arg5[%c18_168, %c0_169, %c0_170] : memref<25x16x8xf32, #tpu.memory_space<vmem>>, vector<1x16x8xf32>
    %236 = vector.shape_cast %235 : vector<1x16x8xf32> to vector<16x8xf32>
    %237 = vector.extract_strided_slice %145 {offsets = [0, 39], sizes = [8, 96], strides = [1, 1]} : vector<8x160xf32> to vector<8x96xf32>
    %cst_171 = arith.constant dense<0.000000e+00> : vector<16x96xf32>
    %238 = tpu.matmul %236, %237, %cst_171 {dimension_numbers = #tpu.dot_dimension_numbers<[1], [0], [0], [1], [0, 0, 1, 1], [], []>} : vector<16x8xf32>, vector<8x96xf32>, vector<16x96xf32> -> vector<16x96xf32>
    %239 = arith.addf %234, %238 : vector<16x96xf32>
    %c19_172 = arith.constant 19 : index
    %c0_173 = arith.constant 0 : index
    %c0_174 = arith.constant 0 : index
    %240 = vector.load %arg5[%c19_172, %c0_173, %c0_174] : memref<25x16x8xf32, #tpu.memory_space<vmem>>, vector<1x16x8xf32>
    %241 = vector.shape_cast %240 : vector<1x16x8xf32> to vector<16x8xf32>
    %242 = vector.extract_strided_slice %145 {offsets = [0, 40], sizes = [8, 96], strides = [1, 1]} : vector<8x160xf32> to vector<8x96xf32>
    %cst_175 = arith.constant dense<0.000000e+00> : vector<16x96xf32>
    %243 = tpu.matmul %241, %242, %cst_175 {dimension_numbers = #tpu.dot_dimension_numbers<[1], [0], [0], [1], [0, 0, 1, 1], [], []>} : vector<16x8xf32>, vector<8x96xf32>, vector<16x96xf32> -> vector<16x96xf32>
    %244 = arith.addf %239, %243 : vector<16x96xf32>
    %c20_176 = arith.constant 20 : index
    %c0_177 = arith.constant 0 : index
    %c0_178 = arith.constant 0 : index
    %245 = vector.load %arg5[%c20_176, %c0_177, %c0_178] : memref<25x16x8xf32, #tpu.memory_space<vmem>>, vector<1x16x8xf32>
    %246 = vector.shape_cast %245 : vector<1x16x8xf32> to vector<16x8xf32>
    %247 = vector.extract_strided_slice %145 {offsets = [0, 48], sizes = [8, 96], strides = [1, 1]} : vector<8x160xf32> to vector<8x96xf32>
    %cst_179 = arith.constant dense<0.000000e+00> : vector<16x96xf32>
    %248 = tpu.matmul %246, %247, %cst_179 {dimension_numbers = #tpu.dot_dimension_numbers<[1], [0], [0], [1], [0, 0, 1, 1], [], []>} : vector<16x8xf32>, vector<8x96xf32>, vector<16x96xf32> -> vector<16x96xf32>
    %249 = arith.addf %244, %248 : vector<16x96xf32>
    %c21_180 = arith.constant 21 : index
    %c0_181 = arith.constant 0 : index
    %c0_182 = arith.constant 0 : index
    %250 = vector.load %arg5[%c21_180, %c0_181, %c0_182] : memref<25x16x8xf32, #tpu.memory_space<vmem>>, vector<1x16x8xf32>
    %251 = vector.shape_cast %250 : vector<1x16x8xf32> to vector<16x8xf32>
    %252 = vector.extract_strided_slice %145 {offsets = [0, 49], sizes = [8, 96], strides = [1, 1]} : vector<8x160xf32> to vector<8x96xf32>
    %cst_183 = arith.constant dense<0.000000e+00> : vector<16x96xf32>
    %253 = tpu.matmul %251, %252, %cst_183 {dimension_numbers = #tpu.dot_dimension_numbers<[1], [0], [0], [1], [0, 0, 1, 1], [], []>} : vector<16x8xf32>, vector<8x96xf32>, vector<16x96xf32> -> vector<16x96xf32>
    %254 = arith.addf %249, %253 : vector<16x96xf32>
    %c22_184 = arith.constant 22 : index
    %c0_185 = arith.constant 0 : index
    %c0_186 = arith.constant 0 : index
    %255 = vector.load %arg5[%c22_184, %c0_185, %c0_186] : memref<25x16x8xf32, #tpu.memory_space<vmem>>, vector<1x16x8xf32>
    %256 = vector.shape_cast %255 : vector<1x16x8xf32> to vector<16x8xf32>
    %257 = vector.extract_strided_slice %145 {offsets = [0, 50], sizes = [8, 96], strides = [1, 1]} : vector<8x160xf32> to vector<8x96xf32>
    %cst_187 = arith.constant dense<0.000000e+00> : vector<16x96xf32>
    %258 = tpu.matmul %256, %257, %cst_187 {dimension_numbers = #tpu.dot_dimension_numbers<[1], [0], [0], [1], [0, 0, 1, 1], [], []>} : vector<16x8xf32>, vector<8x96xf32>, vector<16x96xf32> -> vector<16x96xf32>
    %259 = arith.addf %254, %258 : vector<16x96xf32>
    %c23_188 = arith.constant 23 : index
    %c0_189 = arith.constant 0 : index
    %c0_190 = arith.constant 0 : index
    %260 = vector.load %arg5[%c23_188, %c0_189, %c0_190] : memref<25x16x8xf32, #tpu.memory_space<vmem>>, vector<1x16x8xf32>
    %261 = vector.shape_cast %260 : vector<1x16x8xf32> to vector<16x8xf32>
    %262 = vector.extract_strided_slice %145 {offsets = [0, 51], sizes = [8, 96], strides = [1, 1]} : vector<8x160xf32> to vector<8x96xf32>
    %cst_191 = arith.constant dense<0.000000e+00> : vector<16x96xf32>
    %263 = tpu.matmul %261, %262, %cst_191 {dimension_numbers = #tpu.dot_dimension_numbers<[1], [0], [0], [1], [0, 0, 1, 1], [], []>} : vector<16x8xf32>, vector<8x96xf32>, vector<16x96xf32> -> vector<16x96xf32>
    %264 = arith.addf %259, %263 : vector<16x96xf32>
    %c24_192 = arith.constant 24 : index
    %c0_193 = arith.constant 0 : index
    %c0_194 = arith.constant 0 : index
    %265 = vector.load %arg5[%c24_192, %c0_193, %c0_194] : memref<25x16x8xf32, #tpu.memory_space<vmem>>, vector<1x16x8xf32>
    %266 = vector.shape_cast %265 : vector<1x16x8xf32> to vector<16x8xf32>
    %267 = vector.extract_strided_slice %145 {offsets = [0, 52], sizes = [8, 96], strides = [1, 1]} : vector<8x160xf32> to vector<8x96xf32>
    %cst_195 = arith.constant dense<0.000000e+00> : vector<16x96xf32>
    %268 = tpu.matmul %266, %267, %cst_195 {dimension_numbers = #tpu.dot_dimension_numbers<[1], [0], [0], [1], [0, 0, 1, 1], [], []>} : vector<16x8xf32>, vector<8x96xf32>, vector<16x96xf32> -> vector<16x96xf32>
    %269 = arith.addf %264, %268 : vector<16x96xf32>
    %c0_196 = arith.constant 0 : index
    %c0_197 = arith.constant 0 : index
    %270 = vector.load %arg6[%c0_196, %c0_197] : memref<16x1xf32, #tpu.memory_space<vmem>>, vector<16x1xf32>
    %271 = vector.broadcast %270 : vector<16x1xf32> to vector<16x96xf32>
    %272 = arith.addf %269, %271 : vector<16x96xf32>
    %cst_198 = arith.constant 0.000000e+00 : f32
    %273 = vector.broadcast %cst_198 : f32 to vector<16x96xf32>
    %274 = arith.maximumf %272, %273 : vector<16x96xf32>
    %c0_199 = arith.constant 0 : index
    %c0_200 = arith.constant 0 : index
    %c0_201 = arith.constant 0 : index
    %275 = vector.load %arg7[%c0_199, %c0_200, %c0_201] : memref<4x96x16xf32, #tpu.memory_space<vmem>>, vector<1x96x16xf32>
    %276 = vector.shape_cast %275 : vector<1x96x16xf32> to vector<96x16xf32>
    %cst_202 = arith.constant dense<0.000000e+00> : vector<16x16xf32>
    %277 = tpu.matmul %274, %276, %cst_202 {dimension_numbers = #tpu.dot_dimension_numbers<[1], [0], [0], [1], [0, 0, 1, 1], [], []>} : vector<16x96xf32>, vector<96x16xf32>, vector<16x16xf32> -> vector<16x16xf32>
    %c1_203 = arith.constant 1 : index
    %c0_204 = arith.constant 0 : index
    %c0_205 = arith.constant 0 : index
    %278 = vector.load %arg7[%c1_203, %c0_204, %c0_205] : memref<4x96x16xf32, #tpu.memory_space<vmem>>, vector<1x96x16xf32>
    %279 = vector.shape_cast %278 : vector<1x96x16xf32> to vector<96x16xf32>
    %cst_206 = arith.constant dense<0.000000e+00> : vector<16x16xf32>
    %280 = tpu.matmul %274, %279, %cst_206 {dimension_numbers = #tpu.dot_dimension_numbers<[1], [0], [0], [1], [0, 0, 1, 1], [], []>} : vector<16x96xf32>, vector<96x16xf32>, vector<16x16xf32> -> vector<16x16xf32>
    %281 = arith.maximumf %277, %280 : vector<16x16xf32>
    %c2_207 = arith.constant 2 : index
    %c0_208 = arith.constant 0 : index
    %c0_209 = arith.constant 0 : index
    %282 = vector.load %arg7[%c2_207, %c0_208, %c0_209] : memref<4x96x16xf32, #tpu.memory_space<vmem>>, vector<1x96x16xf32>
    %283 = vector.shape_cast %282 : vector<1x96x16xf32> to vector<96x16xf32>
    %cst_210 = arith.constant dense<0.000000e+00> : vector<16x16xf32>
    %284 = tpu.matmul %274, %283, %cst_210 {dimension_numbers = #tpu.dot_dimension_numbers<[1], [0], [0], [1], [0, 0, 1, 1], [], []>} : vector<16x96xf32>, vector<96x16xf32>, vector<16x16xf32> -> vector<16x16xf32>
    %285 = arith.maximumf %281, %284 : vector<16x16xf32>
    %c3_211 = arith.constant 3 : index
    %c0_212 = arith.constant 0 : index
    %c0_213 = arith.constant 0 : index
    %286 = vector.load %arg7[%c3_211, %c0_212, %c0_213] : memref<4x96x16xf32, #tpu.memory_space<vmem>>, vector<1x96x16xf32>
    %287 = vector.shape_cast %286 : vector<1x96x16xf32> to vector<96x16xf32>
    %cst_214 = arith.constant dense<0.000000e+00> : vector<16x16xf32>
    %288 = tpu.matmul %274, %287, %cst_214 {dimension_numbers = #tpu.dot_dimension_numbers<[1], [0], [0], [1], [0, 0, 1, 1], [], []>} : vector<16x96xf32>, vector<96x16xf32>, vector<16x16xf32> -> vector<16x16xf32>
    %289 = arith.maximumf %285, %288 : vector<16x16xf32>
    %290 = vector.extract_strided_slice %289 {offsets = [0, 0], sizes = [1, 16], strides = [1, 1]} : vector<16x16xf32> to vector<1x16xf32>
    %c0_215 = arith.constant 0 : index
    %c0_216 = arith.constant 0 : index
    %c0_217 = arith.constant 0 : index
    %291 = vector.load %arg8[%c0_215, %c0_216, %c0_217] : memref<16x16x16xf32, #tpu.memory_space<vmem>>, vector<1x16x16xf32>
    %292 = vector.shape_cast %291 : vector<1x16x16xf32> to vector<16x16xf32>
    %cst_218 = arith.constant dense<0.000000e+00> : vector<1x16xf32>
    %293 = tpu.matmul %290, %292, %cst_218 {dimension_numbers = #tpu.dot_dimension_numbers<[1], [0], [0], [1], [0, 0, 1, 1], [], []>} : vector<1x16xf32>, vector<16x16xf32>, vector<1x16xf32> -> vector<1x16xf32>
    %294 = vector.extract_strided_slice %289 {offsets = [1, 0], sizes = [1, 16], strides = [1, 1]} : vector<16x16xf32> to vector<1x16xf32>
    %c1_219 = arith.constant 1 : index
    %c0_220 = arith.constant 0 : index
    %c0_221 = arith.constant 0 : index
    %295 = vector.load %arg8[%c1_219, %c0_220, %c0_221] : memref<16x16x16xf32, #tpu.memory_space<vmem>>, vector<1x16x16xf32>
    %296 = vector.shape_cast %295 : vector<1x16x16xf32> to vector<16x16xf32>
    %cst_222 = arith.constant dense<0.000000e+00> : vector<1x16xf32>
    %297 = tpu.matmul %294, %296, %cst_222 {dimension_numbers = #tpu.dot_dimension_numbers<[1], [0], [0], [1], [0, 0, 1, 1], [], []>} : vector<1x16xf32>, vector<16x16xf32>, vector<1x16xf32> -> vector<1x16xf32>
    %298 = arith.addf %293, %297 : vector<1x16xf32>
    %299 = vector.extract_strided_slice %289 {offsets = [2, 0], sizes = [1, 16], strides = [1, 1]} : vector<16x16xf32> to vector<1x16xf32>
    %c2_223 = arith.constant 2 : index
    %c0_224 = arith.constant 0 : index
    %c0_225 = arith.constant 0 : index
    %300 = vector.load %arg8[%c2_223, %c0_224, %c0_225] : memref<16x16x16xf32, #tpu.memory_space<vmem>>, vector<1x16x16xf32>
    %301 = vector.shape_cast %300 : vector<1x16x16xf32> to vector<16x16xf32>
    %cst_226 = arith.constant dense<0.000000e+00> : vector<1x16xf32>
    %302 = tpu.matmul %299, %301, %cst_226 {dimension_numbers = #tpu.dot_dimension_numbers<[1], [0], [0], [1], [0, 0, 1, 1], [], []>} : vector<1x16xf32>, vector<16x16xf32>, vector<1x16xf32> -> vector<1x16xf32>
    %303 = arith.addf %298, %302 : vector<1x16xf32>
    %304 = vector.extract_strided_slice %289 {offsets = [3, 0], sizes = [1, 16], strides = [1, 1]} : vector<16x16xf32> to vector<1x16xf32>
    %c3_227 = arith.constant 3 : index
    %c0_228 = arith.constant 0 : index
    %c0_229 = arith.constant 0 : index
    %305 = vector.load %arg8[%c3_227, %c0_228, %c0_229] : memref<16x16x16xf32, #tpu.memory_space<vmem>>, vector<1x16x16xf32>
    %306 = vector.shape_cast %305 : vector<1x16x16xf32> to vector<16x16xf32>
    %cst_230 = arith.constant dense<0.000000e+00> : vector<1x16xf32>
    %307 = tpu.matmul %304, %306, %cst_230 {dimension_numbers = #tpu.dot_dimension_numbers<[1], [0], [0], [1], [0, 0, 1, 1], [], []>} : vector<1x16xf32>, vector<16x16xf32>, vector<1x16xf32> -> vector<1x16xf32>
    %308 = arith.addf %303, %307 : vector<1x16xf32>
    %309 = vector.extract_strided_slice %289 {offsets = [4, 0], sizes = [1, 16], strides = [1, 1]} : vector<16x16xf32> to vector<1x16xf32>
    %c4_231 = arith.constant 4 : index
    %c0_232 = arith.constant 0 : index
    %c0_233 = arith.constant 0 : index
    %310 = vector.load %arg8[%c4_231, %c0_232, %c0_233] : memref<16x16x16xf32, #tpu.memory_space<vmem>>, vector<1x16x16xf32>
    %311 = vector.shape_cast %310 : vector<1x16x16xf32> to vector<16x16xf32>
    %cst_234 = arith.constant dense<0.000000e+00> : vector<1x16xf32>
    %312 = tpu.matmul %309, %311, %cst_234 {dimension_numbers = #tpu.dot_dimension_numbers<[1], [0], [0], [1], [0, 0, 1, 1], [], []>} : vector<1x16xf32>, vector<16x16xf32>, vector<1x16xf32> -> vector<1x16xf32>
    %313 = arith.addf %308, %312 : vector<1x16xf32>
    %314 = vector.extract_strided_slice %289 {offsets = [5, 0], sizes = [1, 16], strides = [1, 1]} : vector<16x16xf32> to vector<1x16xf32>
    %c5_235 = arith.constant 5 : index
    %c0_236 = arith.constant 0 : index
    %c0_237 = arith.constant 0 : index
    %315 = vector.load %arg8[%c5_235, %c0_236, %c0_237] : memref<16x16x16xf32, #tpu.memory_space<vmem>>, vector<1x16x16xf32>
    %316 = vector.shape_cast %315 : vector<1x16x16xf32> to vector<16x16xf32>
    %cst_238 = arith.constant dense<0.000000e+00> : vector<1x16xf32>
    %317 = tpu.matmul %314, %316, %cst_238 {dimension_numbers = #tpu.dot_dimension_numbers<[1], [0], [0], [1], [0, 0, 1, 1], [], []>} : vector<1x16xf32>, vector<16x16xf32>, vector<1x16xf32> -> vector<1x16xf32>
    %318 = arith.addf %313, %317 : vector<1x16xf32>
    %319 = vector.extract_strided_slice %289 {offsets = [6, 0], sizes = [1, 16], strides = [1, 1]} : vector<16x16xf32> to vector<1x16xf32>
    %c6_239 = arith.constant 6 : index
    %c0_240 = arith.constant 0 : index
    %c0_241 = arith.constant 0 : index
    %320 = vector.load %arg8[%c6_239, %c0_240, %c0_241] : memref<16x16x16xf32, #tpu.memory_space<vmem>>, vector<1x16x16xf32>
    %321 = vector.shape_cast %320 : vector<1x16x16xf32> to vector<16x16xf32>
    %cst_242 = arith.constant dense<0.000000e+00> : vector<1x16xf32>
    %322 = tpu.matmul %319, %321, %cst_242 {dimension_numbers = #tpu.dot_dimension_numbers<[1], [0], [0], [1], [0, 0, 1, 1], [], []>} : vector<1x16xf32>, vector<16x16xf32>, vector<1x16xf32> -> vector<1x16xf32>
    %323 = arith.addf %318, %322 : vector<1x16xf32>
    %324 = vector.extract_strided_slice %289 {offsets = [7, 0], sizes = [1, 16], strides = [1, 1]} : vector<16x16xf32> to vector<1x16xf32>
    %c7_243 = arith.constant 7 : index
    %c0_244 = arith.constant 0 : index
    %c0_245 = arith.constant 0 : index
    %325 = vector.load %arg8[%c7_243, %c0_244, %c0_245] : memref<16x16x16xf32, #tpu.memory_space<vmem>>, vector<1x16x16xf32>
    %326 = vector.shape_cast %325 : vector<1x16x16xf32> to vector<16x16xf32>
    %cst_246 = arith.constant dense<0.000000e+00> : vector<1x16xf32>
    %327 = tpu.matmul %324, %326, %cst_246 {dimension_numbers = #tpu.dot_dimension_numbers<[1], [0], [0], [1], [0, 0, 1, 1], [], []>} : vector<1x16xf32>, vector<16x16xf32>, vector<1x16xf32> -> vector<1x16xf32>
    %328 = arith.addf %323, %327 : vector<1x16xf32>
    %329 = vector.extract_strided_slice %289 {offsets = [8, 0], sizes = [1, 16], strides = [1, 1]} : vector<16x16xf32> to vector<1x16xf32>
    %c8_247 = arith.constant 8 : index
    %c0_248 = arith.constant 0 : index
    %c0_249 = arith.constant 0 : index
    %330 = vector.load %arg8[%c8_247, %c0_248, %c0_249] : memref<16x16x16xf32, #tpu.memory_space<vmem>>, vector<1x16x16xf32>
    %331 = vector.shape_cast %330 : vector<1x16x16xf32> to vector<16x16xf32>
    %cst_250 = arith.constant dense<0.000000e+00> : vector<1x16xf32>
    %332 = tpu.matmul %329, %331, %cst_250 {dimension_numbers = #tpu.dot_dimension_numbers<[1], [0], [0], [1], [0, 0, 1, 1], [], []>} : vector<1x16xf32>, vector<16x16xf32>, vector<1x16xf32> -> vector<1x16xf32>
    %333 = arith.addf %328, %332 : vector<1x16xf32>
    %334 = vector.extract_strided_slice %289 {offsets = [9, 0], sizes = [1, 16], strides = [1, 1]} : vector<16x16xf32> to vector<1x16xf32>
    %c9_251 = arith.constant 9 : index
    %c0_252 = arith.constant 0 : index
    %c0_253 = arith.constant 0 : index
    %335 = vector.load %arg8[%c9_251, %c0_252, %c0_253] : memref<16x16x16xf32, #tpu.memory_space<vmem>>, vector<1x16x16xf32>
    %336 = vector.shape_cast %335 : vector<1x16x16xf32> to vector<16x16xf32>
    %cst_254 = arith.constant dense<0.000000e+00> : vector<1x16xf32>
    %337 = tpu.matmul %334, %336, %cst_254 {dimension_numbers = #tpu.dot_dimension_numbers<[1], [0], [0], [1], [0, 0, 1, 1], [], []>} : vector<1x16xf32>, vector<16x16xf32>, vector<1x16xf32> -> vector<1x16xf32>
    %338 = arith.addf %333, %337 : vector<1x16xf32>
    %339 = vector.extract_strided_slice %289 {offsets = [10, 0], sizes = [1, 16], strides = [1, 1]} : vector<16x16xf32> to vector<1x16xf32>
    %c10_255 = arith.constant 10 : index
    %c0_256 = arith.constant 0 : index
    %c0_257 = arith.constant 0 : index
    %340 = vector.load %arg8[%c10_255, %c0_256, %c0_257] : memref<16x16x16xf32, #tpu.memory_space<vmem>>, vector<1x16x16xf32>
    %341 = vector.shape_cast %340 : vector<1x16x16xf32> to vector<16x16xf32>
    %cst_258 = arith.constant dense<0.000000e+00> : vector<1x16xf32>
    %342 = tpu.matmul %339, %341, %cst_258 {dimension_numbers = #tpu.dot_dimension_numbers<[1], [0], [0], [1], [0, 0, 1, 1], [], []>} : vector<1x16xf32>, vector<16x16xf32>, vector<1x16xf32> -> vector<1x16xf32>
    %343 = arith.addf %338, %342 : vector<1x16xf32>
    %344 = vector.extract_strided_slice %289 {offsets = [11, 0], sizes = [1, 16], strides = [1, 1]} : vector<16x16xf32> to vector<1x16xf32>
    %c11_259 = arith.constant 11 : index
    %c0_260 = arith.constant 0 : index
    %c0_261 = arith.constant 0 : index
    %345 = vector.load %arg8[%c11_259, %c0_260, %c0_261] : memref<16x16x16xf32, #tpu.memory_space<vmem>>, vector<1x16x16xf32>
    %346 = vector.shape_cast %345 : vector<1x16x16xf32> to vector<16x16xf32>
    %cst_262 = arith.constant dense<0.000000e+00> : vector<1x16xf32>
    %347 = tpu.matmul %344, %346, %cst_262 {dimension_numbers = #tpu.dot_dimension_numbers<[1], [0], [0], [1], [0, 0, 1, 1], [], []>} : vector<1x16xf32>, vector<16x16xf32>, vector<1x16xf32> -> vector<1x16xf32>
    %348 = arith.addf %343, %347 : vector<1x16xf32>
    %349 = vector.extract_strided_slice %289 {offsets = [12, 0], sizes = [1, 16], strides = [1, 1]} : vector<16x16xf32> to vector<1x16xf32>
    %c12_263 = arith.constant 12 : index
    %c0_264 = arith.constant 0 : index
    %c0_265 = arith.constant 0 : index
    %350 = vector.load %arg8[%c12_263, %c0_264, %c0_265] : memref<16x16x16xf32, #tpu.memory_space<vmem>>, vector<1x16x16xf32>
    %351 = vector.shape_cast %350 : vector<1x16x16xf32> to vector<16x16xf32>
    %cst_266 = arith.constant dense<0.000000e+00> : vector<1x16xf32>
    %352 = tpu.matmul %349, %351, %cst_266 {dimension_numbers = #tpu.dot_dimension_numbers<[1], [0], [0], [1], [0, 0, 1, 1], [], []>} : vector<1x16xf32>, vector<16x16xf32>, vector<1x16xf32> -> vector<1x16xf32>
    %353 = arith.addf %348, %352 : vector<1x16xf32>
    %354 = vector.extract_strided_slice %289 {offsets = [13, 0], sizes = [1, 16], strides = [1, 1]} : vector<16x16xf32> to vector<1x16xf32>
    %c13_267 = arith.constant 13 : index
    %c0_268 = arith.constant 0 : index
    %c0_269 = arith.constant 0 : index
    %355 = vector.load %arg8[%c13_267, %c0_268, %c0_269] : memref<16x16x16xf32, #tpu.memory_space<vmem>>, vector<1x16x16xf32>
    %356 = vector.shape_cast %355 : vector<1x16x16xf32> to vector<16x16xf32>
    %cst_270 = arith.constant dense<0.000000e+00> : vector<1x16xf32>
    %357 = tpu.matmul %354, %356, %cst_270 {dimension_numbers = #tpu.dot_dimension_numbers<[1], [0], [0], [1], [0, 0, 1, 1], [], []>} : vector<1x16xf32>, vector<16x16xf32>, vector<1x16xf32> -> vector<1x16xf32>
    %358 = arith.addf %353, %357 : vector<1x16xf32>
    %359 = vector.extract_strided_slice %289 {offsets = [14, 0], sizes = [1, 16], strides = [1, 1]} : vector<16x16xf32> to vector<1x16xf32>
    %c14_271 = arith.constant 14 : index
    %c0_272 = arith.constant 0 : index
    %c0_273 = arith.constant 0 : index
    %360 = vector.load %arg8[%c14_271, %c0_272, %c0_273] : memref<16x16x16xf32, #tpu.memory_space<vmem>>, vector<1x16x16xf32>
    %361 = vector.shape_cast %360 : vector<1x16x16xf32> to vector<16x16xf32>
    %cst_274 = arith.constant dense<0.000000e+00> : vector<1x16xf32>
    %362 = tpu.matmul %359, %361, %cst_274 {dimension_numbers = #tpu.dot_dimension_numbers<[1], [0], [0], [1], [0, 0, 1, 1], [], []>} : vector<1x16xf32>, vector<16x16xf32>, vector<1x16xf32> -> vector<1x16xf32>
    %363 = arith.addf %358, %362 : vector<1x16xf32>
    %364 = vector.extract_strided_slice %289 {offsets = [15, 0], sizes = [1, 16], strides = [1, 1]} : vector<16x16xf32> to vector<1x16xf32>
    %c15_275 = arith.constant 15 : index
    %c0_276 = arith.constant 0 : index
    %c0_277 = arith.constant 0 : index
    %365 = vector.load %arg8[%c15_275, %c0_276, %c0_277] : memref<16x16x16xf32, #tpu.memory_space<vmem>>, vector<1x16x16xf32>
    %366 = vector.shape_cast %365 : vector<1x16x16xf32> to vector<16x16xf32>
    %cst_278 = arith.constant dense<0.000000e+00> : vector<1x16xf32>
    %367 = tpu.matmul %364, %366, %cst_278 {dimension_numbers = #tpu.dot_dimension_numbers<[1], [0], [0], [1], [0, 0, 1, 1], [], []>} : vector<1x16xf32>, vector<16x16xf32>, vector<1x16xf32> -> vector<1x16xf32>
    %368 = arith.addf %363, %367 : vector<1x16xf32>
    %c0_279 = arith.constant 0 : index
    %c0_280 = arith.constant 0 : index
    %369 = vector.load %arg9[%c0_279, %c0_280] : memref<1x16xf32, #tpu.memory_space<vmem>>, vector<1x16xf32>
    %370 = arith.addf %368, %369 : vector<1x16xf32>
    %cst_281 = arith.constant 0.000000e+00 : f32
    %371 = vector.broadcast %cst_281 : f32 to vector<1x16xf32>
    %372 = arith.maximumf %370, %371 : vector<1x16xf32>
    %c0_282 = arith.constant 0 : index
    %c0_283 = arith.constant 0 : index
    %373 = vector.load %arg10[%c0_282, %c0_283] : memref<16x13xf32, #tpu.memory_space<vmem>>, vector<16x13xf32>
    %cst_284 = arith.constant dense<0.000000e+00> : vector<1x13xf32>
    %374 = tpu.matmul %372, %373, %cst_284 {dimension_numbers = #tpu.dot_dimension_numbers<[1], [0], [0], [1], [0, 0, 1, 1], [], []>} : vector<1x16xf32>, vector<16x13xf32>, vector<1x13xf32> -> vector<1x13xf32>
    %c0_285 = arith.constant 0 : index
    %c0_286 = arith.constant 0 : index
    %375 = vector.load %arg11[%c0_285, %c0_286] : memref<1x13xf32, #tpu.memory_space<vmem>>, vector<1x13xf32>
    %376 = arith.addf %374, %375 : vector<1x13xf32>
    %cst_287 = arith.constant dense<0xFF800000> : vector<1xf32>
    %377 = vector.multi_reduction <maximumf>, %376, %cst_287 [1] : vector<1x13xf32> to vector<1xf32>
    %378 = vector.shape_cast %377 : vector<1xf32> to vector<1x1xf32>
    %379 = vector.broadcast %378 : vector<1x1xf32> to vector<1x13xf32>
    %380 = arith.subf %376, %379 : vector<1x13xf32>
    %381 = math.exp %380 : vector<1x13xf32>
    %cst_288 = arith.constant dense<0.000000e+00> : vector<1xf32>
    %382 = vector.multi_reduction <add>, %381, %cst_288 [1] : vector<1x13xf32> to vector<1xf32>
    %383 = vector.shape_cast %382 : vector<1xf32> to vector<1x1xf32>
    %384 = vector.broadcast %383 : vector<1x1xf32> to vector<1x13xf32>
    %385 = arith.divf %381, %384 : vector<1x13xf32>
    %c0_289 = arith.constant 0 : index
    %c0_290 = arith.constant 0 : index
    %c0_291 = arith.constant 0 : index
    %386 = vector.load %arg12[%c0_289, %c0_290, %c0_291] : memref<1x1x13xf32, #tpu.memory_space<vmem>>, vector<1x1x13xf32>
    %387 = vector.shape_cast %386 : vector<1x1x13xf32> to vector<1x13xf32>
    %388 = vector.shape_cast %385 : vector<1x13xf32> to vector<1x1x13xf32>
    tpu.vector_store %arg12[%c0_289, %c0_290, %c0_291], %388 {strides = array<i32>} : memref<1x1x13xf32, #tpu.memory_space<vmem>>, vector<1x1x13xf32>,
    return
  }
  func.func @transform_0(%arg0: i32) -> (i32, i32, i32) {
    %c0_i32 = arith.constant 0 : i32
    %c0_i32_0 = arith.constant 0 : i32
    %c0_i32_1 = arith.constant 0 : i32
    return %arg0, %c0_i32, %c0_i32_0 : i32, i32, i32
  }
  func.func @transform_1(%arg0: i32) -> (i32, i32, i32) {
    %c0_i32 = arith.constant 0 : i32
    %c0_i32_0 = arith.constant 0 : i32
    %c0_i32_1 = arith.constant 0 : i32
    %c0_i32_2 = arith.constant 0 : i32
    return %c0_i32, %c0_i32_0, %c0_i32_1 : i32, i32, i32
  }
  func.func @transform_2(%arg0: i32) -> (i32, i32) {
    %c0_i32 = arith.constant 0 : i32
    %c0_i32_0 = arith.constant 0 : i32
    %c0_i32_1 = arith.constant 0 : i32
    return %c0_i32, %c0_i32_0 : i32, i32
  }
  func.func @transform_3(%arg0: i32) -> (i32, i32, i32) {
    %c0_i32 = arith.constant 0 : i32
    %c0_i32_0 = arith.constant 0 : i32
    %c0_i32_1 = arith.constant 0 : i32
    %c0_i32_2 = arith.constant 0 : i32
    return %c0_i32, %c0_i32_0, %c0_i32_1 : i32, i32, i32
  }
  func.func @transform_4(%arg0: i32) -> (i32, i32, i32) {
    %c0_i32 = arith.constant 0 : i32
    %c0_i32_0 = arith.constant 0 : i32
    %c0_i32_1 = arith.constant 0 : i32
    %c0_i32_2 = arith.constant 0 : i32
    return %c0_i32, %c0_i32_0, %c0_i32_1 : i32, i32, i32
  }
  func.func @transform_5(%arg0: i32) -> (i32, i32) {
    %c0_i32 = arith.constant 0 : i32
    %c0_i32_0 = arith.constant 0 : i32
    %c0_i32_1 = arith.constant 0 : i32
    return %c0_i32, %c0_i32_0 : i32, i32
  }
  func.func @transform_6(%arg0: i32) -> (i32, i32, i32) {
    %c0_i32 = arith.constant 0 : i32
    %c0_i32_0 = arith.constant 0 : i32
    %c0_i32_1 = arith.constant 0 : i32
    %c0_i32_2 = arith.constant 0 : i32
    return %c0_i32, %c0_i32_0, %c0_i32_1 : i32, i32, i32
  }
  func.func @transform_7(%arg0: i32) -> (i32, i32, i32) {
    %c0_i32 = arith.constant 0 : i32
    %c0_i32_0 = arith.constant 0 : i32
    %c0_i32_1 = arith.constant 0 : i32
    %c0_i32_2 = arith.constant 0 : i32
    return %c0_i32, %c0_i32_0, %c0_i32_1 : i32, i32, i32
  }
  func.func @transform_8(%arg0: i32) -> (i32, i32) {
    %c0_i32 = arith.constant 0 : i32
    %c0_i32_0 = arith.constant 0 : i32
    %c0_i32_1 = arith.constant 0 : i32
    return %c0_i32, %c0_i32_0 : i32, i32
  }
  func.func @transform_9(%arg0: i32) -> (i32, i32) {
    %c0_i32 = arith.constant 0 : i32
    %c0_i32_0 = arith.constant 0 : i32
    %c0_i32_1 = arith.constant 0 : i32
    return %c0_i32, %c0_i32_0 : i32, i32
  }
  func.func @transform_10(%arg0: i32) -> (i32, i32) {
    %c0_i32 = arith.constant 0 : i32
    %c0_i32_0 = arith.constant 0 : i32
    %c0_i32_1 = arith.constant 0 : i32
    return %c0_i32, %c0_i32_0 : i32, i32
  }
  func.func @transform_11(%arg0: i32) -> (i32, i32, i32) {
    %c0_i32 = arith.constant 0 : i32
    %c0_i32_0 = arith.constant 0 : i32
    %c0_i32_1 = arith.constant 0 : i32
    return %arg0, %c0_i32, %c0_i32_0 : i32, i32, i32
  }
}

</mosaic_0001>

<bundles_post_ra>
// kernel: net_forward.1
= control target key start
LH: loop header
LB: loop body
LE: loop exit
PB: predicated region body
PF: predicated region fallthrough
CT: control target
= control target key end

     0   :  { %s19009_s0 = inlined_call_operand.vmem [shape: f32[2,3,896], index: 0, kind: input, shape index: {}]   ;;  %s19010_s1 = inlined_call_operand.vmem [shape: f32[25,8,3], index: 1, kind: input, shape index: {}]   ;;  %s19011_s2 = inlined_call_operand.vmem [shape: f32[8,1], index: 2, kind: input, shape index: {}]   ;;  %s19012_s3 = inlined_call_operand.vmem [shape: f32[4,672,160], index: 3, kind: input, shape index: {}]   ;;  %s19013_s4 = inlined_call_operand.vmem [shape: f32[25,16,8], index: 4, kind: input, shape index: {}]   ;;  %s19014_s5 = inlined_call_operand.vmem [shape: f32[16,1], index: 5, kind: input, shape index: {}]   ;;  %s19015_s6 = inlined_call_operand.vmem [shape: f32[4,96,16], index: 6, kind: input, shape index: {}]   ;;  %s19016_s7 = inlined_call_operand.vmem [shape: f32[16,16,16], index: 7, kind: input, shape index: {}]   ;;  %s19017_s8 = inlined_call_operand.vmem [shape: f32[1,16], index: 8, kind: input, shape index: {}]   ;;  %s19018_s9 = inlined_call_operand.vmem [shape: f32[16,13], index: 9, kind: input, shape index: {}]   ;;  %s19019_s10 = inlined_call_operand.vmem [shape: f32[1,13], index: 10, kind: input, shape index: {}]   ;;  %s19020_s11 = inlined_call_operand.hbm [shape: f32[2,1,13], index: 11, kind: output, shape index: {}]  }
   0x1   :  { %19030 = sst [smem:[#allocation5_spill]] %s19009_s0 }
   0x2   :  { %19031 = sst [smem:[#allocation6_spill]] %s19010_s1 }
   0x3   :  { %16 = vsyncpa [#allocation3], 0 }
   0x4   :  { %18 = vsyncpa [#allocation3 + $0x1], 0  ;;  %s15098_s17 = smov 0   ;;  %s15100_s18 = smov 0  }
   0x5   :  { %s15102_s19 = smov 0   ;;  %s15104_s20 = smov 0  }
   0x6 LB: > { %s15119_s21 = sadd.s32 4294967295, %s14988_s20   ;;  %s12314_s22 = sadd.s32 4294967294, %s14988_s20   ;;  %s14988_s20 = sphi %s15104_s20, %s19048_s20   ;;  %s14984_s19 = sphi %s15102_s19, %s19047_s19   ;;  %s14980_s18 = sphi %s15100_s18, %s19046_s18   ;;  %s14976_s17 = sphi %s15098_s17, %s19045_s17  }
   0x7   : > { %s15123_s23 = sadd.s32 1, %s14988_s20   ;;  %s267_s24 = sadd.s32 1, %s14984_s19 }
   0x8   : > { %s264_s25 = ssub.s32 %s14988_s20, %s15123_s23  ;;  %p277_p0 = scmp.ne.s32.totalorder %s14984_s19, %s14980_s18 }
   0x9   : > { %p265_p1 = scmp.eq.s32.totalorder %s264_s25, 0  ;;  %p278_p2 = scmp.eq.s32.totalorder %s15119_s21, 1 }
   0xa   : > { %p283_p3 = scmp.ne.s32.totalorder %s14980_s18, %s14976_s17  ;;  %p284_p4 = scmp.eq.s32.totalorder %s12314_s22, 1 }
   0xb   : > { %s15134_s26 = scalar_select %p265_p1, %s14984_s19, %s267_s24  }
   0xc   : > { %p15136_p5 = por %p278_p2, %p277_p0  ;;  %p15140_p6 = por %p284_p4, %p283_p3 }
   0xd   : > { %p12317_p7 = scmp.ge.s32.totalorder %s14988_s20, 1  ;;  %p340_p8 = scmp.lt.s32.totalorder %s14988_s20, 3 }
   0xf   : > { %p341_p9 = pnand %p12317_p7, %p340_p8 }
  0x10   : > { %p379_p10 = scmp.lt.s32.totalorder (!%p341_p9), %s15119_s21, 1  ;;  %v14990_v0 = vmov (!%p341_p9), 0.0   ;;  %s19034_s0 = sld [smem:[#allocation5_spill]] (!%p341_p9)  ;;  %vm409_vm0 = vcmask (!%p341_p9), 1039360   ;;  %vm419_vm1 = vcmask (!%p341_p9), 1042432   ;;  %vm415_vm2 = vcmask (!%p341_p9), 23552  }
  0x11   : > { %344 = sbr.rel (%p341_p9) target bundleno = 2687 (0xa7f), region = 64  ;;  %496 = vmatprep.mubr.f32.mxu0 (!%p341_p9), %v14990_v0  ;;  %567 = vmatprep.mubr.f32.mxu1 (!%p341_p9), %v14990_v0  ;;  %s19021_s15 = smov (!%p341_p9), 127   ;;  %vm887_vm3 = vcmask (!%p341_p9), 1031168   ;;  %vm1141_vm4 = vcmask (!%p341_p9), 1022976   ;;  %vm1395_vm5 = vcmask (!%p341_p9), 1014784   ;;  %vm1649_vm6 = vcmask (!%p341_p9), 818176  }
  0x12   : > { %s19023_s16 = smov (!%p341_p9), 126   ;;  %s19024_s22 = smov (!%p341_p9), 125   ;;  %vm1903_vm7 = vcmask (!%p341_p9), 809984   ;;  %vm2157_vm8 = vcmask (!%p341_p9), 801792   ;;  %vm2411_vm9 = vcmask (!%p341_p9), 793600   ;;  %vm2665_vm10 = vcmask (!%p341_p9), 785408  }
  0x13   : > { %s19026_s24 = smov (!%p341_p9), 124   ;;  %s19027_s25 = smov (!%p341_p9), 100   ;;  %vm2919_vm11 = vcmask (!%p341_p9), 588800   ;;  %vm3173_vm12 = vcmask (!%p341_p9), 580608   ;;  %vm3427_vm13 = vcmask (!%p341_p9), 572416   ;;  %vm3681_vm14 = vcmask (!%p341_p9), 564224  }
  0x14   : > { %s14998_s12 = smov (!%p341_p9), 97   ;;  %s19022_s13 = smov (!%p341_p9), 96   ;;  %vm3935_vm15 = vcmask (!%p341_p9), 556032  }
  0x15   : > { %s19035_s1 = sld [smem:[#allocation6_spill]] (!%p341_p9) }
  0x18   : > { %s380_s29 = scalar_select %p379_p10, %s15119_s21, 1 }
  0x1a   : > { %s14829_s30 = smul.u32 28, %s380_s29  ;;  %s14996_s29 = smov 99  }
  0x1b   : > { %v15310_v13 = vld [vmem:[%s19035_s1 + $0x8] sm:$0xff]  ;;  %v15338_v19 = vld [vmem:[%s19035_s1] sm:$0xff]  ;;  %v15370_v26 = vld [vmem:[%s19035_s1 + $0x10] sm:$0xff] }
  0x1c   : > { %s15153_s14 = scalar_lea.vmem %s19034_s0, %s14829_s30  ;;  %s14997_s30 = smov 98   ;;  %v15400_v34 = vld [vmem:[%s19035_s1 + $0x18] sm:$0xff]  ;;  %v15432_v42 = vld [vmem:[%s19035_s1 + $0x20] sm:$0xff]  ;;  %v15464_v50 = vld [vmem:[%s19035_s1 + $0x28] sm:$0xff] }
  0x1d   : > { %v15156_v1 = vld [vmem:[%s15153_s14 + $0x8] sm:$0x77]  ;;  %v15159_v2 = vld [vmem:[%s15153_s14] sm:$0x77]  ;;  %v15170_v4 = vld [vmem:[%s15153_s14 + $0x10] sm:$0x77] }
  0x1e   : > { %401 = vrot.lane.b32.xlu0 %v15156_v1, %s19021_s15  ;;  %397 = vrot.lane.b32.xlu1 %v15159_v2, %s19021_s15  ;;  %v15167_v3 = vcombine.high %v15159_v2, %v15159_v2  ;;  %v15178_v5 = vcombine.high %v15170_v4, %v15170_v4  ;;  %v15242_v6 = vcombine.high %v15156_v1, %v15156_v1  ;;  %v15493_v58 = vld [vmem:[%s19035_s1 + $0x30] sm:$0xff]  ;;  %s15022_s0 = smov 102  }
  0x22   : > { %405 = vrot.lane.b32.xlu1 %v15170_v4, %s19021_s15  ;;  %399 = vrot.lane.b32.xlu0 %v15167_v3, %s19021_s15 }
  0x26   : > { %877 = vrot.lane.b32.xlu1 %v15167_v3, %s19023_s16  ;;  %407 = vrot.lane.b32.xlu0 %v15178_v5, %s19021_s15 }
  0x2a   : > { %875 = vrot.lane.b32.xlu1 %v15159_v2, %s19023_s16  ;;  %879 = vrot.lane.b32.xlu0 %v15156_v1, %s19023_s16 }
  0x2e   : > { %885 = vrot.lane.b32.xlu1 %v15178_v5, %s19023_s16  ;;  %883 = vrot.lane.b32.xlu0 %v15170_v4, %s19023_s16 }
  0x32   : > { %1133 = vrot.lane.b32.xlu1 %v15156_v1, %s19024_s22  ;;  %1131 = vrot.lane.b32.xlu0 %v15167_v3, %s19024_s22 }
  0x36   : > { %1137 = vrot.lane.b32.xlu1 %v15170_v4, %s19024_s22  ;;  %1129 = vrot.lane.b32.xlu0 %v15159_v2, %s19024_s22 }
  0x3a   : > { %1385 = vrot.lane.b32.xlu1 %v15167_v3, %s19026_s24  ;;  %1139 = vrot.lane.b32.xlu0 %v15178_v5, %s19024_s22 }
  0x3e   : > { %1383 = vrot.lane.b32.xlu1 %v15159_v2, %s19026_s24  ;;  %1387 = vrot.lane.b32.xlu0 %v15156_v1, %s19026_s24 }
  0x42   : > { %1393 = vrot.lane.b32.xlu1 %v15178_v5, %s19026_s24  ;;  %1391 = vrot.lane.b32.xlu0 %v15170_v4, %s19026_s24 }
  0x46   : > { %1641 = vrot.lane.b32.xlu1 %v15156_v1, %s19027_s25  ;;  %1639 = vrot.lane.b32.xlu0 %v15167_v3, %s19027_s25 }
  0x4a   : > { %1645 = vrot.lane.b32.xlu1 %v15170_v4, %s19027_s25  ;;  %1637 = vrot.lane.b32.xlu0 %v15159_v2, %s19027_s25 }
  0x4e   : > { %1893 = vrot.lane.b32.xlu1 %v15167_v3, %s14996_s29  ;;  %1647 = vrot.lane.b32.xlu0 %v15178_v5, %s19027_s25 }
  0x52   : > { %1891 = vrot.lane.b32.xlu1 %v15159_v2, %s14996_s29  ;;  %1895 = vrot.lane.b32.xlu0 %v15156_v1, %s14996_s29 }
  0x56   : > { %1901 = vrot.lane.b32.xlu1 %v15178_v5, %s14996_s29  ;;  %1899 = vrot.lane.b32.xlu0 %v15170_v4, %s14996_s29 }
  0x5a   : > { %2149 = vrot.lane.b32.xlu1 %v15156_v1, %s14997_s30  ;;  %2147 = vrot.lane.b32.xlu0 %v15167_v3, %s14997_s30 }
  0x5e   : > { %2153 = vrot.lane.b32.xlu1 %v15170_v4, %s14997_s30  ;;  %2145 = vrot.lane.b32.xlu0 %v15159_v2, %s14997_s30 }
  0x62   : > { %403 = vrot.lane.b32.xlu1 %v15242_v6, %s19021_s15  ;;  %2155 = vrot.lane.b32.xlu0 %v15178_v5, %s14997_s30  ;;  %s15000_s15 = smov 72  }
  0x66   : > { %2403 = vrot.lane.b32.xlu1 %v15156_v1, %s14998_s12  ;;  %2401 = vrot.lane.b32.xlu0 %v15167_v3, %s14998_s12 }
  0x6a   : > { %2407 = vrot.lane.b32.xlu1 %v15170_v4, %s14998_s12  ;;  %2399 = vrot.lane.b32.xlu0 %v15159_v2, %s14998_s12 }
  0x6e   : > { %2655 = vrot.lane.b32.xlu1 %v15167_v3, %s19022_s13  ;;  %2409 = vrot.lane.b32.xlu0 %v15178_v5, %s14998_s12 }
  0x72   : > { %2653 = vrot.lane.b32.xlu1 %v15159_v2, %s19022_s13  ;;  %2657 = vrot.lane.b32.xlu0 %v15156_v1, %s19022_s13 }
  0x76   : > { %2663 = vrot.lane.b32.xlu1 %v15178_v5, %s19022_s13  ;;  %2661 = vrot.lane.b32.xlu0 %v15170_v4, %s19022_s13  ;;  %s19025_s13 = smov 71  }
  0x7a   : > { %2909 = vrot.lane.b32.xlu1 %v15167_v3, %s15000_s15  ;;  %881 = vrot.lane.b32.xlu0 %v15242_v6, %s19023_s16  ;;  %s15002_s16 = smov 70  }
  0x7e   : > { %2907 = vrot.lane.b32.xlu1 %v15159_v2, %s15000_s15  ;;  %2911 = vrot.lane.b32.xlu0 %v15156_v1, %s15000_s15 }
  0x82   : > { %2917 = vrot.lane.b32.xlu1 %v15178_v5, %s15000_s15  ;;  %2915 = vrot.lane.b32.xlu0 %v15170_v4, %s15000_s15 }
  0x86   : > { %3163 = vrot.lane.b32.xlu1 %v15167_v3, %s19025_s13  ;;  %1135 = vrot.lane.b32.xlu0 %v15242_v6, %s19024_s22  ;;  %s15003_s22 = smov 69  }
  0x8a   : > { %3161 = vrot.lane.b32.xlu1 %v15159_v2, %s19025_s13  ;;  %3165 = vrot.lane.b32.xlu0 %v15156_v1, %s19025_s13 }
  0x8e   : > { %3171 = vrot.lane.b32.xlu1 %v15178_v5, %s19025_s13  ;;  %3169 = vrot.lane.b32.xlu0 %v15170_v4, %s19025_s13  ;;  %s19028_s13 = smov 43  }
  0x90   : > { %v15292_v7 = vpop.permute.xlu0 %401  ;;  %v398_v8 = vpop.permute.xlu1 %397 }
  0x92   : > { %3417 = vrot.lane.b32.xlu1 %v15167_v3, %s15002_s16  ;;  %1389 = vrot.lane.b32.xlu0 %v15242_v6, %s19026_s24  ;;  %s15004_s24 = smov 68  }
  0x94   : > { %v15298_v9 = vpop.permute.xlu1 %405  ;;  %v400_v10 = vpop.permute.xlu0 %399 }
  0x95   : > { %v411_v11 = vsel %vm409_vm0, %v400_v10, %v15292_v7  ;;  %v410_v12 = vsel %vm409_vm0, %v398_v8, %v400_v10 }
  0x96   : > { %3415 = vrot.lane.b32.xlu1 %v15159_v2, %s15002_s16  ;;  %3419 = vrot.lane.b32.xlu0 %v15156_v1, %s15002_s16 }
  0x97   : > { %12320 = vmatprep.subr.msk.mxu0 %vm419_vm1, %v411_v11 }
  0x98   : > { %12321 = vmatpush1.msk.msra.mxu0 %vm419_vm1, %v410_v12  ;;  %v878_v14 = vpop.permute.xlu1 %877  ;;  %v408_v15 = vpop.permute.xlu0 %407  ;;  %v15529_v12 = vld [vmem:[%s19035_s1 + $0x38] sm:$0xff] }
  0x99   : > { %12322 = vmatmul.mubr.msk.f32.vlgmr.msra.gmra.mrb[0].mxu0 %vm415_vm2, %v15310_v13  ;;  %v414_v16 = vsel %vm409_vm0, %v15298_v9, %v408_v15  ;;  %12326 = vmatprep.subr.msk.mxu0 %vm419_vm1, %v408_v15 }
  0x9a   : > { %3425 = vrot.lane.b32.xlu1 %v15178_v5, %s15002_s16  ;;  %3423 = vrot.lane.b32.xlu0 %v15170_v4, %s15002_s16 }
  0x9b   : > { %12327 = vmatpush1.msk.msra.mxu0 %vm419_vm1, %v414_v16  ;;  %638 = vmatprep.mubr.f32.mxu0 %v14990_v0 }
  0x9c   : > { %v876_v17 = vpop.permute.xlu1 %875  ;;  %v15325_v18 = vpop.permute.xlu0 %879  ;;  %12329 = vmatprep.subr.msk.mxu0 %vm419_vm1, %v15167_v3 }
  0x9d   : > { %12328 = vmatmul.mubr.msk.f32.vlgmr.msra.gmra.mrb[2].mxu0 %vm415_vm2, %v15310_v13  ;;  %v889_v22 = vsel %vm887_vm3, %v878_v14, %v15325_v18  ;;  %v888_v25 = vsel %vm887_vm3, %v876_v17, %v878_v14 }
  0x9e   : > { %3671 = vrot.lane.b32.xlu1 %v15167_v3, %s15003_s22  ;;  %1643 = vrot.lane.b32.xlu0 %v15242_v6, %s19027_s25  ;;  %s15005_s25 = smov 44  }
  0x9f   : > { %12330 = vmatpush1.msk.msra.mxu0 %vm419_vm1, %v15159_v2  ;;  %724 = vmatprep.mubr.f32.mxu0 %v14990_v0 }
  0xa0   : > { %12335 = vmatprep.subr.msk.mxu0 %vm419_vm1, %v15178_v5  ;;  %v886_v20 = vpop.permute.xlu1 %885  ;;  %v15345_v21 = vpop.permute.xlu0 %883 }
  0xa1   : > { %12331 = vmatmul.mubr.msk.f32.vlgmr.msra.gmra.mrb[0].mxu0 %vm415_vm2, %v15338_v19  ;;  %v892_v29 = vsel %vm887_vm3, %v15345_v21, %v886_v20 }
  0xa2   : > { %12336 = vmatpush1.msk.msra.mxu0 %vm419_vm1, %v15170_v4  ;;  %3669 = vrot.lane.b32.xlu1 %v15159_v2, %s15003_s22 }
  0xa3   : > { %12339 = vmatprep.subr.msk.mxu0 %vm419_vm1, %v889_v22  ;;  %3673 = vrot.lane.b32.xlu0 %v15156_v1, %s15003_s22 }
  0xa4   : > { %866 = vmatprep.mubr.f32.mxu0 %v14990_v0  ;;  %v15359_v23 = vpop.permute.xlu1 %1133  ;;  %v1132_v24 = vpop.permute.xlu0 %1131 }
  0xa5   : > { %12337 = vmatmul.mubr.msk.f32.vlgmr.msra.gmra.mrb[2].mxu0 %vm415_vm2, %v15338_v19  ;;  %v1143_v30 = vsel %vm1141_vm4, %v1132_v24, %v15359_v23 }
  0xa6   : > { %12340 = vmatpush1.msk.msra.mxu0 %vm419_vm1, %v888_v25  ;;  %3679 = vrot.lane.b32.xlu1 %v15178_v5, %s15003_s22 }
  0xa7   : > { %12345 = vmatprep.subr.msk.mxu0 %vm419_vm1, %v886_v20  ;;  %3677 = vrot.lane.b32.xlu0 %v15170_v4, %s15003_s22 }
  0xa8   : > { %972 = vmatprep.mubr.f32.mxu0 %v14990_v0  ;;  %v15376_v27 = vpop.permute.xlu1 %1137  ;;  %v1130_v28 = vpop.permute.xlu0 %1129 }
  0xa9   : > { %12341 = vmatmul.mubr.msk.f32.vlgmr.msra.gmra.mrb[0].mxu0 %vm415_vm2, %v15370_v26  ;;  %v1142_v33 = vsel %vm1141_vm4, %v1130_v28, %v1132_v24 }
  0xaa   : > { %12346 = vmatpush1.msk.msra.mxu0 %vm419_vm1, %v892_v29  ;;  %3925 = vrot.lane.b32.xlu1 %v15167_v3, %s15004_s24  ;;  %v15575_v29 = vld [vmem:[%s19035_s1 + $0x40] sm:$0xff] }
  0xab   : > { %12349 = vmatprep.subr.msk.mxu0 %vm419_vm1, %v1143_v30  ;;  %1897 = vrot.lane.b32.xlu0 %v15242_v6, %s14996_s29  ;;  %s19029_s29 = smov 42  }
  0xac   : > { %1114 = vmatprep.mubr.f32.mxu0 %v14990_v0  ;;  %v1386_v31 = vpop.permute.xlu1 %1385  ;;  %v1140_v32 = vpop.permute.xlu0 %1139 }
  0xad   : > { %12347 = vmatmul.mubr.msk.f32.vlgmr.msra.gmra.mrb[2].mxu0 %vm415_vm2, %v15370_v26  ;;  %v1146_v37 = vsel %vm1141_vm4, %v15376_v27, %v1140_v32 }
  0xae   : > { %12350 = vmatpush1.msk.msra.mxu0 %vm419_vm1, %v1142_v33  ;;  %3923 = vrot.lane.b32.xlu1 %v15159_v2, %s15004_s24 }
  0xaf   : > { %12355 = vmatprep.subr.msk.mxu0 %vm419_vm1, %v1140_v32  ;;  %3927 = vrot.lane.b32.xlu0 %v15156_v1, %s15004_s24 }
  0xb0   : > { %1226 = vmatprep.mubr.f32.mxu0 %v14990_v0  ;;  %v1384_v35 = vpop.permute.xlu1 %1383  ;;  %v15406_v36 = vpop.permute.xlu0 %1387 }
  0xb1   : > { %12351 = vmatmul.mubr.msk.f32.vlgmr.msra.gmra.mrb[0].mxu0 %vm415_vm2, %v15400_v34  ;;  %v1397_v38 = vsel %vm1395_vm5, %v1386_v31, %v15406_v36  ;;  %v1396_v41 = vsel %vm1395_vm5, %v1384_v35, %v1386_v31 }
  0xb2   : > { %12356 = vmatpush1.msk.msra.mxu0 %vm419_vm1, %v1146_v37  ;;  %3933 = vrot.lane.b32.xlu1 %v15178_v5, %s15004_s24 }
  0xb3   : > { %3931 = vrot.lane.b32.xlu0 %v15170_v4, %s15004_s24  ;;  %12359 = vmatprep.subr.msk.mxu0 %vm419_vm1, %v1397_v38  ;;  %v15611_v38 = vld [vmem:[%s19035_s1 + $0x48] sm:$0xff] }
  0xb4   : > { %1368 = vmatprep.mubr.f32.mxu0 %v14990_v0  ;;  %v1394_v39 = vpop.permute.xlu1 %1393  ;;  %v15421_v40 = vpop.permute.xlu0 %1391 }
  0xb5   : > { %12357 = vmatmul.mubr.msk.f32.vlgmr.msra.gmra.mrb[2].mxu0 %vm415_vm2, %v15400_v34  ;;  %v1400_v45 = vsel %vm1395_vm5, %v15421_v40, %v1394_v39 }
  0xb6   : > { %12360 = vmatpush1.msk.msra.mxu0 %vm419_vm1, %v1396_v41  ;;  %4179 = vrot.lane.b32.xlu1 %v15167_v3, %s15005_s25 }
  0xb7   : > { %2151 = vrot.lane.b32.xlu0 %v15242_v6, %s14997_s30  ;;  %12365 = vmatprep.subr.msk.mxu0 %vm419_vm1, %v1394_v39  ;;  %s19036_s30 = smov 96  }
  0xb8   : > { %1480 = vmatprep.mubr.f32.mxu0 %v14990_v0  ;;  %v15438_v43 = vpop.permute.xlu1 %1641  ;;  %v1640_v44 = vpop.permute.xlu0 %1639 }
  0xb9   : > { %12361 = vmatmul.mubr.msk.f32.vlgmr.msra.gmra.mrb[0].mxu0 %vm415_vm2, %v15432_v42  ;;  %v1651_v46 = vsel %vm1649_vm6, %v1640_v44, %v15438_v43 }
  0xba   : > { %12366 = vmatpush1.msk.msra.mxu0 %vm419_vm1, %v1400_v45  ;;  %4177 = vrot.lane.b32.xlu1 %v15159_v2, %s15005_s25 }
  0xbb   : > { %4181 = vrot.lane.b32.xlu0 %v15156_v1, %s15005_s25  ;;  %12369 = vmatprep.subr.msk.mxu0 %vm419_vm1, %v1651_v46 }
  0xbc   : > { %v15452_v47 = vpop.permute.xlu1 %1645  ;;  %v1638_v48 = vpop.permute.xlu0 %1637  ;;  %1622 = vmatprep.mubr.f32.mxu0 %v14990_v0 }
  0xbd   : > { %v1650_v49 = vsel %vm1649_vm6, %v1638_v48, %v1640_v44  ;;  %12367 = vmatmul.mubr.msk.f32.vlgmr.msra.gmra.mrb[2].mxu0 %vm415_vm2, %v15432_v42 }
  0xbe   : > { %4187 = vrot.lane.b32.xlu1 %v15178_v5, %s15005_s25  ;;  %12370 = vmatpush1.msk.msra.mxu0 %vm419_vm1, %v1650_v49 }
  0xbf   : > { %4185 = vrot.lane.b32.xlu0 %v15170_v4, %s15005_s25  ;;  %1734 = vmatprep.mubr.f32.mxu0 %v14990_v0 }
  0xc0   : > { %v1894_v51 = vpop.permute.xlu1 %1893  ;;  %v1648_v52 = vpop.permute.xlu0 %1647 }
  0xc1   : > { %v1654_v53 = vsel %vm1649_vm6, %v15452_v47, %v1648_v52  ;;  %12375 = vmatprep.subr.msk.mxu0 %vm419_vm1, %v1648_v52  ;;  %12371 = vmatmul.mubr.msk.f32.vlgmr.msra.gmra.mrb[0].mxu0 %vm415_vm2, %v15464_v50 }
  0xc2   : > { %4433 = vrot.lane.b32.xlu1 %v15167_v3, %s19028_s13  ;;  %12376 = vmatpush1.msk.msra.mxu0 %vm419_vm1, %v1654_v53  ;;  %v15655_v53 = vld [vmem:[%s19035_s1 + $0x50] sm:$0xff] }
  0xc3   : > { %2405 = vrot.lane.b32.xlu0 %v15242_v6, %s14998_s12  ;;  %1876 = vmatprep.mubr.f32.mxu0 %v14990_v0  ;;  %s15009_s12 = smov 40  }
  0xc4   : > { %v1892_v54 = vpop.permute.xlu1 %1891  ;;  %v15480_v55 = vpop.permute.xlu0 %1895 }
  0xc5   : > { %v1904_v56 = vsel %vm1903_vm7, %v1892_v54, %v1894_v51  ;;  %12377 = vmatmul.mubr.msk.f32.vlgmr.msra.gmra.mrb[2].mxu0 %vm415_vm2, %v15464_v50  ;;  %v1905_v57 = vsel %vm1903_vm7, %v1894_v51, %v15480_v55 }
  0xc6   : > { %4431 = vrot.lane.b32.xlu1 %v15159_v2, %s19028_s13  ;;  %12379 = vmatprep.subr.msk.mxu0 %vm419_vm1, %v1905_v57  ;;  %v15678_v57 = vld [vmem:[%s15153_s14 + $0x18] sm:$0x7] }
  0xc7   : > { %4435 = vrot.lane.b32.xlu0 %v15156_v1, %s19028_s13  ;;  %12380 = vmatpush1.msk.msra.mxu0 %vm419_vm1, %v1904_v56 }
  0xc8   : > { %v1902_v59 = vpop.permute.xlu1 %1901  ;;  %v15498_v60 = vpop.permute.xlu0 %1899  ;;  %1988 = vmatprep.mubr.f32.mxu0 %v14990_v0 }
  0xc9   : > { %v1908_v61 = vsel %vm1903_vm7, %v15498_v60, %v1902_v59  ;;  %12385 = vmatprep.subr.msk.mxu0 %vm419_vm1, %v1902_v59  ;;  %12381 = vmatmul.mubr.msk.f32.vlgmr.msra.gmra.mrb[0].mxu0 %vm415_vm2, %v15493_v58 }
  0xca   : > { %4441 = vrot.lane.b32.xlu1 %v15178_v5, %s19028_s13  ;;  %12386 = vmatpush1.msk.msra.mxu0 %vm419_vm1, %v1908_v61 }
  0xcb   : > { %4439 = vrot.lane.b32.xlu0 %v15170_v4, %s19028_s13  ;;  %2130 = vmatprep.mubr.f32.mxu0 %v14990_v0  ;;  %s15008_s13 = smov 41  }
  0xcc   : > { %v15512_v62 = vpop.permute.xlu1 %2149  ;;  %v2148_v63 = vpop.permute.xlu0 %2147 }
  0xcd   : > { %v2159_v8 = vsel %vm2157_vm8, %v2148_v63, %v15512_v62  ;;  %12387 = vmatmul.mubr.msk.f32.vlgmr.msra.gmra.mrb[2].mxu0 %vm415_vm2, %v15493_v58 }
  0xce   : > { %4687 = vrot.lane.b32.xlu1 %v15167_v3, %s19029_s29  ;;  %12389 = vmatprep.subr.msk.mxu0 %vm419_vm1, %v2159_v8 }
  0xcf   : > { %2659 = vrot.lane.b32.xlu0 %v15242_v6, %s19036_s30  ;;  %2242 = vmatprep.mubr.f32.mxu0 %v14990_v0  ;;  %s15010_s30 = smov 16  }
  0xd0   : > { %v15524_v10 = vpop.permute.xlu1 %2153  ;;  %v2146_v11 = vpop.permute.xlu0 %2145 }
  0xd1   : > { %v2158_v14 = vsel %vm2157_vm8, %v2146_v11, %v2148_v63 }
  0xd2   : > { %4685 = vrot.lane.b32.xlu1 %v15159_v2, %s19029_s29  ;;  %12390 = vmatpush1.msk.msra.mxu0 %vm419_vm1, %v2158_v14 }
  0xd3   : > { %4689 = vrot.lane.b32.xlu0 %v15156_v1, %s19029_s29  ;;  %12391 = vmatmul.mubr.msk.f32.vlgmr.msra.gmra.mrb[0].mxu0 %vm415_vm2, %v15529_v12 }
  0xd4   : > { %v404_v15 = vpop.permute.xlu1 %403  ;;  %v2156_v16 = vpop.permute.xlu0 %2155  ;;  %2384 = vmatprep.mubr.f32.mxu0 %v14990_v0 }
  0xd5   : > { %v2162_v17 = vsel %vm2157_vm8, %v15524_v10, %v2156_v16  ;;  %12395 = vmatprep.subr.msk.mxu0 %vm419_vm1, %v2156_v16  ;;  %v413_v20 = vsel %vm409_vm0, %v404_v15, %v15298_v9  ;;  %v412_v22 = vsel %vm409_vm0, %v15292_v7, %v404_v15  ;;  %v15703_v15 = vld [vmem:[%s19035_s1 + $0x58] sm:$0xff]  ;;  %vm4189_vm0 = vcmask 359424  }
  0xd6   : > { %4695 = vrot.lane.b32.xlu1 %v15178_v5, %s19029_s29  ;;  %12323 = vmatprep.subr.msk.mxu1 %vm419_vm1, %v413_v20 }
  0xd7   : > { %4693 = vrot.lane.b32.xlu0 %v15170_v4, %s19029_s29  ;;  %12396 = vmatpush1.msk.msra.mxu0 %vm419_vm1, %v2162_v17  ;;  %s19037_s29 = smov 71  }
  0xd8   : > { %12324 = vmatpush1.msk.msra.mxu1 %vm419_vm1, %v412_v22  ;;  %v15554_v24 = vpop.permute.xlu1 %2403  ;;  %v2402_v25 = vpop.permute.xlu0 %2401  ;;  %12397 = vmatmul.mubr.msk.f32.vlgmr.msra.gmra.mrb[2].mxu0 %vm415_vm2, %v15529_v12 }
  0xd9   : > { %v2413_v7 = vsel %vm2411_vm9, %v2402_v25, %v15554_v24  ;;  %2496 = vmatprep.mubr.f32.mxu0 %v14990_v0  ;;  %12325 = vmatmul.mubr.msk.f32.vlgmr.msra.gmra.mrb[0].mxu1 %vm415_vm2, %v15310_v13 }
  0xda   : > { %4941 = vrot.lane.b32.xlu1 %v15167_v3, %s15008_s13  ;;  %12399 = vmatprep.subr.msk.mxu0 %vm419_vm1, %v2413_v7 }
  0xdb   : > { %2913 = vrot.lane.b32.xlu0 %v15242_v6, %s15000_s15  ;;  %12332 = vmatprep.subr.msk.mxu1 %vm419_vm1, %v15242_v6  ;;  %s15014_s15 = smov 12  }
  0xdc   : > { %v15570_v9 = vpop.permute.xlu1 %2407  ;;  %v2400_v28 = vpop.permute.xlu0 %2399  ;;  %12333 = vmatpush1.msk.msra.mxu1 %vm419_vm1, %v15156_v1  ;;  %795 = vmatprep.mubr.f32.mxu1 %v14990_v0 }
  0xdd   : > { %v2412_v13 = vsel %vm2411_vm9, %v2400_v28, %v2402_v25 }
  0xde   : > { %4939 = vrot.lane.b32.xlu1 %v15159_v2, %s15008_s13  ;;  %12400 = vmatpush1.msk.msra.mxu0 %vm419_vm1, %v2412_v13 }
  0xdf   : > { %4943 = vrot.lane.b32.xlu0 %v15156_v1, %s15008_s13  ;;  %12401 = vmatmul.mubr.msk.f32.vlgmr.msra.gmra.mrb[0].mxu0 %vm415_vm2, %v15575_v29 }
  0xe0   : > { %v2656_v30 = vpop.permute.xlu1 %2655  ;;  %v2410_v31 = vpop.permute.xlu0 %2409  ;;  %2638 = vmatprep.mubr.f32.mxu0 %v14990_v0 }
  0xe1   : > { %v2416_v32 = vsel %vm2411_vm9, %v15570_v9, %v2410_v31  ;;  %12405 = vmatprep.subr.msk.mxu0 %vm419_vm1, %v2410_v31  ;;  %12334 = vmatmul.mubr.msk.f32.vlgmr.msra.gmra.mrb[0].mxu1 %vm415_vm2, %v15338_v19 }
  0xe2   : > { %4949 = vrot.lane.b32.xlu1 %v15178_v5, %s15008_s13  ;;  %12406 = vmatpush1.msk.msra.mxu0 %vm419_vm1, %v2416_v32 }
  0xe3   : > { %4947 = vrot.lane.b32.xlu0 %v15170_v4, %s15008_s13  ;;  %12407 = vmatmul.mubr.msk.f32.vlgmr.msra.gmra.mrb[2].mxu0 %vm415_vm2, %v15575_v29 }
  0xe4   : > { %v2654_v33 = vpop.permute.xlu1 %2653  ;;  %v15601_v35 = vpop.permute.xlu0 %2657  ;;  %2750 = vmatprep.mubr.f32.mxu0 %v14990_v0  ;;  %1043 = vmatprep.mubr.f32.mxu1 %v14990_v0 }
  0xe5   : > { %v2666_v19 = vsel %vm2665_vm10, %v2654_v33, %v2656_v30  ;;  %v2667_v37 = vsel %vm2665_vm10, %v2656_v30, %v15601_v35  ;;  %v15748_v30 = vld [vmem:[%s19035_s1 + $0x60] sm:$0xff] }
  0xe6   : > { %5195 = vrot.lane.b32.xlu1 %v15167_v3, %s15009_s12  ;;  %12409 = vmatprep.subr.msk.mxu0 %vm419_vm1, %v2667_v37 }
  0xe7   : > { %3167 = vrot.lane.b32.xlu0 %v15242_v6, %s19037_s29  ;;  %12410 = vmatpush1.msk.msra.mxu0 %vm419_vm1, %v2666_v19  ;;  %s15012_s29 = smov 14  }
  0xe8   : > { %v2664_v39 = vpop.permute.xlu1 %2663  ;;  %v15619_v41 = vpop.permute.xlu0 %2661  ;;  %12411 = vmatmul.mubr.msk.f32.vlgmr.msra.gmra.mrb[0].mxu0 %vm415_vm2, %v15611_v38 }
  0xe9   : > { %v2670_v44 = vsel %vm2665_vm10, %v15619_v41, %v2664_v39  ;;  %12415 = vmatprep.subr.msk.mxu0 %vm419_vm1, %v2664_v39  ;;  %2892 = vmatprep.mubr.f32.mxu0 %v14990_v0 }
  0xea   : > { %5193 = vrot.lane.b32.xlu1 %v15159_v2, %s15009_s12  ;;  %12416 = vmatpush1.msk.msra.mxu0 %vm419_vm1, %v2670_v44 }
  0xeb   : > { %5197 = vrot.lane.b32.xlu0 %v15156_v1, %s15009_s12 }
  0xec   : > { %v2910_v45 = vpop.permute.xlu1 %2909  ;;  %v882_v46 = vpop.permute.xlu0 %881  ;;  %12417 = vmatmul.mubr.msk.f32.vlgmr.msra.gmra.mrb[2].mxu0 %vm415_vm2, %v15611_v38 }
  0xed   : > { %v890_v48 = vsel %vm887_vm3, %v15325_v18, %v882_v46  ;;  %v891_v49 = vsel %vm887_vm3, %v882_v46, %v15345_v21  ;;  %3004 = vmatprep.mubr.f32.mxu0 %v14990_v0  ;;  %v15796_v46 = vld [vmem:[%s19035_s1 + $0x68] sm:$0xff]  ;;  %vm4443_vm3 = vcmask 351232  }
  0xee   : > { %5203 = vrot.lane.b32.xlu1 %v15178_v5, %s15009_s12  ;;  %12342 = vmatprep.subr.msk.mxu1 %vm419_vm1, %v891_v49 }
  0xef   : > { %5201 = vrot.lane.b32.xlu0 %v15170_v4, %s15009_s12  ;;  %12343 = vmatpush1.msk.msra.mxu1 %vm419_vm1, %v890_v48 }
  0xf0   : > { %v2908_v51 = vpop.permute.xlu1 %2907  ;;  %v15645_v52 = vpop.permute.xlu0 %2911  ;;  %12344 = vmatmul.mubr.msk.f32.vlgmr.msra.gmra.mrb[0].mxu1 %vm415_vm2, %v15370_v26 }
  0xf1   : > { %v2920_v18 = vsel %vm2919_vm11, %v2908_v51, %v2910_v45  ;;  %v2921_v21 = vsel %vm2919_vm11, %v2910_v45, %v15645_v52  ;;  %1297 = vmatprep.mubr.f32.mxu1 %v14990_v0 }
  0xf2   : > { %5450 = vrot.lane.b32.xlu1 %v15167_v3, %s15010_s30  ;;  %12419 = vmatprep.subr.msk.mxu0 %vm419_vm1, %v2921_v21 }
  0xf3   : > { %3421 = vrot.lane.b32.xlu0 %v15242_v6, %s15002_s16  ;;  %12420 = vmatpush1.msk.msra.mxu0 %vm419_vm1, %v2920_v18  ;;  %s15013_s16 = smov 13  }
  0xf4   : > { %v2918_v26 = vpop.permute.xlu1 %2917  ;;  %v15664_v54 = vpop.permute.xlu0 %2915  ;;  %12421 = vmatmul.mubr.msk.f32.vlgmr.msra.gmra.mrb[0].mxu0 %vm415_vm2, %v15655_v53 }
  0xf5   : > { %v2924_v56 = vsel %vm2919_vm11, %v15664_v54, %v2918_v26  ;;  %12425 = vmatprep.subr.msk.mxu0 %vm419_vm1, %v2918_v26  ;;  %3146 = vmatprep.mubr.f32.mxu0 %v14990_v0 }
  0xf6   : > { %5448 = vrot.lane.b32.xlu1 %v15159_v2, %s15010_s30  ;;  %12426 = vmatpush1.msk.msra.mxu0 %vm419_vm1, %v2924_v56 }
  0xf7   : > { %5452 = vrot.lane.b32.xlu0 %v15156_v1, %s15010_s30 }
  0xf8   : > { %v3164_v59 = vpop.permute.xlu1 %3163  ;;  %v1136_v61 = vpop.permute.xlu0 %1135  ;;  %12427 = vmatmul.mubr.msk.f32.vlgmr.msra.gmra.mrb[2].mxu0 %vm415_vm2, %v15655_v53 }
  0xf9   : > { %v1144_v63 = vsel %vm1141_vm4, %v15359_v23, %v1136_v61  ;;  %v1145_v8 = vsel %vm1141_vm4, %v1136_v61, %v15376_v27  ;;  %3258 = vmatprep.mubr.f32.mxu0 %v14990_v0  ;;  %v15840_v61 = vld [vmem:[%s19035_s1 + $0x70] sm:$0xff]  ;;  %vm4697_vm4 = vcmask 343040  }
  0xfa   : > { %5460 = vrot.lane.b32.xlu1 %v15678_v57, %s15010_s30  ;;  %12352 = vmatprep.subr.msk.mxu1 %vm419_vm1, %v1145_v8 }
  0xfb   : > { %5458 = vrot.lane.b32.xlu0 %v15178_v5, %s15010_s30  ;;  %12353 = vmatpush1.msk.msra.mxu1 %vm419_vm1, %v1144_v63 }
  0xfc   : > { %v3162_v11 = vpop.permute.xlu1 %3161  ;;  %v15693_v14 = vpop.permute.xlu0 %3165  ;;  %12354 = vmatmul.mubr.msk.f32.vlgmr.msra.gmra.mrb[0].mxu1 %vm415_vm2, %v15400_v34 }
  0xfd   : > { %v3174_v23 = vsel %vm3173_vm12, %v3162_v11, %v3164_v59  ;;  %v3175_v27 = vsel %vm3173_vm12, %v3164_v59, %v15693_v14  ;;  %1551 = vmatprep.mubr.f32.mxu1 %v14990_v0 }
  0xfe   : > { %3675 = vrot.lane.b32.xlu1 %v15242_v6, %s15003_s22  ;;  %12429 = vmatprep.subr.msk.mxu0 %vm419_vm1, %v3175_v27  ;;  %s15011_s22 = smov 15  }
  0xff   : > { %5456 = vrot.lane.b32.xlu0 %v15170_v4, %s15010_s30  ;;  %12430 = vmatpush1.msk.msra.mxu0 %vm419_vm1, %v3174_v23 }
 0x100   : > { %v3172_v34 = vpop.permute.xlu1 %3171  ;;  %v15712_v16 = vpop.permute.xlu0 %3169  ;;  %12431 = vmatmul.mubr.msk.f32.vlgmr.msra.gmra.mrb[0].mxu0 %vm415_vm2, %v15703_v15 }
 0x101   : > { %v3178_v17 = vsel %vm3173_vm12, %v15712_v16, %v3172_v34  ;;  %12435 = vmatprep.subr.msk.mxu0 %vm419_vm1, %v3172_v34  ;;  %3400 = vmatprep.mubr.f32.mxu0 %v14990_v0 }
 0x102   : > { %5709 = vrot.lane.b32.xlu1 %v15156_v1, %s15011_s22  ;;  %12436 = vmatpush1.msk.msra.mxu0 %vm419_vm1, %v3178_v17 }
 0x103   : > { %5707 = vrot.lane.b32.xlu0 %v15167_v3, %s15011_s22 }
 0x104   : > { %v3418_v20 = vpop.permute.xlu1 %3417  ;;  %v1390_v22 = vpop.permute.xlu0 %1389  ;;  %12437 = vmatmul.mubr.msk.f32.vlgmr.msra.gmra.mrb[2].mxu0 %vm415_vm2, %v15703_v15 }
 0x105   : > { %v1398_v25 = vsel %vm1395_vm5, %v15406_v36, %v1390_v22  ;;  %v1399_v7 = vsel %vm1395_vm5, %v1390_v22, %v15421_v40  ;;  %3512 = vmatprep.mubr.f32.mxu0 %v14990_v0  ;;  %vm4951_vm5 = vcmask 334848  }
 0x106   : > { %5715 = vrot.lane.b32.xlu1 %v15178_v5, %s15011_s22  ;;  %12362 = vmatprep.subr.msk.mxu1 %vm419_vm1, %v1399_v7 }
 0x107   : > { %5705 = vrot.lane.b32.xlu0 %v15159_v2, %s15011_s22  ;;  %12363 = vmatpush1.msk.msra.mxu1 %vm419_vm1, %v1398_v25 }
 0x108   : > { %v3416_v28 = vpop.permute.xlu1 %3415  ;;  %v15738_v13 = vpop.permute.xlu0 %3419  ;;  %12364 = vmatmul.mubr.msk.f32.vlgmr.msra.gmra.mrb[0].mxu1 %vm415_vm2, %v15432_v42 }
 0x109   : > { %v3428_v36 = vsel %vm3427_vm13, %v3416_v28, %v3418_v20  ;;  %v3429_v40 = vsel %vm3427_vm13, %v3418_v20, %v15738_v13  ;;  %1805 = vmatprep.mubr.f32.mxu1 %v14990_v0 }
 0x10a   : > { %5713 = vrot.lane.b32.xlu1 %v15170_v4, %s15011_s22  ;;  %12439 = vmatprep.subr.msk.mxu0 %vm419_vm1, %v3429_v40  ;;  %v15930_v40 = vld [vmem:[%s19035_s1 + $0x80] sm:$0xff] }
 0x10b   : > { %5717 = vrot.lane.b32.xlu0 %v15678_v57, %s15011_s22  ;;  %12440 = vmatpush1.msk.msra.mxu0 %vm419_vm1, %v3428_v36 }
 0x10c   : > { %v3426_v42 = vpop.permute.xlu1 %3425  ;;  %v15757_v31 = vpop.permute.xlu0 %3423  ;;  %12441 = vmatmul.mubr.msk.f32.vlgmr.msra.gmra.mrb[0].mxu0 %vm415_vm2, %v15748_v30 }
 0x10d   : > { %v3432_v32 = vsel %vm3427_vm13, %v15757_v31, %v3426_v42  ;;  %12445 = vmatprep.subr.msk.mxu0 %vm419_vm1, %v3426_v42  ;;  %3654 = vmatprep.mubr.f32.mxu0 %v14990_v0 }
 0x10e   : > { %5964 = vrot.lane.b32.xlu1 %v15167_v3, %s15012_s29  ;;  %12446 = vmatpush1.msk.msra.mxu0 %vm419_vm1, %v3432_v32 }
 0x10f   : > { %3929 = vrot.lane.b32.xlu0 %v15242_v6, %s15004_s24  ;;  %s19039_s24 = smov 42  }
 0x110   : > { %v3672_v33 = vpop.permute.xlu1 %3671  ;;  %v1644_v19 = vpop.permute.xlu0 %1643  ;;  %12447 = vmatmul.mubr.msk.f32.vlgmr.msra.gmra.mrb[2].mxu0 %vm415_vm2, %v15748_v30 }
 0x111   : > { %v1652_v37 = vsel %vm1649_vm6, %v15438_v43, %v1644_v19  ;;  %v1653_v39 = vsel %vm1649_vm6, %v1644_v19, %v15452_v47  ;;  %3766 = vmatprep.mubr.f32.mxu0 %v14990_v0  ;;  %vm5205_vm6 = vcmask 326656  }
 0x112   : > { %5962 = vrot.lane.b32.xlu1 %v15159_v2, %s15012_s29  ;;  %12372 = vmatprep.subr.msk.mxu1 %vm419_vm1, %v1653_v39 }
 0x113   : > { %5966 = vrot.lane.b32.xlu0 %v15156_v1, %s15012_s29  ;;  %12373 = vmatpush1.msk.msra.mxu1 %vm419_vm1, %v1652_v37 }
 0x114   : > { %v3670_v44 = vpop.permute.xlu1 %3669  ;;  %12374 = vmatmul.mubr.msk.f32.vlgmr.msra.gmra.mrb[0].mxu1 %vm415_vm2, %v15464_v50 }
 0x115   : > { %v3682_v43 = vsel %vm3681_vm14, %v3670_v44, %v3672_v33  ;;  %v15786_v47 = vpop.permute.xlu0 %3673  ;;  %2059 = vmatprep.mubr.f32.mxu1 %v14990_v0 }
 0x116   : > { %5974 = vrot.lane.b32.xlu1 %v15678_v57, %s15012_s29  ;;  %v3683_v45 = vsel %vm3681_vm14, %v3672_v33, %v15786_v47 }
 0x117   : > { %5972 = vrot.lane.b32.xlu0 %v15178_v5, %s15012_s29  ;;  %12449 = vmatprep.subr.msk.mxu0 %vm419_vm1, %v3683_v45 }
 0x118   : > { %12450 = vmatpush1.msk.msra.mxu0 %vm419_vm1, %v3682_v43  ;;  %v3680_v50 = vpop.permute.xlu1 %3679 }
 0x119   : > { %v15802_v48 = vpop.permute.xlu0 %3677  ;;  %12455 = vmatprep.subr.msk.mxu0 %vm419_vm1, %v3680_v50  ;;  %12451 = vmatmul.mubr.msk.f32.vlgmr.msra.gmra.mrb[0].mxu0 %vm415_vm2, %v15796_v46 }
 0x11a   : > { %v3686_v49 = vsel %vm3681_vm14, %v15802_v48, %v3680_v50  ;;  %4183 = vrot.lane.b32.xlu1 %v15242_v6, %s15005_s25  ;;  %3908 = vmatprep.mubr.f32.mxu0 %v14990_v0  ;;  %s19038_s25 = smov 43  }
 0x11b   : > { %5970 = vrot.lane.b32.xlu0 %v15170_v4, %s15012_s29  ;;  %12456 = vmatpush1.msk.msra.mxu0 %vm419_vm1, %v3686_v49 }
 0x11c   : > { %v3926_v51 = vpop.permute.xlu1 %3925 }
 0x11d   : > { %v1898_v18 = vpop.permute.xlu0 %1897  ;;  %12457 = vmatmul.mubr.msk.f32.vlgmr.msra.gmra.mrb[2].mxu0 %vm415_vm2, %v15796_v46 }
 0x11e   : > { %v1906_v21 = vsel %vm1903_vm7, %v15480_v55, %v1898_v18  ;;  %6223 = vrot.lane.b32.xlu1 %v15156_v1, %s15013_s16  ;;  %v1907_v26 = vsel %vm1903_vm7, %v1898_v18, %v15498_v60  ;;  %4020 = vmatprep.mubr.f32.mxu0 %v14990_v0  ;;  %vm5462_vm7 = vcmask 130048  }
 0x11f   : > { %6221 = vrot.lane.b32.xlu0 %v15167_v3, %s15013_s16  ;;  %12382 = vmatprep.subr.msk.mxu1 %vm419_vm1, %v1907_v26 }
 0x120   : > { %12383 = vmatpush1.msk.msra.mxu1 %vm419_vm1, %v1906_v21  ;;  %v3924_v56 = vpop.permute.xlu1 %3923 }
 0x121   : > { %v3936_v55 = vsel %vm3935_vm15, %v3924_v56, %v3926_v51  ;;  %v15829_v59 = vpop.permute.xlu0 %3927  ;;  %12384 = vmatmul.mubr.msk.f32.vlgmr.msra.gmra.mrb[0].mxu1 %vm415_vm2, %v15493_v58 }
 0x122   : > { %6229 = vrot.lane.b32.xlu1 %v15178_v5, %s15013_s16  ;;  %v3937_v60 = vsel %vm3935_vm15, %v3926_v51, %v15829_v59  ;;  %2313 = vmatprep.mubr.f32.mxu1 %v14990_v0 }
 0x123   : > { %6219 = vrot.lane.b32.xlu0 %v15159_v2, %s15013_s16  ;;  %12459 = vmatprep.subr.msk.mxu0 %vm419_vm1, %v3937_v60 }
 0x124   : > { %12460 = vmatpush1.msk.msra.mxu0 %vm419_vm1, %v3936_v55  ;;  %v3934_v58 = vpop.permute.xlu1 %3933 }
 0x125   : > { %v15847_v63 = vpop.permute.xlu0 %3931  ;;  %12465 = vmatprep.subr.msk.mxu0 %vm419_vm1, %v3934_v58  ;;  %12461 = vmatmul.mubr.msk.f32.vlgmr.msra.gmra.mrb[0].mxu0 %vm415_vm2, %v15840_v61 }
 0x126   : > { %v3940_v8 = vsel %vm3935_vm15, %v15847_v63, %v3934_v58  ;;  %6227 = vrot.lane.b32.xlu1 %v15170_v4, %s15013_s16  ;;  %4162 = vmatprep.mubr.f32.mxu0 %v14990_v0 }
 0x127   : > { %6231 = vrot.lane.b32.xlu0 %v15678_v57, %s15013_s16  ;;  %12466 = vmatpush1.msk.msra.mxu0 %vm419_vm1, %v3940_v8 }
 0x128   : > { %v4180_v11 = vpop.permute.xlu1 %4179 }
 0x129   : > { %v2152_v23 = vpop.permute.xlu0 %2151  ;;  %12467 = vmatmul.mubr.msk.f32.vlgmr.msra.gmra.mrb[2].mxu0 %vm415_vm2, %v15840_v61 }
 0x12a   : > { %v2160_v27 = vsel %vm2157_vm8, %v15512_v62, %v2152_v23  ;;  %6478 = vrot.lane.b32.xlu1 %v15167_v3, %s15014_s15  ;;  %v2161_v4 = vsel %vm2157_vm8, %v2152_v23, %v15524_v10  ;;  %4274 = vmatprep.mubr.f32.mxu0 %v14990_v0  ;;  %v15885_v10 = vld [vmem:[%s19035_s1 + $0x78] sm:$0xff]  ;;  %vm5719_vm8 = vcmask 121856  }
 0x12b   : > { %4437 = vrot.lane.b32.xlu0 %v15242_v6, %s19038_s25  ;;  %12392 = vmatprep.subr.msk.mxu1 %vm419_vm1, %v2161_v4  ;;  %s15020_s25 = smov 104  }
 0x12c   : > { %12393 = vmatpush1.msk.msra.mxu1 %vm419_vm1, %v2160_v27  ;;  %v4178_v34 = vpop.permute.xlu1 %4177 }
 0x12d   : > { %v4190_v62 = vsel %vm4189_vm0, %v4178_v34, %v4180_v11  ;;  %v15874_v17 = vpop.permute.xlu0 %4181  ;;  %12394 = vmatmul.mubr.msk.f32.vlgmr.msra.gmra.mrb[0].mxu1 %vm415_vm2, %v15529_v12 }
 0x12e   : > { %6476 = vrot.lane.b32.xlu1 %v15159_v2, %s15014_s15  ;;  %v4191_v3 = vsel %vm4189_vm0, %v4180_v11, %v15874_v17  ;;  %2567 = vmatprep.mubr.f32.mxu1 %v14990_v0 }
 0x12f   : > { %6480 = vrot.lane.b32.xlu0 %v15156_v1, %s15014_s15  ;;  %12469 = vmatprep.subr.msk.mxu0 %vm419_vm1, %v4191_v3 }
 0x130   : > { %12470 = vmatpush1.msk.msra.mxu0 %vm419_vm1, %v4190_v62  ;;  %v4188_v12 = vpop.permute.xlu1 %4187 }
 0x131   : > { %v15892_v20 = vpop.permute.xlu0 %4185  ;;  %12475 = vmatprep.subr.msk.mxu0 %vm419_vm1, %v4188_v12  ;;  %12471 = vmatmul.mubr.msk.f32.vlgmr.msra.gmra.mrb[0].mxu0 %vm415_vm2, %v15885_v10 }
 0x132   : > { %v4194_v2 = vsel %vm4189_vm0, %v15892_v20, %v4188_v12  ;;  %4945 = vrot.lane.b32.xlu1 %v15242_v6, %s15008_s13  ;;  %4416 = vmatprep.mubr.f32.mxu0 %v14990_v0  ;;  %s19040_s13 = smov 126  }
 0x133   : > { %4691 = vrot.lane.b32.xlu0 %v15242_v6, %s19039_s24  ;;  %12476 = vmatpush1.msk.msra.mxu0 %vm419_vm1, %v4194_v2  ;;  %v15015_v2 = vmov 0   ;;  %s15021_s24 = smov 112  }
 0x134   : > { %v4434_v1 = vpop.permute.xlu1 %4433  ;;  %14916 = vset.pattern.permute.xlu1 %v15015_v2  ;;  %14917 = vset.pattern.permute.xlu0 %v15015_v2 }
 0x135   : > { %v2406_v22 = vpop.permute.xlu0 %2405  ;;  %12477 = vmatmul.mubr.msk.f32.vlgmr.msra.gmra.mrb[2].mxu0 %vm415_vm2, %v15885_v10 }
 0x136   : > { %v2414_v25 = vsel %vm2411_vm9, %v15554_v24, %v2406_v22  ;;  %5454 = vrot.lane.b32.xlu1 %v15242_v6, %s15010_s30  ;;  %v2415_v7 = vsel %vm2411_vm9, %v2406_v22, %v15570_v9  ;;  %4528 = vmatprep.mubr.f32.mxu0 %v14990_v0  ;;  %vm5976_vm9 = vcmask 113664   ;;  %s19042_s30 = smov 124  }
 0x137   : > { %5199 = vrot.lane.b32.xlu0 %v15242_v6, %s15009_s12  ;;  %12402 = vmatprep.subr.msk.mxu1 %vm419_vm1, %v2415_v7  ;;  %s19041_s12 = smov 127  }
 0x138   : > { %12403 = vmatpush1.msk.msra.mxu1 %vm419_vm1, %v2414_v25  ;;  %v4432_v28 = vpop.permute.xlu1 %4431 }
 0x139   : > { %v4444_v36 = vsel %vm4443_vm3, %v4432_v28, %v4434_v1  ;;  %v15919_v24 = vpop.permute.xlu0 %4435  ;;  %12404 = vmatmul.mubr.msk.f32.vlgmr.msra.gmra.mrb[0].mxu1 %vm415_vm2, %v15575_v29 }
 0x13a   : > { %5968 = vrot.lane.b32.xlu1 %v15242_v6, %s15012_s29  ;;  %v4445_v9 = vsel %vm4443_vm3, %v4434_v1, %v15919_v24  ;;  %2821 = vmatprep.mubr.f32.mxu1 %v14990_v0  ;;  %s15017_s29 = smov 116  }
 0x13b   : > { %5711 = vrot.lane.b32.xlu0 %v15242_v6, %s15011_s22  ;;  %12479 = vmatprep.subr.msk.mxu0 %vm419_vm1, %v4445_v9  ;;  %s19043_s22 = smov 125  }
 0x13c   : > { %12480 = vmatpush1.msk.msra.mxu0 %vm419_vm1, %v4444_v36  ;;  %v4442_v29 = vpop.permute.xlu1 %4441 }
 0x13d   : > { %v15937_v42 = vpop.permute.xlu0 %4439  ;;  %12485 = vmatprep.subr.msk.mxu0 %vm419_vm1, %v4442_v29  ;;  %12481 = vmatmul.mubr.msk.f32.vlgmr.msra.gmra.mrb[0].mxu0 %vm415_vm2, %v15930_v40 }
 0x13e   : > { %v4448_v32 = vsel %vm4443_vm3, %v15937_v42, %v4442_v29  ;;  %6482 = vrot.lane.b32.xlu1 %v15242_v6, %s15014_s15  ;;  %4670 = vmatprep.mubr.f32.mxu0 %v14990_v0 }
 0x13f   : > { %6225 = vrot.lane.b32.xlu0 %v15242_v6, %s15013_s16  ;;  %12486 = vmatpush1.msk.msra.mxu0 %vm419_vm1, %v4448_v32  ;;  %v14925_v6 = vld [vmem:[%s15153_s14 + $0x10] sm:$0x77]  ;;  %s15016_s14 = smov 115   ;;  %s15018_s16 = smov 113  }
 0x140   : > { %v4688_v33 = vpop.permute.xlu1 %4687 }
 0x141   : > { %v2660_v19 = vpop.permute.xlu0 %2659  ;;  %12487 = vmatmul.mubr.msk.f32.vlgmr.msra.gmra.mrb[2].mxu0 %vm415_vm2, %v15930_v40 }
 0x142   : > { %v2668_v37 = vsel %vm2665_vm10, %v15601_v35, %v2660_v19  ;;  %v2669_v39 = vsel %vm2665_vm10, %v2660_v19, %v15619_v41  ;;  %6486 = vrot.lane.b32.xlu1 %v15178_v5, %s15014_s15  ;;  %4782 = vmatprep.mubr.f32.mxu0 %v14990_v0  ;;  %v15973_v41 = vld [vmem:[%s19035_s1 + $0x88] sm:$0xff] }
 0x143   : > { %6484 = vrot.lane.b32.xlu0 %v14925_v6, %s15014_s15  ;;  %12412 = vmatprep.subr.msk.mxu1 %vm419_vm1, %v2669_v39 }
 0x144   : > { %12413 = vmatpush1.msk.msra.mxu1 %vm419_vm1, %v2668_v37  ;;  %v4686_v44 = vpop.permute.xlu1 %4685 }
 0x145   : > { %v4698_v43 = vsel %vm4697_vm4, %v4686_v44, %v4688_v33  ;;  %v15964_v35 = vpop.permute.xlu0 %4689  ;;  %12414 = vmatmul.mubr.msk.f32.vlgmr.msra.gmra.mrb[0].mxu1 %vm415_vm2, %v15611_v38 }
 0x146   : > { %v4699_v5 = vsel %vm4697_vm4, %v4688_v33, %v15964_v35  ;;  %3075 = vmatprep.mubr.f32.mxu1 %v14990_v0 }
 0x147   : > { %6488 = vrot.lane.b32.xlu0 %v15678_v57, %s15014_s15  ;;  %12489 = vmatprep.subr.msk.mxu0 %vm419_vm1, %v4699_v5  ;;  %s15019_s15 = smov 114  }
 0x148   : > { %12490 = vmatpush1.msk.msra.mxu0 %vm419_vm1, %v4698_v43  ;;  %v4696_v45 = vpop.permute.xlu1 %4695 }
 0x149   : > { %v15980_v50 = vpop.permute.xlu0 %4693  ;;  %12495 = vmatprep.subr.msk.mxu0 %vm419_vm1, %v4696_v45  ;;  %12491 = vmatmul.mubr.msk.f32.vlgmr.msra.gmra.mrb[0].mxu0 %vm415_vm2, %v15973_v41 }
 0x14a   : > { %v4702_v38 = vsel %vm4697_vm4, %v15980_v50, %v4696_v45  ;;  %4924 = vmatprep.mubr.f32.mxu0 %v14990_v0  ;;  %v16112_v45 = vld [vmem:[%s19035_s1 + $0xa8] sm:$0xff] }
 0x14b   : > { %12496 = vmatpush1.msk.msra.mxu0 %vm419_vm1, %v4702_v38 }
 0x14c   : > { %v4942_v57 = vpop.permute.xlu1 %4941 }
 0x14d   : > { %v2914_v49 = vpop.permute.xlu0 %2913  ;;  %12497 = vmatmul.mubr.msk.f32.vlgmr.msra.gmra.mrb[2].mxu0 %vm415_vm2, %v15973_v41 }
 0x14e   : > { %v2922_v51 = vsel %vm2919_vm11, %v15645_v52, %v2914_v49  ;;  %v2923_v18 = vsel %vm2919_vm11, %v2914_v49, %v15664_v54  ;;  %5036 = vmatprep.mubr.f32.mxu0 %v14990_v0  ;;  %v16008_v54 = vld [vmem:[%s19035_s1 + $0x90] sm:$0xff]  ;;  %vm6233_vm11 = vcmask 105472  }
 0x14f   : > { %12422 = vmatprep.subr.msk.mxu1 %vm419_vm1, %v2923_v18 }
 0x150   : > { %12423 = vmatpush1.msk.msra.mxu1 %vm419_vm1, %v2922_v51  ;;  %v4940_v21 = vpop.permute.xlu1 %4939 }
 0x151   : > { %v4952_v26 = vsel %vm4951_vm5, %v4940_v21, %v4942_v57  ;;  %v15999_v56 = vpop.permute.xlu0 %4943  ;;  %12424 = vmatmul.mubr.msk.f32.vlgmr.msra.gmra.mrb[0].mxu1 %vm415_vm2, %v15655_v53 }
 0x152   : > { %v4953_v52 = vsel %vm4951_vm5, %v4942_v57, %v15999_v56  ;;  %3329 = vmatprep.mubr.f32.mxu1 %v14990_v0 }
 0x153   : > { %12499 = vmatprep.subr.msk.mxu0 %vm419_vm1, %v4953_v52 }
 0x154   : > { %12500 = vmatpush1.msk.msra.mxu0 %vm419_vm1, %v4952_v26  ;;  %v4950_v55 = vpop.permute.xlu1 %4949 }
 0x155   : > { %v16013_v60 = vpop.permute.xlu0 %4947  ;;  %12505 = vmatprep.subr.msk.mxu0 %vm419_vm1, %v4950_v55  ;;  %12501 = vmatmul.mubr.msk.f32.vlgmr.msra.gmra.mrb[0].mxu0 %vm415_vm2, %v16008_v54 }
 0x156   : > { %v4956_v53 = vsel %vm4951_vm5, %v16013_v60, %v4950_v55  ;;  %5178 = vmatprep.mubr.f32.mxu0 %v14990_v0 }
 0x157   : > { %12506 = vmatpush1.msk.msra.mxu0 %vm419_vm1, %v4956_v53 }
 0x158   : > { %v5196_v58 = vpop.permute.xlu1 %5195 }
 0x159   : > { %v3168_v8 = vpop.permute.xlu0 %3167  ;;  %12507 = vmatmul.mubr.msk.f32.vlgmr.msra.gmra.mrb[2].mxu0 %vm415_vm2, %v16008_v54 }
 0x15a   : > { %v3176_v11 = vsel %vm3173_vm12, %v15693_v14, %v3168_v8  ;;  %v3177_v23 = vsel %vm3173_vm12, %v3168_v8, %v15712_v16  ;;  %5290 = vmatprep.mubr.f32.mxu0 %v14990_v0  ;;  %v16041_v16 = vld [vmem:[%s19035_s1 + $0x98] sm:$0xff]  ;;  %vm6490_vm12 = vcmask 97280  }
 0x15b   : > { %12432 = vmatprep.subr.msk.mxu1 %vm419_vm1, %v3177_v23 }
 0x15c   : > { %12433 = vmatpush1.msk.msra.mxu1 %vm419_vm1, %v3176_v11  ;;  %v5194_v27 = vpop.permute.xlu1 %5193 }
 0x15d   : > { %v5206_v4 = vsel %vm5205_vm6, %v5194_v27, %v5196_v58  ;;  %v16032_v34 = vpop.permute.xlu0 %5197  ;;  %12434 = vmatmul.mubr.msk.f32.vlgmr.msra.gmra.mrb[0].mxu1 %vm415_vm2, %v15703_v15  ;;  %v6731_v15 = vld [vmem:[%s19011_s2] sm:$0xff] }
 0x15e   : > { %v5207_v14 = vsel %vm5205_vm6, %v5196_v58, %v16032_v34  ;;  %3583 = vmatprep.mubr.f32.mxu1 %v14990_v0  ;;  %6734 = vperm.xlu1 %14916, %v6731_v15  }
 0x15f   : > { %12509 = vmatprep.subr.msk.mxu0 %vm419_vm1, %v5207_v14 }
 0x160   : > { %12510 = vmatpush1.msk.msra.mxu0 %vm419_vm1, %v5206_v4  ;;  %v5204_v62 = vpop.permute.xlu1 %5203 }
 0x161   : > { %v16046_v3 = vpop.permute.xlu0 %5201  ;;  %12515 = vmatprep.subr.msk.mxu0 %vm419_vm1, %v5204_v62  ;;  %12511 = vmatmul.mubr.msk.f32.vlgmr.msra.gmra.mrb[0].mxu0 %vm415_vm2, %v16041_v16 }
 0x162   : > { %v5210_v12 = vsel %vm5205_vm6, %v16046_v3, %v5204_v62  ;;  %5432 = vmatprep.mubr.f32.mxu0 %v14990_v0 }
 0x163   : > { %12516 = vmatpush1.msk.msra.mxu0 %vm419_vm1, %v5210_v12 }
 0x164   : > { %v5451_v1 = vpop.permute.xlu1 %5450 }
 0x165   : > { %v3422_v22 = vpop.permute.xlu0 %3421  ;;  %12517 = vmatmul.mubr.msk.f32.vlgmr.msra.gmra.mrb[2].mxu0 %vm415_vm2, %v16041_v16 }
 0x166   : > { %v3430_v25 = vsel %vm3427_vm13, %v15738_v13, %v3422_v22  ;;  %v3431_v7 = vsel %vm3427_vm13, %v3422_v22, %v15757_v31  ;;  %5548 = vmatprep.mubr.f32.mxu0 %v14990_v0  ;;  %v16077_v31 = vld [vmem:[%s19035_s1 + $0xa0] sm:$0xff]  ;;  %vm9623_vm13 = vcmask 752640  }
 0x167   : > { %12442 = vmatprep.subr.msk.mxu1 %vm419_vm1, %v3431_v7 }
 0x168   : > { %12443 = vmatpush1.msk.msra.mxu1 %vm419_vm1, %v3430_v25  ;;  %v5449_v28 = vpop.permute.xlu1 %5448 }
 0x169   : > { %v5463_v36 = vsel %vm5462_vm7, %v5449_v28, %v5451_v1  ;;  %v16068_v9 = vpop.permute.xlu0 %5452  ;;  %12444 = vmatmul.mubr.msk.f32.vlgmr.msra.gmra.mrb[0].mxu1 %vm415_vm2, %v15748_v30 }
 0x16a   : > { %v5464_v13 = vsel %vm5462_vm7, %v5451_v1, %v16068_v9  ;;  %3837 = vmatprep.mubr.f32.mxu1 %v14990_v0  ;;  %v16180_v1 = vld [vmem:[%s19035_s1 + $0xb8] sm:$0xff] }
 0x16b   : > { %12519 = vmatprep.subr.msk.mxu0 %vm419_vm1, %v5464_v13 }
 0x16c   : > { %12520 = vmatpush1.msk.msra.mxu0 %vm419_vm1, %v5463_v36  ;;  %v5461_v29 = vpop.permute.xlu1 %5460 }
 0x16d   : > { %v5459_v32 = vpop.permute.xlu0 %5458  ;;  %12521 = vmatmul.mubr.msk.f32.vlgmr.msra.gmra.mrb[0].mxu0 %vm415_vm2, %v16077_v31 }
 0x16e   : > { %v5468_v30 = vsel %vm5462_vm7, %v5459_v32, %v5461_v29  ;;  %5690 = vmatprep.mubr.f32.mxu0 %v14990_v0 }
 0x16f   : > { %12525 = vmatprep.subr.msk.mxu0 %vm419_vm1, %v5468_v30 }
 0x170   : > { %v3676_v33 = vpop.permute.xlu1 %3675 }
 0x171   : > { %v3684_v19 = vsel %vm3681_vm14, %v15786_v47, %v3676_v33  ;;  %v3685_v37 = vsel %vm3681_vm14, %v3676_v33, %v15802_v48  ;;  %v16091_v39 = vpop.permute.xlu0 %5456  ;;  %vm9716_vm14 = vcmask 744448  }
 0x172   : > { %v5467_v6 = vsel %vm5462_vm7, %v16091_v39, %v5459_v32  ;;  %12452 = vmatprep.subr.msk.mxu1 %vm419_vm1, %v3685_v37 }
 0x173   : > { %12526 = vmatpush1.msk.msra.mxu0 %vm419_vm1, %v5467_v6  ;;  %12453 = vmatpush1.msk.msra.mxu1 %vm419_vm1, %v3684_v19 }
 0x174   : > { %v16098_v44 = vpop.permute.xlu1 %5709  ;;  %12527 = vmatmul.mubr.msk.f32.vlgmr.msra.gmra.mrb[2].mxu0 %vm415_vm2, %v16077_v31  ;;  %12454 = vmatmul.mubr.msk.f32.vlgmr.msra.gmra.mrb[0].mxu1 %vm415_vm2, %v15796_v46 }
 0x175   : > { %v5708_v47 = vpop.permute.xlu0 %5707  ;;  %5805 = vmatprep.mubr.f32.mxu0 %v14990_v0  ;;  %4091 = vmatprep.mubr.f32.mxu1 %v14990_v0 }
 0x176   : > { %v5721_v48 = vsel %vm5719_vm8, %v5708_v47, %v16098_v44 }
 0x177   : > { %12529 = vmatprep.subr.msk.mxu0 %vm419_vm1, %v5721_v48 }
 0x178   : > { %v5716_v43 = vpop.permute.xlu1 %5715 }
 0x179   : > { %v5706_v5 = vpop.permute.xlu0 %5705 }
 0x17a   : > { %v5720_v38 = vsel %vm5719_vm8, %v5706_v5, %v5708_v47 }
 0x17b   : > { %12530 = vmatpush1.msk.msra.mxu0 %vm419_vm1, %v5720_v38 }
 0x17c   : > { %v16116_v46 = vpop.permute.xlu1 %5713  ;;  %12531 = vmatmul.mubr.msk.f32.vlgmr.msra.gmra.mrb[0].mxu0 %vm415_vm2, %v16112_v45 }
 0x17d   : > { %v5724_v57 = vsel %vm5719_vm8, %v16116_v46, %v5716_v43  ;;  %v5718_v49 = vpop.permute.xlu0 %5717  ;;  %5947 = vmatprep.mubr.f32.mxu0 %v14990_v0 }
 0x17e   : > { %v5725_v51 = vsel %vm5719_vm8, %v5716_v43, %v5718_v49 }
 0x17f   : > { %12535 = vmatprep.subr.msk.mxu0 %vm419_vm1, %v5725_v51 }
 0x180   : > { %12536 = vmatpush1.msk.msra.mxu0 %vm419_vm1, %v5724_v57  ;;  %v5965_v18 = vpop.permute.xlu1 %5964 }
 0x181   : > { %v3930_v21 = vpop.permute.xlu0 %3929  ;;  %12537 = vmatmul.mubr.msk.f32.vlgmr.msra.gmra.mrb[2].mxu0 %vm415_vm2, %v16112_v45 }
 0x182   : > { %v3938_v26 = vsel %vm3935_vm15, %v15829_v59, %v3930_v21  ;;  %v3939_v52 = vsel %vm3935_vm15, %v3930_v21, %v15847_v63  ;;  %6062 = vmatprep.mubr.f32.mxu0 %v14990_v0  ;;  %v16145_v63 = vld [vmem:[%s19035_s1 + $0xb0] sm:$0xff]  ;;  %vm9809_vm15 = vcmask 736256  }
 0x183   : > { %12462 = vmatprep.subr.msk.mxu1 %vm419_vm1, %v3939_v52  ;;  %v12571_v21 = vld [vmem:[%s19012_s3 + $0x550] sm:$0xff]  ;;  %v12576_v52 = vld [vmem:[%s19012_s3 + $0x578] sm:$0xff] }
 0x184   : > { %12463 = vmatpush1.msk.msra.mxu1 %vm419_vm1, %v3938_v26  ;;  %v5963_v55 = vpop.permute.xlu1 %5962  ;;  %v12574_v26 = vld [vmem:[%s19012_s3 + $0x568] sm:$0xff] }
 0x185   : > { %v5977_v53 = vsel %vm5976_vm9, %v5963_v55, %v5965_v18  ;;  %v16136_v58 = vpop.permute.xlu0 %5966  ;;  %12464 = vmatmul.mubr.msk.f32.vlgmr.msra.gmra.mrb[0].mxu1 %vm415_vm2, %v15840_v61 }
 0x186   : > { %v5978_v59 = vsel %vm5976_vm9, %v5965_v18, %v16136_v58  ;;  %4345 = vmatprep.mubr.f32.mxu1 %v14990_v0 }
 0x187   : > { %12539 = vmatprep.subr.msk.mxu0 %vm419_vm1, %v5978_v59 }
 0x188   : > { %12540 = vmatpush1.msk.msra.mxu0 %vm419_vm1, %v5977_v53  ;;  %v5975_v8 = vpop.permute.xlu1 %5974 }
 0x189   : > { %v5973_v11 = vpop.permute.xlu0 %5972  ;;  %12541 = vmatmul.mubr.msk.f32.vlgmr.msra.gmra.mrb[0].mxu0 %vm415_vm2, %v16145_v63 }
 0x18a   : > { %v5982_v61 = vsel %vm5976_vm9, %v5973_v11, %v5975_v8  ;;  %6204 = vmatprep.mubr.f32.mxu0 %v14990_v0 }
 0x18b   : > { %12545 = vmatprep.subr.msk.mxu0 %vm419_vm1, %v5982_v61 }
 0x18c   : > { %v4184_v23 = vpop.permute.xlu1 %4183 }
 0x18d   : > { %v4192_v27 = vsel %vm4189_vm0, %v15874_v17, %v4184_v23  ;;  %v4193_v4 = vsel %vm4189_vm0, %v4184_v23, %v15892_v20  ;;  %v16159_v14 = vpop.permute.xlu0 %5970  ;;  %v12578_v23 = vld [vmem:[%s19012_s3 + $0x588] sm:$0xff]  ;;  %vm9902_vm0 = vcmask 728064  }
 0x18e   : > { %v5981_v62 = vsel %vm5976_vm9, %v16159_v14, %v5973_v11  ;;  %12472 = vmatprep.subr.msk.mxu1 %vm419_vm1, %v4193_v4 }
 0x18f   : > { %12546 = vmatpush1.msk.msra.mxu0 %vm419_vm1, %v5981_v62  ;;  %12473 = vmatpush1.msk.msra.mxu1 %vm419_vm1, %v4192_v27  ;;  %v12580_v27 = vld [vmem:[%s19012_s3 + $0x598] sm:$0xff] }
 0x190   : > { %v16166_v15 = vpop.permute.xlu1 %6223  ;;  %12547 = vmatmul.mubr.msk.f32.vlgmr.msra.gmra.mrb[2].mxu0 %vm415_vm2, %v16145_v63  ;;  %12474 = vmatmul.mubr.msk.f32.vlgmr.msra.gmra.mrb[0].mxu1 %vm415_vm2, %v15885_v10  ;;  %v13978_v62 = vpack.c.bf16 %v12580_v27, %v12578_v23 }
 0x191   : > { %v6222_v17 = vpop.permute.xlu0 %6221  ;;  %6319 = vmatprep.mubr.f32.mxu0 %v14990_v0  ;;  %4599 = vmatprep.mubr.f32.mxu1 %v14990_v0 }
 0x192   : > { %v6235_v20 = vsel %vm6233_vm11, %v6222_v17, %v16166_v15 }
 0x193   : > { %12549 = vmatprep.subr.msk.mxu0 %vm419_vm1, %v6235_v20  ;;  %v12579_v20 = vld [vmem:[%s19012_s3 + $0x590] sm:$0xff] }
 0x194   : > { %v6230_v12 = vpop.permute.xlu1 %6229 }
 0x195   : > { %v6220_v2 = vpop.permute.xlu0 %6219 }
 0x196   : > { %v6234_v22 = vsel %vm6233_vm11, %v6220_v2, %v6222_v17  ;;  %v12577_v17 = vld [vmem:[%s19012_s3 + $0x580] sm:$0xff]  ;;  %v12584_v2 = vld [vmem:[%s19012_s3 + $0x5b8] sm:$0xff] }
 0x197   : > { %12550 = vmatpush1.msk.msra.mxu0 %vm419_vm1, %v6234_v22 }
 0x198   : > { %v16184_v10 = vpop.permute.xlu1 %6227  ;;  %12551 = vmatmul.mubr.msk.f32.vlgmr.msra.gmra.mrb[0].mxu0 %vm415_vm2, %v16180_v1 }
 0x199   : > { %v6238_v25 = vsel %vm6233_vm11, %v16184_v10, %v6230_v12  ;;  %v6232_v7 = vpop.permute.xlu0 %6231  ;;  %6461 = vmatprep.mubr.f32.mxu0 %v14990_v0 }
 0x19a   : > { %v6239_v28 = vsel %vm6233_vm11, %v6230_v12, %v6232_v7  ;;  %v12582_v12 = vld [vmem:[%s19012_s3 + $0x5a8] sm:$0xff]  ;;  %v12581_v7 = vld [vmem:[%s19012_s3 + $0x5a0] sm:$0xff] }
 0x19b   : > { %12555 = vmatprep.subr.msk.mxu0 %vm419_vm1, %v6239_v28  ;;  %v12583_v28 = vld [vmem:[%s19012_s3 + $0x5b0] sm:$0xff] }
 0x19c   : > { %12556 = vmatpush1.msk.msra.mxu0 %vm419_vm1, %v6238_v25  ;;  %v6479_v36 = vpop.permute.xlu1 %6478  ;;  %v13980_v25 = vpack.c.bf16 %v12579_v20, %v12577_v17  ;;  %v6758_v17 = vld [vmem:[%s19012_s3 + $0x48] sm:$0xff] }
 0x19d   : > { %v4438_v13 = vpop.permute.xlu0 %4437  ;;  %12557 = vmatmul.mubr.msk.f32.vlgmr.msra.gmra.mrb[2].mxu0 %vm415_vm2, %v16180_v1 }
 0x19e   : > { %v4446_v29 = vsel %vm4443_vm3, %v15919_v24, %v4438_v13  ;;  %v4447_v32 = vsel %vm4443_vm3, %v4438_v13, %v15937_v42  ;;  %6576 = vmatprep.mubr.f32.mxu0 %v14990_v0  ;;  %v16213_v42 = vld [vmem:[%s19035_s1 + $0xc0] sm:$0xff]  ;;  %v13984_v13 = vpack.c.bf16 %v12583_v28, %v12581_v7  ;;  %v12616_v7 = vld [vmem:[%s19012_s3 + $0x6b8] sm:$0xff]  ;;  %s15023_s1 = smov 103   ;;  %vm9995_vm3 = vcmask 719872  }
 0x19f   : > { %12482 = vmatprep.subr.msk.mxu1 %vm419_vm1, %v4447_v32  ;;  %v12585_v32 = vld [vmem:[%s19012_s3 + $0x5c0] sm:$0xff] }
 0x1a0   : > { %12483 = vmatpush1.msk.msra.mxu1 %vm419_vm1, %v4446_v29  ;;  %v6477_v30 = vpop.permute.xlu1 %6476 }
 0x1a1   : > { %v6491_v33 = vsel %vm6490_vm12, %v6477_v30, %v6479_v36  ;;  %12484 = vmatmul.mubr.msk.f32.vlgmr.msra.gmra.mrb[0].mxu1 %vm415_vm2, %v15930_v40  ;;  %v16206_v19 = vpop.permute.xlu0 %6480  ;;  %v12587_v30 = vld [vmem:[%s19012_s3 + $0x5d0] sm:$0xff] }
 0x1a2   : > { %v6492_v24 = vsel %vm6490_vm12, %v6479_v36, %v16206_v19  ;;  %4853 = vmatprep.mubr.f32.mxu1 %v14990_v0  ;;  %v12588_v36 = vld [vmem:[%s19012_s3 + $0x5d8] sm:$0xff] }
 0x1a3   : > { %12559 = vmatprep.subr.msk.mxu0 %vm419_vm1, %v6492_v24  ;;  %v12592_v24 = vld [vmem:[%s19012_s3 + $0x5f8] sm:$0xff] }
 0x1a4   : > { %12560 = vmatpush1.msk.msra.mxu0 %vm419_vm1, %v6491_v33  ;;  %v4946_v37 = vpop.permute.xlu1 %4945  ;;  %v12590_v33 = vld [vmem:[%s19012_s3 + $0x5e8] sm:$0xff] }
 0x1a5   : > { %12561 = vmatmul.mubr.msk.f32.vlgmr.msra.gmra.mrb[0].mxu0 %vm415_vm2, %v16213_v42  ;;  %v4692_v40 = vpop.permute.xlu0 %4691  ;;  %v4955_v48 = vsel %vm4951_vm5, %v4946_v37, %v16013_v60  ;;  %v4954_v5 = vsel %vm4951_vm5, %v15999_v56, %v4946_v37  ;;  %vm10181_vm5 = vcmask 646144  }
 0x1a6   : > { %v4700_v6 = vsel %vm4697_vm4, %v15964_v35, %v4692_v40  ;;  %v4701_v47 = vsel %vm4697_vm4, %v4692_v40, %v15980_v50  ;;  %6718 = vmatprep.mubr.f32.mxu0 %v14990_v0  ;;  %v13990_v40 = vpack.c.bf16 %v12592_v24, %v12590_v33  ;;  %v12613_v33 = vld [vmem:[%s19012_s3 + $0x6a0] sm:$0xff]  ;;  %v12615_v24 = vld [vmem:[%s19012_s3 + $0x6b0] sm:$0xff]  ;;  %vm10088_vm4 = vcmask 654336  }
 0x1a7   : > { %12492 = vmatprep.subr.msk.mxu1 %vm419_vm1, %v4701_v47  ;;  %v12591_v47 = vld [vmem:[%s19012_s3 + $0x5f0] sm:$0xff] }
 0x1a8   : > { %12493 = vmatpush1.msk.msra.mxu1 %vm419_vm1, %v4700_v6  ;;  %v5455_v43 = vpop.permute.xlu1 %5454  ;;  %v12589_v6 = vld [vmem:[%s19012_s3 + $0x5e0] sm:$0xff] }
 0x1a9   : > { %12494 = vmatmul.mubr.msk.f32.vlgmr.msra.gmra.mrb[0].mxu1 %vm415_vm2, %v15973_v41  ;;  %12502 = vmatprep.subr.msk.mxu1 %vm419_vm1, %v4955_v48  ;;  %v5200_v35 = vpop.permute.xlu0 %5199  ;;  %v5466_v49 = vsel %vm5462_vm7, %v5455_v43, %v16091_v39  ;;  %v12569_v39 = vld [vmem:[%s19012_s3 + $0x540] sm:$0xff]  ;;  %v5465_v55 = vsel %vm5462_vm7, %v16068_v9, %v5455_v43  ;;  %v13974_v9 = vpack.c.bf16 %v12576_v52, %v12574_v26  ;;  %v12596_v48 = vld [vmem:[%s19012_s3 + $0x618] sm:$0xff]  ;;  %v12603_v52 = vld [vmem:[%s19012_s3 + $0x650] sm:$0xff] }
 0x1aa   : > { %v5209_v50 = vsel %vm5205_vm6, %v5200_v35, %v16046_v3  ;;  %12503 = vmatpush1.msk.msra.mxu1 %vm419_vm1, %v4954_v5  ;;  %5107 = vmatprep.mubr.f32.mxu1 %v14990_v0  ;;  %v5208_v57 = vsel %vm5205_vm6, %v16032_v34, %v5200_v35  ;;  %v12572_v34 = vld [vmem:[%s19012_s3 + $0x558] sm:$0xff]  ;;  %v13972_v61 = vpack.c.bf16 %v12571_v21, %v12569_v39  ;;  %v12601_v26 = vld [vmem:[%s19012_s3 + $0x640] sm:$0xff]  ;;  %vm10274_vm6 = vcmask 637952  }
 0x1ab   : > { %12512 = vmatprep.subr.msk.mxu1 %vm419_vm1, %v5209_v50  ;;  %v13992_v43 = vpack.c.bf16 %v12591_v47, %v12589_v6  ;;  %v12593_v50 = vld [vmem:[%s19012_s3 + $0x600] sm:$0xff] }
 0x1ac   : > { %v5969_v60 = vpop.permute.xlu1 %5968  ;;  %v6761_v47 = vld [vmem:[%s19012_s3 + $0x60] sm:$0xff] }
 0x1ad   : > { %v16241_v38 = vsel %vm5976_vm9, %v16136_v58, %v5969_v60  ;;  %v5712_v56 = vpop.permute.xlu0 %5711  ;;  %v5980_v22 = vsel %vm5976_vm9, %v5969_v60, %v16159_v14  ;;  %v12586_v14 = vld [vmem:[%s19012_s3 + $0x5c8] sm:$0xff]  ;;  %v12595_v60 = vld [vmem:[%s19012_s3 + $0x610] sm:$0xff]  ;;  %vm10460_vm9 = vcmask 621568  }
 0x1ae   : > { %v5722_v41 = vsel %vm5719_vm8, %v16098_v44, %v5712_v56  ;;  %v5723_v8 = vsel %vm5719_vm8, %v5712_v56, %v16116_v46  ;;  %v12575_v46 = vld [vmem:[%s19012_s3 + $0x570] sm:$0xff]  ;;  %v13986_v29 = vpack.c.bf16 %v12588_v36, %v12586_v14  ;;  %v12598_v56 = vld [vmem:[%s19012_s3 + $0x628] sm:$0xff]  ;;  %v6757_v36 = vld [vmem:[%s19012_s3 + $0x40] sm:$0xff]  ;;  %vm10367_vm8 = vcmask 629760  }
 0x1b0   : > { %v16253_v51 = vpop.permute.xlu1 %6482 }
 0x1b1   : > { %12504 = vmatmul.mubr.msk.f32.vlgmr.msra.gmra.mrb[0].mxu1 %vm415_vm2, %v16008_v54  ;;  %v16249_v3 = vpop.permute.xlu0 %6225  ;;  %v12570_v54 = vld [vmem:[%s19012_s3 + $0x548] sm:$0xff] }
 0x1b2   : > { %12513 = vmatpush1.msk.msra.mxu1 %vm419_vm1, %v5208_v57  ;;  %5361 = vmatprep.mubr.f32.mxu1 %v14990_v0  ;;  %v13970_v59 = vpack.c.bf16 %v12572_v34, %v12570_v54  ;;  %v6237_v37 = vsel %vm6233_vm11, %v16249_v3, %v16184_v10  ;;  %v12594_v10 = vld [vmem:[%s19012_s3 + $0x608] sm:$0xff]  ;;  %v6752_v57 = vld [vmem:[%s19012_s3 + $0x18] sm:$0xff] }
 0x1b3   : > { %12522 = vmatprep.subr.msk.mxu1 %vm419_vm1, %v5466_v49  ;;  %v13994_v35 = vpack.c.bf16 %v12596_v48, %v12594_v10  ;;  %v12597_v49 = vld [vmem:[%s19012_s3 + $0x620] sm:$0xff]  ;;  %v12604_v54 = vld [vmem:[%s19012_s3 + $0x658] sm:$0xff]  ;;  %v6763_v10 = vld [vmem:[%s19012_s3 + $0x70] sm:$0xff] }
 0x1b4   : > { %v6487_v18 = vpop.permute.xlu1 %6486  ;;  %v6766_v48 = vld [vmem:[%s19012_s3 + $0x88] sm:$0xff] }
 0x1b5   : > { %v16258_v44 = vpop.permute.xlu0 %6484 }
 0x1b6   : > { %v6495_v53 = vsel %vm6490_vm12, %v16258_v44, %v6487_v18  ;;  %v6494_v5 = vsel %vm6490_vm12, %v16253_v51, %v16258_v44  ;;  %v12599_v44 = vld [vmem:[%s19012_s3 + $0x630] sm:$0xff] }
 0x1b7   : > { %v14000_v39 = vpack.c.bf16 %v12599_v44, %v12597_v49  ;;  %v6772_v44 = vld [vmem:[%s19012_s3 + $0xb8] sm:$0xff] }
 0x1b9   : > { %12514 = vmatmul.mubr.msk.f32.vlgmr.msra.gmra.mrb[0].mxu1 %vm415_vm2, %v16041_v16  ;;  %v6489_v58 = vpop.permute.xlu0 %6488  ;;  %v12573_v16 = vld [vmem:[%s19012_s3 + $0x560] sm:$0xff] }
 0x1ba   : > { %12523 = vmatpush1.msk.msra.mxu1 %vm419_vm1, %v5465_v55  ;;  %v6496_v11 = vsel %vm6490_vm12, %v6487_v18, %v6489_v58  ;;  %5619 = vmatprep.mubr.f32.mxu1 %v14990_v0  ;;  %v13976_v4 = vpack.c.bf16 %v12575_v46, %v12573_v16  ;;  %v12602_v18 = vld [vmem:[%s19012_s3 + $0x648] sm:$0xff]  ;;  %v6493_v55 = vsel %vm6490_vm12, %v16206_v19, %v16253_v51  ;;  %v12608_v58 = vld [vmem:[%s19012_s3 + $0x678] sm:$0xff]  ;;  %v6749_v19 = vld [vmem:[%s19012_s3] sm:$0xff] }
 0x1bb   : > { %12532 = vmatprep.subr.msk.mxu1 %vm419_vm1, %v5723_v8  ;;  %12565 = vmatprep.subr.msk.mxu0 %vm419_vm1, %v6496_v11  ;;  %v14002_v21 = vpack.c.bf16 %v12604_v54, %v12602_v18  ;;  %v6754_v51 = vld [vmem:[%s19012_s3 + $0x28] sm:$0xff]  ;;  %v6756_v8 = vld [vmem:[%s19012_s3 + $0x38] sm:$0xff]  ;;  %v12621_v54 = vld [vmem:[%s19012_s3 + $0x6e0] sm:$0xff] }
 0x1bc   : > { %12566 = vmatpush1.msk.msra.mxu0 %vm419_vm1, %v6495_v53  ;;  %v12606_v53 = vld [vmem:[%s19012_s3 + $0x668] sm:$0xff]  ;;  %v12612_v46 = vld [vmem:[%s19012_s3 + $0x698] sm:$0xff]  ;;  %v13806_v27 = vpack.c.bf16 %v6756_v8, %v6754_v51  ;;  %v12627_v8 = vld [vmem:[%s19012_s3 + $0x710] sm:$0xff] }
 0x1bd   : > { %12567 = vmatmul.mubr.msk.f32.vlgmr.msra.gmra.mrb[2].mxu0 %vm415_vm2, %v16213_v42  ;;  %13971 = vmatprep.subr.bf16.mxu0 %v13970_v59  ;;  %v14004_v59 = vpack.c.bf16 %v12603_v52, %v12601_v26  ;;  %v14006_v11 = vpack.c.bf16 %v12608_v58, %v12606_v53  ;;  %v12610_v16 = vld [vmem:[%s19012_s3 + $0x688] sm:$0xff]  ;;  %v6771_v53 = vld [vmem:[%s19012_s3 + $0xb0] sm:$0xff] }
 0x1be   : > { %13973 = vmatpush1.bf16.msra.mxu0 %v13972_v61  ;;  %v12605_v61 = vld [vmem:[%s19012_s3 + $0x660] sm:$0xff]  ;;  %v6774_v58 = vld [vmem:[%s19012_s3 + $0xc8] sm:$0xff] }
 0x1bf   : > { %13975 = vmatprep.subr.bf16.mxu0 %v13974_v9  ;;  %v12607_v9 = vld [vmem:[%s19012_s3 + $0x670] sm:$0xff] }
 0x1c0   : > { %v14008_v20 = vpack.c.bf16 %v12607_v9, %v12605_v61  ;;  %v6773_v9 = vld [vmem:[%s19012_s3 + $0xc0] sm:$0xff] }
 0x1c1   : > { %12524 = vmatmul.mubr.msk.f32.vlgmr.msra.gmra.mrb[0].mxu1 %vm415_vm2, %v16077_v31  ;;  %v13982_v31 = vpack.c.bf16 %v12584_v2, %v12582_v12  ;;  %v6760_v12 = vld [vmem:[%s19012_s3 + $0x58] sm:$0xff]  ;;  %v14010_v2 = vpack.c.bf16 %v12612_v46, %v12610_v16  ;;  %v6775_v16 = vld [vmem:[%s19012_s3 + $0xd0] sm:$0xff] }
 0x1c2   : > { %12533 = vmatpush1.msk.msra.mxu1 %vm419_vm1, %v5722_v41  ;;  %5876 = vmatprep.mubr.f32.mxu1 %v14990_v0  ;;  %v12600_v41 = vld [vmem:[%s19012_s3 + $0x638] sm:$0xff]  ;;  %v13810_v14 = vpack.c.bf16 %v6760_v12, %v6758_v17  ;;  %v6777_v17 = vld [vmem:[%s19012_s3 + $0xe0] sm:$0xff]  ;;  %v6782_v12 = vld [vmem:[%s19012_s3 + $0x108] sm:$0xff] }
 0x1c3   : > { %12542 = vmatprep.subr.msk.mxu1 %vm419_vm1, %v5980_v22  ;;  %13977 = vmatpush1.bf16.msra.mxu0 %v13976_v4  ;;  %v6753_v4 = vld [vmem:[%s19012_s3 + $0x20] sm:$0xff] }
 0x1c4   : > { %13979 = vmatprep.subr.bf16.mxu0 %v13978_v62  ;;  %v6755_v62 = vld [vmem:[%s19012_s3 + $0x30] sm:$0xff]  ;;  %v12609_v22 = vld [vmem:[%s19012_s3 + $0x680] sm:$0xff] }
 0x1c5   : > { %v13808_v28 = vpack.c.bf16 %v6755_v62, %v6753_v4  ;;  %v13828_v4 = vpack.c.bf16 %v6775_v16, %v6773_v9  ;;  %v6809_v16 = vld [vmem:[%s19012_s3 + $0x1e0] sm:$0xff] }
 0x1c7   : > { %13981 = vmatpush1.bf16.msra.mxu0 %v13980_v25  ;;  %v12611_v25 = vld [vmem:[%s19012_s3 + $0x690] sm:$0xff] }
 0x1c8   : > { %13983 = vmatprep.subr.bf16.mxu0 %v13982_v31  ;;  %v12614_v31 = vld [vmem:[%s19012_s3 + $0x6a8] sm:$0xff] }
 0x1c9   : > { %12534 = vmatmul.mubr.msk.f32.vlgmr.msra.gmra.mrb[0].mxu1 %vm415_vm2, %v16112_v45  ;;  %v13988_v45 = vpack.c.bf16 %v12587_v30, %v12585_v32  ;;  %v6764_v32 = vld [vmem:[%s19012_s3 + $0x78] sm:$0xff]  ;;  %v14014_v30 = vpack.c.bf16 %v12616_v7, %v12614_v31 }
 0x1ca   : > { %12543 = vmatpush1.msk.msra.mxu1 %vm419_vm1, %v16241_v38  ;;  %6133 = vmatprep.mubr.f32.mxu1 %v14990_v0  ;;  %v6236_v38 = vsel %vm6233_vm11, %v16166_v15, %v16249_v3  ;;  %v6750_v15 = vld [vmem:[%s19012_s3 + $0x8] sm:$0xff]  ;;  %v13998_v3 = vpack.c.bf16 %v12600_v41, %v12598_v56  ;;  %v12624_v56 = vld [vmem:[%s19012_s3 + $0x6f8] sm:$0xff]  ;;  %v13816_v41 = vpack.c.bf16 %v6763_v10, %v6761_v47  ;;  %v6787_v47 = vld [vmem:[%s19012_s3 + $0x130] sm:$0xff]  ;;  %vm12233_vm11 = vcmask 98304  }
 0x1cb   : > { %12552 = vmatprep.subr.msk.mxu1 %vm419_vm1, %v6237_v37  ;;  %13985 = vmatpush1.bf16.msra.mxu0 %v13984_v13  ;;  %v13802_v34 = vpack.c.bf16 %v6752_v57, %v6750_v15  ;;  %v6762_v13 = vld [vmem:[%s19012_s3 + $0x68] sm:$0xff]  ;;  %v6767_v57 = vld [vmem:[%s19012_s3 + $0x90] sm:$0xff] }
 0x1cc   : > { %13987 = vmatprep.subr.bf16.mxu0 %v13986_v29  ;;  %v14012_v29 = vpack.c.bf16 %v12611_v25, %v12609_v22  ;;  %v12618_v37 = vld [vmem:[%s19012_s3 + $0x6c8] sm:$0xff]  ;;  %v13814_v6 = vpack.c.bf16 %v6764_v32, %v6762_v13  ;;  %v12632_v25 = vld [vmem:[%s19012_s3 + $0x738] sm:$0xff]  ;;  %v6783_v13 = vld [vmem:[%s19012_s3 + $0x110] sm:$0xff] }
 0x1cd   : > { %v12630_v22 = vld [vmem:[%s19012_s3 + $0x728] sm:$0xff] }
 0x1ce   : > { %v14030_v7 = vpack.c.bf16 %v12632_v25, %v12630_v22  ;;  %v6786_v32 = vld [vmem:[%s19012_s3 + $0x128] sm:$0xff] }
 0x1cf   : > { %13989 = vmatpush1.bf16.msra.mxu0 %v13988_v45  ;;  %v12620_v45 = vld [vmem:[%s19012_s3 + $0x6d8] sm:$0xff]  ;;  %v6790_v10 = vld [vmem:[%s19012_s3 + $0x148] sm:$0xff] }
 0x1d0   : > { %13991 = vmatprep.subr.bf16.mxu0 %v13990_v40 }
 0x1d1   : > { %12544 = vmatmul.mubr.msk.f32.vlgmr.msra.gmra.mrb[0].mxu1 %vm415_vm2, %v16145_v63  ;;  %v13996_v63 = vpack.c.bf16 %v12595_v60, %v12593_v50  ;;  %v12617_v50 = vld [vmem:[%s19012_s3 + $0x6c0] sm:$0xff]  ;;  %v12619_v60 = vld [vmem:[%s19012_s3 + $0x6d0] sm:$0xff] }
 0x1d2   : > { %12553 = vmatpush1.msk.msra.mxu1 %vm419_vm1, %v6236_v38  ;;  %6390 = vmatprep.mubr.f32.mxu1 %v14990_v0  ;;  %v12622_v38 = vld [vmem:[%s19012_s3 + $0x6e8] sm:$0xff]  ;;  %v14020_v49 = vpack.c.bf16 %v12619_v60, %v12617_v50  ;;  %v6791_v50 = vld [vmem:[%s19012_s3 + $0x150] sm:$0xff] }
 0x1d3   : > { %12562 = vmatprep.subr.msk.mxu1 %vm419_vm1, %v6494_v5  ;;  %13993 = vmatpush1.bf16.msra.mxu0 %v13992_v43  ;;  %v14016_v43 = vpack.c.bf16 %v12615_v24, %v12613_v33  ;;  %v6768_v5 = vld [vmem:[%s19012_s3 + $0x98] sm:$0xff]  ;;  %v14022_v18 = vpack.c.bf16 %v12624_v56, %v12622_v38  ;;  %v12634_v33 = vld [vmem:[%s19012_s3 + $0x748] sm:$0xff] }
 0x1d4   : > { %13995 = vmatprep.subr.bf16.mxu0 %v13994_v35  ;;  %v14018_v35 = vpack.c.bf16 %v12620_v45, %v12618_v37  ;;  %v13818_v15 = vpack.c.bf16 %v6768_v5, %v6766_v48  ;;  %v12636_v24 = vld [vmem:[%s19012_s3 + $0x758] sm:$0xff]  ;;  %v6794_v60 = vld [vmem:[%s19012_s3 + $0x168] sm:$0xff] }
 0x1d5   : > { %v14034_v45 = vpack.c.bf16 %v12636_v24, %v12634_v33  ;;  %v6792_v48 = vld [vmem:[%s19012_s3 + $0x158] sm:$0xff]  ;;  %v6817_v33 = vld [vmem:[%s19012_s3 + $0x220] sm:$0xff]  ;;  %v6819_v24 = vld [vmem:[%s19012_s3 + $0x230] sm:$0xff] }
 0x1d6   : > { %v13842_v5 = vpack.c.bf16 %v6792_v48, %v6790_v10  ;;  %v6796_v38 = vld [vmem:[%s19012_s3 + $0x178] sm:$0xff]  ;;  %v6822_v10 = vld [vmem:[%s19012_s3 + $0x248] sm:$0xff] }
 0x1d7   : > { %13997 = vmatpush1.bf16.msra.mxu0 %v13996_v63  ;;  %v6765_v63 = vld [vmem:[%s19012_s3 + $0x80] sm:$0xff]  ;;  %v6824_v48 = vld [vmem:[%s19012_s3 + $0x258] sm:$0xff] }
 0x1d8   : > { %13999 = vmatprep.subr.bf16.mxu0 %v13998_v3  ;;  %v6770_v3 = vld [vmem:[%s19012_s3 + $0xa8] sm:$0xff]  ;;  %v13820_v26 = vpack.c.bf16 %v6767_v57, %v6765_v63  ;;  %v6795_v63 = vld [vmem:[%s19012_s3 + $0x170] sm:$0xff] }
 0x1d9   : > { %12554 = vmatmul.mubr.msk.f32.vlgmr.msra.gmra.mrb[0].mxu1 %vm415_vm2, %v16180_v1  ;;  %v6751_v1 = vld [vmem:[%s19012_s3 + $0x10] sm:$0xff]  ;;  %v13822_v52 = vpack.c.bf16 %v6772_v44, %v6770_v3  ;;  %v6798_v57 = vld [vmem:[%s19012_s3 + $0x188] sm:$0xff]  ;;  %v6800_v3 = vld [vmem:[%s19012_s3 + $0x198] sm:$0xff] }
 0x1da   : > { %12563 = vmatpush1.msk.msra.mxu1 %vm419_vm1, %v6493_v55  ;;  %6647 = vmatprep.mubr.f32.mxu1 %v14990_v0  ;;  %v13804_v23 = vpack.c.bf16 %v6751_v1, %v6749_v19  ;;  %v6769_v55 = vld [vmem:[%s19012_s3 + $0xa0] sm:$0xff]  ;;  %v6776_v1 = vld [vmem:[%s19012_s3 + $0xd8] sm:$0xff]  ;;  %v13850_v44 = vpack.c.bf16 %v6800_v3, %v6798_v57  ;;  %v6826_v57 = vld [vmem:[%s19012_s3 + $0x268] sm:$0xff]  ;;  %vm6917_vm1 = vcmask 261120  }
 0x1db   : > { %13803 = vmatprep.subr.bf16.mxu1 %v13802_v34  ;;  %14001 = vmatpush1.bf16.msra.mxu0 %v14000_v39  ;;  %v12623_v34 = vld [vmem:[%s19012_s3 + $0x6f0] sm:$0xff]  ;;  %v12626_v39 = vld [vmem:[%s19012_s3 + $0x708] sm:$0xff]  ;;  %v13826_v61 = vpack.c.bf16 %v6776_v1, %v6774_v58  ;;  %v6808_v58 = vld [vmem:[%s19012_s3 + $0x1d8] sm:$0xff] }
 0x1dc   : > { %14003 = vmatprep.subr.bf16.mxu0 %v14002_v21  ;;  %v12628_v21 = vld [vmem:[%s19012_s3 + $0x718] sm:$0xff]  ;;  %v14024_v19 = vpack.c.bf16 %v12623_v34, %v12621_v54  ;;  %v6799_v54 = vld [vmem:[%s19012_s3 + $0x190] sm:$0xff]  ;;  %v6802_v34 = vld [vmem:[%s19012_s3 + $0x1a8] sm:$0xff] }
 0x1dd   : > { %v14026_v51 = vpack.c.bf16 %v12628_v21, %v12626_v39  ;;  %v6804_v39 = vld [vmem:[%s19012_s3 + $0x1b8] sm:$0xff] }
 0x1de   : > { %v6828_v3 = vld [vmem:[%s19012_s3 + $0x278] sm:$0xff] }
 0x1df   : > { %14005 = vmatpush1.bf16.msra.mxu0 %v14004_v59  ;;  %v12625_v59 = vld [vmem:[%s19012_s3 + $0x700] sm:$0xff] }
 0x1e0   : > { %14007 = vmatprep.subr.bf16.mxu0 %v14006_v11  ;;  %v13824_v11 = vpack.c.bf16 %v6771_v53, %v6769_v55  ;;  %v14028_v46 = vpack.c.bf16 %v12627_v8, %v12625_v59  ;;  %v6803_v55 = vld [vmem:[%s19012_s3 + $0x1b0] sm:$0xff]  ;;  %v6806_v53 = vld [vmem:[%s19012_s3 + $0x1c8] sm:$0xff] }
 0x1e1   : > { %12564 = vmatmul.mubr.msk.f32.vlgmr.msra.gmra.mrb[0].mxu1 %vm415_vm2, %v16213_v42  ;;  %v6759_v42 = vld [vmem:[%s19012_s3 + $0x50] sm:$0xff]  ;;  %v13858_v1 = vpack.c.bf16 %v6808_v58, %v6806_v53  ;;  %v6810_v8 = vld [vmem:[%s19012_s3 + $0x1e8] sm:$0xff]  ;;  %v6832_v58 = vld [vmem:[%s19012_s3 + $0x298] sm:$0xff]  ;;  %vm8295_vm2 = vcmask 64512  }
 0x1e2   : > { %13805 = vmatpush1.bf16.msra.mxu1 %v13804_v23  ;;  %v13812_v40 = vpack.c.bf16 %v6759_v42, %v6757_v36  ;;  %v6778_v23 = vld [vmem:[%s19012_s3 + $0xe8] sm:$0xff]  ;;  %v6781_v42 = vld [vmem:[%s19012_s3 + $0x100] sm:$0xff]  ;;  %v6807_v59 = vld [vmem:[%s19012_s3 + $0x1d0] sm:$0xff] }
 0x1e3   : > { %13807 = vmatprep.subr.bf16.mxu1 %v13806_v27  ;;  %14009 = vmatpush1.bf16.msra.mxu0 %v14008_v20  ;;  %v6780_v27 = vld [vmem:[%s19012_s3 + $0xf8] sm:$0xff]  ;;  %v6779_v20 = vld [vmem:[%s19012_s3 + $0xf0] sm:$0xff]  ;;  %v13836_v37 = vpack.c.bf16 %v6783_v13, %v6781_v42  ;;  %v12638_v42 = vld [vmem:[%s19012_s3 + $0x768] sm:$0xff] }
 0x1e4   : > { %14011 = vmatprep.subr.bf16.mxu0 %v14010_v2  ;;  %v13830_v62 = vpack.c.bf16 %v6780_v27, %v6778_v23  ;;  %v6784_v2 = vld [vmem:[%s19012_s3 + $0x118] sm:$0xff]  ;;  %v13832_v31 = vpack.c.bf16 %v6779_v20, %v6777_v17  ;;  %v6814_v23 = vld [vmem:[%s19012_s3 + $0x208] sm:$0xff]  ;;  %v16708_v17 = vpop.permute.xlu1 %6734 }
 0x1e5   : > { %v13834_v36 = vpack.c.bf16 %v6784_v2, %v6782_v12  ;;  %v6816_v27 = vld [vmem:[%s19012_s3 + $0x218] sm:$0xff]  ;;  %v6813_v12 = vld [vmem:[%s19012_s3 + $0x200] sm:$0xff]  ;;  %v6815_v2 = vld [vmem:[%s19012_s3 + $0x210] sm:$0xff] }
 0x1e6   : > { %13809 = vmatpush1.bf16.msra.mxu1 %v13808_v28  ;;  %v12629_v28 = vld [vmem:[%s19012_s3 + $0x720] sm:$0xff]  ;;  %v12640_v13 = vld [vmem:[%s19012_s3 + $0x778] sm:$0xff]  ;;  %v6830_v53 = vld [vmem:[%s19012_s3 + $0x288] sm:$0xff] }
 0x1e7   : > { %13811 = vmatprep.subr.bf16.mxu1 %v13810_v14  ;;  %14013 = vmatpush1.bf16.msra.mxu0 %v14012_v29  ;;  %v12631_v14 = vld [vmem:[%s19012_s3 + $0x730] sm:$0xff] }
 0x1e8   : > { %14015 = vmatprep.subr.bf16.mxu0 %v14014_v30  ;;  %v14032_v29 = vpack.c.bf16 %v12631_v14, %v12629_v28  ;;  %v6788_v30 = vld [vmem:[%s19012_s3 + $0x138] sm:$0xff]  ;;  %v6818_v28 = vld [vmem:[%s19012_s3 + $0x228] sm:$0xff] }
 0x1ea   : > { %13813 = vmatpush1.bf16.msra.mxu1 %v13812_v40  ;;  %v13838_v40 = vpack.c.bf16 %v6788_v30, %v6786_v32  ;;  %v13868_v32 = vpack.c.bf16 %v6815_v2, %v6813_v12  ;;  %v6833_v2 = vld [vmem:[%s19012_s3 + $0x2a0] sm:$0xff] }
 0x1eb   : > { %13815 = vmatprep.subr.bf16.mxu1 %v13814_v6  ;;  %14017 = vmatpush1.bf16.msra.mxu0 %v14016_v43  ;;  %v6785_v6 = vld [vmem:[%s19012_s3 + $0x120] sm:$0xff] }
 0x1ec   : > { %14019 = vmatprep.subr.bf16.mxu0 %v14018_v35  ;;  %v13840_v43 = vpack.c.bf16 %v6787_v47, %v6785_v6  ;;  %v6789_v35 = vld [vmem:[%s19012_s3 + $0x140] sm:$0xff]  ;;  %v12639_v47 = vld [vmem:[%s19012_s3 + $0x770] sm:$0xff] }
 0x1ed   : > { %v13844_v56 = vpack.c.bf16 %v6791_v50, %v6789_v35  ;;  %v12637_v6 = vld [vmem:[%s19012_s3 + $0x760] sm:$0xff]  ;;  %v13872_v35 = vpack.c.bf16 %v6819_v24, %v6817_v33 }
 0x1ee   : > { %13817 = vmatpush1.bf16.msra.mxu1 %v13816_v41  ;;  %v13846_v41 = vpack.c.bf16 %v6796_v38, %v6794_v60  ;;  %v14040_v50 = vpack.c.bf16 %v12639_v47, %v12637_v6  ;;  %v6821_v60 = vld [vmem:[%s19012_s3 + $0x240] sm:$0xff]  ;;  %v6823_v38 = vld [vmem:[%s19012_s3 + $0x250] sm:$0xff] }
 0x1ef   : > { %13819 = vmatprep.subr.bf16.mxu1 %v13818_v15  ;;  %14021 = vmatpush1.bf16.msra.mxu0 %v14020_v49  ;;  %v6793_v15 = vld [vmem:[%s19012_s3 + $0x160] sm:$0xff] }
 0x1f0   : > { %14023 = vmatprep.subr.bf16.mxu0 %v14022_v18  ;;  %v13848_v49 = vpack.c.bf16 %v6795_v63, %v6793_v15  ;;  %v6797_v18 = vld [vmem:[%s19012_s3 + $0x180] sm:$0xff]  ;;  %v12643_v63 = vld [vmem:[%s19012_s3 + $0x790] sm:$0xff] }
 0x1f1   : > { %v13852_v21 = vpack.c.bf16 %v6799_v54, %v6797_v18  ;;  %v12641_v15 = vld [vmem:[%s19012_s3 + $0x780] sm:$0xff]  ;;  %v13876_v18 = vpack.c.bf16 %v6823_v38, %v6821_v60 }
 0x1f2   : > { %13821 = vmatpush1.bf16.msra.mxu1 %v13820_v26  ;;  %v13854_v26 = vpack.c.bf16 %v6804_v39, %v6802_v34  ;;  %v14044_v54 = vpack.c.bf16 %v12643_v63, %v12641_v15  ;;  %v6825_v34 = vld [vmem:[%s19012_s3 + $0x260] sm:$0xff]  ;;  %v6827_v39 = vld [vmem:[%s19012_s3 + $0x270] sm:$0xff] }
 0x1f3   : > { %13823 = vmatprep.subr.bf16.mxu1 %v13822_v52  ;;  %14025 = vmatpush1.bf16.msra.mxu0 %v14024_v19  ;;  %v6801_v52 = vld [vmem:[%s19012_s3 + $0x1a0] sm:$0xff] }
 0x1f4   : > { %14027 = vmatprep.subr.bf16.mxu0 %v14026_v51  ;;  %v13856_v19 = vpack.c.bf16 %v6803_v55, %v6801_v52  ;;  %v6805_v51 = vld [vmem:[%s19012_s3 + $0x1c0] sm:$0xff]  ;;  %v12647_v55 = vld [vmem:[%s19012_s3 + $0x7b0] sm:$0xff] }
 0x1f5   : > { %v12645_v52 = vld [vmem:[%s19012_s3 + $0x7a0] sm:$0xff] }
 0x1f6   : > { %13825 = vmatpush1.bf16.msra.mxu1 %v13824_v11  ;;  %v6812_v11 = vld [vmem:[%s19012_s3 + $0x1f8] sm:$0xff]  ;;  %v6837_v24 = vld [vmem:[%s19012_s3 + $0x2c0] sm:$0xff] }
 0x1f7   : > { %13827 = vmatprep.subr.bf16.mxu1 %v13826_v61  ;;  %14029 = vmatpush1.bf16.msra.mxu0 %v14028_v46  ;;  %v13860_v61 = vpack.c.bf16 %v6807_v59, %v6805_v51  ;;  %v13862_v9 = vpack.c.bf16 %v6812_v11, %v6810_v8  ;;  %v6811_v46 = vld [vmem:[%s19012_s3 + $0x1f0] sm:$0xff]  ;;  %v13880_v51 = vpack.c.bf16 %v6827_v39, %v6825_v34  ;;  %v6829_v8 = vld [vmem:[%s19012_s3 + $0x280] sm:$0xff] }
 0x1f8   : > { %14031 = vmatprep.subr.bf16.mxu0 %v14030_v7  ;;  %v12635_v7 = vld [vmem:[%s19012_s3 + $0x750] sm:$0xff]  ;;  %v14048_v59 = vpack.c.bf16 %v12647_v55, %v12645_v52 }
 0x1f9   : > { %v6831_v11 = vld [vmem:[%s19012_s3 + $0x290] sm:$0xff] }
 0x1fa   : > { %13829 = vmatpush1.bf16.msra.mxu1 %v13828_v4  ;;  %v13864_v4 = vpack.c.bf16 %v6811_v46, %v6809_v16  ;;  %v12649_v16 = vld [vmem:[%s19012_s3 + $0x7c0] sm:$0xff]  ;;  %v12651_v46 = vld [vmem:[%s19012_s3 + $0x7d0] sm:$0xff] }
 0x1fb   : > { %13831 = vmatprep.subr.bf16.mxu1 %v13830_v62  ;;  %14033 = vmatpush1.bf16.msra.mxu0 %v14032_v29  ;;  %v13866_v62 = vpack.c.bf16 %v6816_v27, %v6814_v23  ;;  %v6834_v23 = vld [vmem:[%s19012_s3 + $0x2a8] sm:$0xff]  ;;  %v6836_v27 = vld [vmem:[%s19012_s3 + $0x2b8] sm:$0xff]  ;;  %v14052_v12 = vpack.c.bf16 %v12651_v46, %v12649_v16 }
 0x1fc   : > { %14035 = vmatprep.subr.bf16.mxu0 %v14034_v45 }
 0x1fe   : > { %13833 = vmatpush1.bf16.msra.mxu1 %v13832_v31  ;;  %v12633_v31 = vld [vmem:[%s19012_s3 + $0x740] sm:$0xff] }
 0x1ff   : > { %13835 = vmatprep.subr.bf16.mxu1 %v13834_v36  ;;  %v6820_v36 = vld [vmem:[%s19012_s3 + $0x238] sm:$0xff]  ;;  %v14036_v30 = vpack.c.bf16 %v12635_v7, %v12633_v31  ;;  %v12653_v7 = vld [vmem:[%s19012_s3 + $0x7e0] sm:$0xff] }
 0x200   : > { %v13870_v45 = vpack.c.bf16 %v6820_v36, %v6818_v28  ;;  %v12655_v28 = vld [vmem:[%s19012_s3 + $0x7f0] sm:$0xff]  ;;  %v6840_v36 = vld [vmem:[%s19012_s3 + $0x2d8] sm:$0xff] }
 0x201   : > { %v14056_v33 = vpack.c.bf16 %v12655_v28, %v12653_v7 }
 0x202   : > { %13837 = vmatpush1.bf16.msra.mxu1 %v13836_v37 }
 0x203   : > { %13839 = vmatprep.subr.bf16.mxu1 %v13838_v40  ;;  %v14038_v40 = vpack.c.bf16 %v12640_v13, %v12638_v42  ;;  %v12658_v42 = vld [vmem:[%s19012_s3 + $0x808] sm:$0xff]  ;;  %v12660_v13 = vld [vmem:[%s19012_s3 + $0x818] sm:$0xff] }
 0x204   : > { %v14058_v47 = vpack.c.bf16 %v12660_v13, %v12658_v42  ;;  %v6858_v42 = vld [vmem:[%s19012_s3 + $0x368] sm:$0xff]  ;;  %v6860_v13 = vld [vmem:[%s19012_s3 + $0x378] sm:$0xff] }
 0x206   : > { %13841 = vmatpush1.bf16.msra.mxu1 %v13840_v43  ;;  %v12642_v43 = vld [vmem:[%s19012_s3 + $0x788] sm:$0xff] }
 0x207   : > { %13843 = vmatprep.subr.bf16.mxu1 %v13842_v5  ;;  %v12644_v5 = vld [vmem:[%s19012_s3 + $0x798] sm:$0xff] }
 0x20a   : > { %13845 = vmatpush1.bf16.msra.mxu1 %v13844_v56  ;;  %v13874_v56 = vpack.c.bf16 %v6824_v48, %v6822_v10  ;;  %v12657_v10 = vld [vmem:[%s19012_s3 + $0x800] sm:$0xff]  ;;  %v12659_v48 = vld [vmem:[%s19012_s3 + $0x810] sm:$0xff] }
 0x20b   : > { %13847 = vmatprep.subr.bf16.mxu1 %v13846_v41  ;;  %v14042_v41 = vpack.c.bf16 %v12644_v5, %v12642_v43  ;;  %v6842_v43 = vld [vmem:[%s19012_s3 + $0x2e8] sm:$0xff]  ;;  %v6844_v5 = vld [vmem:[%s19012_s3 + $0x2f8] sm:$0xff]  ;;  %v14060_v38 = vpack.c.bf16 %v12659_v48, %v12657_v10  ;;  %v13910_v10 = vpack.c.bf16 %v6860_v13, %v6858_v42 }
 0x20c   : > { %v13894_v15 = vpack.c.bf16 %v6844_v5, %v6842_v43  ;;  %v12677_v43 = vld [vmem:[%s19012_s3 + $0x8a0] sm:$0xff]  ;;  %v12679_v5 = vld [vmem:[%s19012_s3 + $0x8b0] sm:$0xff] }
 0x20e   : > { %13849 = vmatpush1.bf16.msra.mxu1 %v13848_v49  ;;  %v12646_v49 = vld [vmem:[%s19012_s3 + $0x7a8] sm:$0xff] }
 0x20f   : > { %13851 = vmatprep.subr.bf16.mxu1 %v13850_v44  ;;  %v12648_v44 = vld [vmem:[%s19012_s3 + $0x7b8] sm:$0xff] }
 0x212   : > { %13853 = vmatpush1.bf16.msra.mxu1 %v13852_v21  ;;  %v13878_v21 = vpack.c.bf16 %v6828_v3, %v6826_v57  ;;  %v12661_v57 = vld [vmem:[%s19012_s3 + $0x820] sm:$0xff]  ;;  %v12663_v3 = vld [vmem:[%s19012_s3 + $0x830] sm:$0xff] }
 0x213   : > { %13855 = vmatprep.subr.bf16.mxu1 %v13854_v26  ;;  %v14046_v26 = vpack.c.bf16 %v12648_v44, %v12646_v49  ;;  %v6846_v49 = vld [vmem:[%s19012_s3 + $0x308] sm:$0xff]  ;;  %v6848_v44 = vld [vmem:[%s19012_s3 + $0x318] sm:$0xff]  ;;  %v14064_v39 = vpack.c.bf16 %v12663_v3, %v12661_v57 }
 0x214   : > { %v13898_v52 = vpack.c.bf16 %v6848_v44, %v6846_v49  ;;  %v12681_v49 = vld [vmem:[%s19012_s3 + $0x8c0] sm:$0xff]  ;;  %v12683_v44 = vld [vmem:[%s19012_s3 + $0x8d0] sm:$0xff] }
 0x216   : > { %13857 = vmatpush1.bf16.msra.mxu1 %v13856_v19  ;;  %v12650_v19 = vld [vmem:[%s19012_s3 + $0x7c8] sm:$0xff] }
 0x217   : > { %13859 = vmatprep.subr.bf16.mxu1 %v13858_v1  ;;  %v12652_v1 = vld [vmem:[%s19012_s3 + $0x7d8] sm:$0xff] }
 0x21a   : > { %13861 = vmatpush1.bf16.msra.mxu1 %v13860_v61  ;;  %v13882_v61 = vpack.c.bf16 %v6832_v58, %v6830_v53  ;;  %v12665_v53 = vld [vmem:[%s19012_s3 + $0x840] sm:$0xff]  ;;  %v12667_v58 = vld [vmem:[%s19012_s3 + $0x850] sm:$0xff] }
 0x21b   : > { %13863 = vmatprep.subr.bf16.mxu1 %v13862_v9  ;;  %v14050_v9 = vpack.c.bf16 %v12652_v1, %v12650_v19  ;;  %v6850_v19 = vld [vmem:[%s19012_s3 + $0x328] sm:$0xff]  ;;  %v6852_v1 = vld [vmem:[%s19012_s3 + $0x338] sm:$0xff] }
 0x21c   : > { %v13902_v16 = vpack.c.bf16 %v6852_v1, %v6850_v19  ;;  %v12685_v19 = vld [vmem:[%s19012_s3 + $0x8e0] sm:$0xff]  ;;  %v12687_v1 = vld [vmem:[%s19012_s3 + $0x8f0] sm:$0xff] }
 0x21e   : > { %13865 = vmatpush1.bf16.msra.mxu1 %v13864_v4  ;;  %v12654_v4 = vld [vmem:[%s19012_s3 + $0x7e8] sm:$0xff] }
 0x21f   : > { %13867 = vmatprep.subr.bf16.mxu1 %v13866_v62  ;;  %v12656_v62 = vld [vmem:[%s19012_s3 + $0x7f8] sm:$0xff] }
 0x220   : > { %v14054_v31 = vpack.c.bf16 %v12656_v62, %v12654_v4  ;;  %v6854_v4 = vld [vmem:[%s19012_s3 + $0x348] sm:$0xff]  ;;  %v6856_v62 = vld [vmem:[%s19012_s3 + $0x358] sm:$0xff] }
 0x221   : > { %v13906_v7 = vpack.c.bf16 %v6856_v62, %v6854_v4  ;;  %v12689_v4 = vld [vmem:[%s19012_s3 + $0x900] sm:$0xff]  ;;  %v12691_v62 = vld [vmem:[%s19012_s3 + $0x910] sm:$0xff] }
 0x278   : > { %v6578_v20 = vpop.f32.mrb[0].mxu0 }
 0x279   : > { %v6737_v22 = vadd.f32 %v16708_v17, %v6578_v20  ;;  %v6580_v25 = vpop.f32.mrb[1].mxu0  ;;  %v13884_v20 = vpack.c.bf16 %v6831_v11, %v6829_v8  ;;  %v14068_v11 = vpack.c.bf16 %v12667_v58, %v12665_v53 }
 0x27a   : > { %v6738_v14 = vadd.f32 %v16708_v17, %v6580_v25  ;;  %v13886_v25 = vpack.c.bf16 %v6836_v27, %v6834_v23  ;;  %v12669_v23 = vld [vmem:[%s19012_s3 + $0x860] sm:$0xff]  ;;  %v12671_v27 = vld [vmem:[%s19012_s3 + $0x870] sm:$0xff] }
 0x27b   : > { %v16744_v37 = vmax.f32 %v6737_v22, 0.0  ;;  %v6835_v22 = vld [vmem:[%s19012_s3 + $0x2b0] sm:$0xff] }
 0x27c   : > { %v16736_v29 = vmax.f32 %v6738_v14, 0.0  ;;  %v6838_v14 = vld [vmem:[%s19012_s3 + $0x2c8] sm:$0xff] }
 0x27d   : > { %v13890_v6 = vpack.c.bf16 %v6840_v36, %v6838_v14  ;;  %v12673_v14 = vld [vmem:[%s19012_s3 + $0x880] sm:$0xff]  ;;  %v12675_v36 = vld [vmem:[%s19012_s3 + $0x890] sm:$0xff] }
 0x27e   : > { %6985 = vmatprep.mubr.f32.mxu1 %v16736_v29  ;;  %7367 = vmatprep.mubr.f32.mxu0 %v16736_v29 }
 0x27f   : > { %6986 = vmatmul.mubr.f32.vlgmr.msra.gmra.mrb[2].mxu1 %v16744_v37  ;;  %7368 = vmatmul.mubr.f32.vlgmr.msra.gmra.mrb[4].mxu0 %v16744_v37 }
 0x280   : > { %13869 = vmatpush1.bf16.msra.mxu1 %v13868_v32  ;;  %14037 = vmatpush1.bf16.msra.mxu0 %v14036_v30  ;;  %v13888_v30 = vpack.c.bf16 %v6835_v22, %v6833_v2  ;;  %v14072_v22 = vpack.c.bf16 %v12671_v27, %v12669_v23 }
 0x281   : > { %13871 = vmatprep.subr.bf16.mxu1 %v13870_v45  ;;  %14039 = vmatprep.subr.bf16.mxu0 %v14038_v40  ;;  %v6839_v45 = vld [vmem:[%s19012_s3 + $0x2d0] sm:$0xff] }
 0x282   : > { %v13892_v60 = vpack.c.bf16 %v6839_v45, %v6837_v24  ;;  %v14076_v45 = vpack.c.bf16 %v12675_v36, %v12673_v14  ;;  %v6875_v14 = vld [vmem:[%s19012_s3 + $0x3f0] sm:$0xff] }
 0x284   : > { %13873 = vmatpush1.bf16.msra.mxu1 %v13872_v35  ;;  %14041 = vmatpush1.bf16.msra.mxu0 %v14040_v50  ;;  %v12662_v35 = vld [vmem:[%s19012_s3 + $0x828] sm:$0xff]  ;;  %v12664_v50 = vld [vmem:[%s19012_s3 + $0x838] sm:$0xff] }
 0x285   : > { %13875 = vmatprep.subr.bf16.mxu1 %v13874_v56  ;;  %14043 = vmatprep.subr.bf16.mxu0 %v14042_v41  ;;  %v6841_v56 = vld [vmem:[%s19012_s3 + $0x2e0] sm:$0xff]  ;;  %v6843_v41 = vld [vmem:[%s19012_s3 + $0x2f0] sm:$0xff]  ;;  %v14062_v63 = vpack.c.bf16 %v12664_v50, %v12662_v35  ;;  %v6862_v35 = vld [vmem:[%s19012_s3 + $0x388] sm:$0xff] }
 0x286   : > { %v13896_v34 = vpack.c.bf16 %v6843_v41, %v6841_v56  ;;  %v6864_v50 = vld [vmem:[%s19012_s3 + $0x398] sm:$0xff]  ;;  %v14080_v41 = vpack.c.bf16 %v12679_v5, %v12677_v43 }
 0x287   : > { %v13914_v57 = vpack.c.bf16 %v6864_v50, %v6862_v35 }
 0x288   : > { %13877 = vmatpush1.bf16.msra.mxu1 %v13876_v18  ;;  %14045 = vmatpush1.bf16.msra.mxu0 %v14044_v54  ;;  %v12666_v18 = vld [vmem:[%s19012_s3 + $0x848] sm:$0xff]  ;;  %v12668_v54 = vld [vmem:[%s19012_s3 + $0x858] sm:$0xff] }
 0x289   : > { %13879 = vmatprep.subr.bf16.mxu1 %v13878_v21  ;;  %14047 = vmatprep.subr.bf16.mxu0 %v14046_v26  ;;  %v6845_v21 = vld [vmem:[%s19012_s3 + $0x300] sm:$0xff]  ;;  %v6847_v26 = vld [vmem:[%s19012_s3 + $0x310] sm:$0xff]  ;;  %v14066_v55 = vpack.c.bf16 %v12668_v54, %v12666_v18  ;;  %v6866_v18 = vld [vmem:[%s19012_s3 + $0x3a8] sm:$0xff] }
 0x28a   : > { %v13900_v8 = vpack.c.bf16 %v6847_v26, %v6845_v21  ;;  %v6868_v54 = vld [vmem:[%s19012_s3 + $0x3b8] sm:$0xff]  ;;  %v14084_v26 = vpack.c.bf16 %v12683_v44, %v12681_v49 }
 0x28b   : > { %v13918_v53 = vpack.c.bf16 %v6868_v54, %v6866_v18  ;;  %v12704_v49 = vld [vmem:[%s19012_s3 + $0x978] sm:$0xff] }
 0x28c   : > { %13881 = vmatpush1.bf16.msra.mxu1 %v13880_v51  ;;  %14049 = vmatpush1.bf16.msra.mxu0 %v14048_v59  ;;  %v12670_v51 = vld [vmem:[%s19012_s3 + $0x868] sm:$0xff]  ;;  %v12672_v59 = vld [vmem:[%s19012_s3 + $0x878] sm:$0xff] }
 0x28d   : > { %13883 = vmatprep.subr.bf16.mxu1 %v13882_v61  ;;  %14051 = vmatprep.subr.bf16.mxu0 %v14050_v9  ;;  %v6849_v61 = vld [vmem:[%s19012_s3 + $0x320] sm:$0xff]  ;;  %v6851_v9 = vld [vmem:[%s19012_s3 + $0x330] sm:$0xff]  ;;  %v14070_v46 = vpack.c.bf16 %v12672_v59, %v12670_v51  ;;  %v6870_v51 = vld [vmem:[%s19012_s3 + $0x3c8] sm:$0xff] }
 0x28e   : > { %v13904_v2 = vpack.c.bf16 %v6851_v9, %v6849_v61  ;;  %v6872_v59 = vld [vmem:[%s19012_s3 + $0x3d8] sm:$0xff]  ;;  %v14088_v9 = vpack.c.bf16 %v12687_v1, %v12685_v19  ;;  %v12706_v1 = vld [vmem:[%s19012_s3 + $0x988] sm:$0xff] }
 0x28f   : > { %v13922_v23 = vpack.c.bf16 %v6872_v59, %v6870_v51  ;;  %v6888_v19 = vld [vmem:[%s19012_s3 + $0x458] sm:$0xff] }
 0x290   : > { %13885 = vmatpush1.bf16.msra.mxu1 %v13884_v20  ;;  %14053 = vmatpush1.bf16.msra.mxu0 %v14052_v12  ;;  %v16864_v32 = vpop.f32.mrb[2].mxu0  ;;  %v12674_v20 = vld [vmem:[%s19012_s3 + $0x888] sm:$0xff]  ;;  %v12676_v12 = vld [vmem:[%s19012_s3 + $0x898] sm:$0xff] }
 0x291   : > { %v16872_v40 = vpop.f32.mrb[3].mxu0  ;;  %13887 = vmatprep.subr.bf16.mxu1 %v13886_v25  ;;  %14055 = vmatprep.subr.bf16.mxu0 %v14054_v31  ;;  %v6853_v25 = vld [vmem:[%s19012_s3 + $0x340] sm:$0xff]  ;;  %v6855_v31 = vld [vmem:[%s19012_s3 + $0x350] sm:$0xff]  ;;  %v14074_v28 = vpack.c.bf16 %v12676_v12, %v12674_v20  ;;  %v6874_v20 = vld [vmem:[%s19012_s3 + $0x3e8] sm:$0xff] }
 0x292   : > { %v13908_v24 = vpack.c.bf16 %v6855_v31, %v6853_v25  ;;  %v6876_v12 = vld [vmem:[%s19012_s3 + $0x3f8] sm:$0xff] }
 0x293   : > { %v13926_v42 = vpack.c.bf16 %v6876_v12, %v6874_v20  ;;  %v12708_v51 = vld [vmem:[%s19012_s3 + $0x998] sm:$0xff] }
 0x294   : > { %13889 = vmatpush1.bf16.msra.mxu1 %v13888_v30  ;;  %14057 = vmatpush1.bf16.msra.mxu0 %v14056_v33  ;;  %v12678_v30 = vld [vmem:[%s19012_s3 + $0x8a8] sm:$0xff]  ;;  %v12680_v33 = vld [vmem:[%s19012_s3 + $0x8b8] sm:$0xff] }
 0x295   : > { %13891 = vmatprep.subr.bf16.mxu1 %v13890_v6  ;;  %14059 = vmatprep.subr.bf16.mxu0 %v14058_v47  ;;  %v6857_v6 = vld [vmem:[%s19012_s3 + $0x360] sm:$0xff]  ;;  %v6859_v47 = vld [vmem:[%s19012_s3 + $0x370] sm:$0xff]  ;;  %v14078_v48 = vpack.c.bf16 %v12680_v33, %v12678_v30  ;;  %v12712_v20 = vld [vmem:[%s19012_s3 + $0x9b8] sm:$0xff] }
 0x296   : > { %v13912_v56 = vpack.c.bf16 %v6859_v47, %v6857_v6  ;;  %v12693_v30 = vld [vmem:[%s19012_s3 + $0x920] sm:$0xff]  ;;  %v12695_v33 = vld [vmem:[%s19012_s3 + $0x930] sm:$0xff]  ;;  %v6880_v6 = vld [vmem:[%s19012_s3 + $0x418] sm:$0xff] }
 0x297   : > { %v12698_v47 = vld [vmem:[%s19012_s3 + $0x948] sm:$0xff]  ;;  %v14096_v5 = vpack.c.bf16 %v12695_v33, %v12693_v30  ;;  %v12716_v30 = vld [vmem:[%s19012_s3 + $0x9d8] sm:$0xff] }
 0x298   : > { %13893 = vmatpush1.bf16.msra.mxu1 %v13892_v60  ;;  %14061 = vmatpush1.bf16.msra.mxu0 %v14060_v38  ;;  %v12682_v60 = vld [vmem:[%s19012_s3 + $0x8c8] sm:$0xff]  ;;  %v12684_v38 = vld [vmem:[%s19012_s3 + $0x8d8] sm:$0xff] }
 0x299   : > { %13895 = vmatprep.subr.bf16.mxu1 %v13894_v15  ;;  %14063 = vmatprep.subr.bf16.mxu0 %v14062_v63  ;;  %v6861_v15 = vld [vmem:[%s19012_s3 + $0x380] sm:$0xff]  ;;  %v6863_v63 = vld [vmem:[%s19012_s3 + $0x390] sm:$0xff]  ;;  %v14082_v3 = vpack.c.bf16 %v12684_v38, %v12682_v60 }
 0x29a   : > { %v13916_v21 = vpack.c.bf16 %v6863_v63, %v6861_v15  ;;  %v6877_v38 = vld [vmem:[%s19012_s3 + $0x400] sm:$0xff]  ;;  %v12699_v63 = vld [vmem:[%s19012_s3 + $0x950] sm:$0xff] }
 0x29b   : > { %v12697_v15 = vld [vmem:[%s19012_s3 + $0x940] sm:$0xff] }
 0x29c   : > { %13897 = vmatpush1.bf16.msra.mxu1 %v13896_v34  ;;  %14065 = vmatpush1.bf16.msra.mxu0 %v14064_v39  ;;  %v12686_v34 = vld [vmem:[%s19012_s3 + $0x8e8] sm:$0xff]  ;;  %v12688_v39 = vld [vmem:[%s19012_s3 + $0x8f8] sm:$0xff]  ;;  %v14100_v54 = vpack.c.bf16 %v12699_v63, %v12697_v15  ;;  %v6897_v63 = vld [vmem:[%s19012_s3 + $0x4a0] sm:$0xff] }
 0x29d   : > { %13899 = vmatprep.subr.bf16.mxu1 %v13898_v52  ;;  %14067 = vmatprep.subr.bf16.mxu0 %v14066_v55  ;;  %v6865_v52 = vld [vmem:[%s19012_s3 + $0x3a0] sm:$0xff]  ;;  %v6867_v55 = vld [vmem:[%s19012_s3 + $0x3b0] sm:$0xff]  ;;  %v14086_v58 = vpack.c.bf16 %v12688_v39, %v12686_v34 }
 0x29e   : > { %v13920_v61 = vpack.c.bf16 %v6867_v55, %v6865_v52  ;;  %v6881_v34 = vld [vmem:[%s19012_s3 + $0x420] sm:$0xff]  ;;  %v6883_v39 = vld [vmem:[%s19012_s3 + $0x430] sm:$0xff] }
 0x29f   : > { %v13936_v59 = vpack.c.bf16 %v6883_v39, %v6881_v34  ;;  %v12722_v34 = vld [vmem:[%s19012_s3 + $0xa08] sm:$0xff]  ;;  %v12724_v39 = vld [vmem:[%s19012_s3 + $0xa18] sm:$0xff] }
 0x2a0   : > { %13901 = vmatpush1.bf16.msra.mxu1 %v13900_v8  ;;  %14069 = vmatpush1.bf16.msra.mxu0 %v14068_v11  ;;  %v12690_v8 = vld [vmem:[%s19012_s3 + $0x908] sm:$0xff]  ;;  %v12692_v11 = vld [vmem:[%s19012_s3 + $0x918] sm:$0xff] }
 0x2a1   : > { %13903 = vmatprep.subr.bf16.mxu1 %v13902_v16  ;;  %14071 = vmatprep.subr.bf16.mxu0 %v14070_v46  ;;  %v6869_v16 = vld [vmem:[%s19012_s3 + $0x3c0] sm:$0xff]  ;;  %v6871_v46 = vld [vmem:[%s19012_s3 + $0x3d0] sm:$0xff]  ;;  %v14090_v27 = vpack.c.bf16 %v12692_v11, %v12690_v8 }
 0x2a2   : > { %v13924_v31 = vpack.c.bf16 %v6871_v46, %v6869_v16  ;;  %v12705_v16 = vld [vmem:[%s19012_s3 + $0x980] sm:$0xff]  ;;  %v14106_v46 = vpack.c.bf16 %v12708_v51, %v12706_v1  ;;  %v14122_v1 = vpack.c.bf16 %v12724_v39, %v12722_v34  ;;  %v12723_v51 = vld [vmem:[%s19012_s3 + $0xa10] sm:$0xff] }
 0x2a3   : > { %v12907_v39 = vld [vmem:[%s19012_s3 + $0xfc0] sm:$0xff] }
 0x2a4   : > { %13905 = vmatpush1.bf16.msra.mxu1 %v13904_v2  ;;  %14073 = vmatpush1.bf16.msra.mxu0 %v14072_v22  ;;  %v12694_v2 = vld [vmem:[%s19012_s3 + $0x928] sm:$0xff]  ;;  %v12696_v22 = vld [vmem:[%s19012_s3 + $0x938] sm:$0xff] }
 0x2a5   : > { %13907 = vmatprep.subr.bf16.mxu1 %v13906_v7  ;;  %14075 = vmatprep.subr.bf16.mxu0 %v14074_v28  ;;  %v14092_v7 = vpack.c.bf16 %v12691_v62, %v12689_v4  ;;  %v6873_v28 = vld [vmem:[%s19012_s3 + $0x3e0] sm:$0xff]  ;;  %v14094_v13 = vpack.c.bf16 %v12696_v22, %v12694_v2  ;;  %v6892_v4 = vld [vmem:[%s19012_s3 + $0x478] sm:$0xff]  ;;  %v12710_v62 = vld [vmem:[%s19012_s3 + $0x9a8] sm:$0xff] }
 0x2a6   : > { %v13928_v43 = vpack.c.bf16 %v6875_v14, %v6873_v28  ;;  %v14110_v28 = vpack.c.bf16 %v12712_v20, %v12710_v62  ;;  %v12711_v14 = vld [vmem:[%s19012_s3 + $0x9b0] sm:$0xff] }
 0x2a7   : > { %v12727_v20 = vld [vmem:[%s19012_s3 + $0xa30] sm:$0xff] }
 0x2a8   : > { %13909 = vmatpush1.bf16.msra.mxu1 %v13908_v24  ;;  %14077 = vmatpush1.bf16.msra.mxu0 %v14076_v45  ;;  %v6878_v24 = vld [vmem:[%s19012_s3 + $0x408] sm:$0xff] }
 0x2a9   : > { %13911 = vmatprep.subr.bf16.mxu1 %v13910_v10  ;;  %14079 = vmatprep.subr.bf16.mxu0 %v14078_v48  ;;  %v12700_v10 = vld [vmem:[%s19012_s3 + $0x958] sm:$0xff]  ;;  %v13930_v50 = vpack.c.bf16 %v6880_v6, %v6878_v24  ;;  %v6893_v6 = vld [vmem:[%s19012_s3 + $0x480] sm:$0xff] }
 0x2aa   : > { %v14098_v60 = vpack.c.bf16 %v12700_v10, %v12698_v47  ;;  %v6895_v47 = vld [vmem:[%s19012_s3 + $0x490] sm:$0xff]  ;;  %v12713_v10 = vld [vmem:[%s19012_s3 + $0x9c0] sm:$0xff] }
 0x2ac   : > { %13913 = vmatpush1.bf16.msra.mxu1 %v13912_v56  ;;  %14081 = vmatpush1.bf16.msra.mxu0 %v14080_v41  ;;  %v6879_v56 = vld [vmem:[%s19012_s3 + $0x410] sm:$0xff]  ;;  %v6742_v41 = vadd.f32 %v16708_v17, %v16872_v40  ;;  %v6884_v40 = vld [vmem:[%s19012_s3 + $0x438] sm:$0xff] }
 0x2ad   : > { %13915 = vmatprep.subr.bf16.mxu1 %v13914_v57  ;;  %14083 = vmatprep.subr.bf16.mxu0 %v14082_v3  ;;  %v6882_v57 = vld [vmem:[%s19012_s3 + $0x428] sm:$0xff]  ;;  %v13932_v44 = vpack.c.bf16 %v6879_v56, %v6877_v38  ;;  %v12720_v38 = vld [vmem:[%s19012_s3 + $0x9f8] sm:$0xff]  ;;  %v13948_v56 = vpack.c.bf16 %v6895_v47, %v6893_v6 }
 0x2ae   : > { %v12702_v3 = vld [vmem:[%s19012_s3 + $0x968] sm:$0xff]  ;;  %v13934_v52 = vpack.c.bf16 %v6884_v40, %v6882_v57  ;;  %v6899_v57 = vld [vmem:[%s19012_s3 + $0x4b0] sm:$0xff]  ;;  %v12717_v40 = vld [vmem:[%s19012_s3 + $0x9e0] sm:$0xff] }
 0x2af   : > { %v14102_v55 = vpack.c.bf16 %v12704_v49, %v12702_v3  ;;  %v12719_v49 = vld [vmem:[%s19012_s3 + $0x9f0] sm:$0xff]  ;;  %v12736_v6 = vld [vmem:[%s19012_s3 + $0xa78] sm:$0xff] }
 0x2b0   : > { %13917 = vmatpush1.bf16.msra.mxu1 %v13916_v21  ;;  %14085 = vmatpush1.bf16.msra.mxu0 %v14084_v26  ;;  %v12701_v21 = vld [vmem:[%s19012_s3 + $0x960] sm:$0xff]  ;;  %v17151_v26 = vmax.f32 %v6742_v41, 0.0 }
 0x2b1   : > { %13919 = vmatprep.subr.bf16.mxu1 %v13918_v53  ;;  %14087 = vmatprep.subr.bf16.mxu0 %v14086_v58  ;;  %v12703_v53 = vld [vmem:[%s19012_s3 + $0x970] sm:$0xff]  ;;  %v6886_v58 = vld [vmem:[%s19012_s3 + $0x448] sm:$0xff] }
 0x2b2   : > { %v14104_v8 = vpack.c.bf16 %v12703_v53, %v12701_v21  ;;  %v13938_v11 = vpack.c.bf16 %v6888_v19, %v6886_v58  ;;  %v13952_v21 = vpack.c.bf16 %v6899_v57, %v6897_v63  ;;  %v6901_v53 = vld [vmem:[%s19012_s3 + $0x4c0] sm:$0xff]  ;;  %v6903_v58 = vld [vmem:[%s19012_s3 + $0x4d0] sm:$0xff]  ;;  %v12910_v63 = vld [vmem:[%s19012_s3 + $0xfd8] sm:$0xff] }
 0x2b3   : > { %v12721_v19 = vld [vmem:[%s19012_s3 + $0xa00] sm:$0xff] }
 0x2b4   : > { %13921 = vmatpush1.bf16.msra.mxu1 %v13920_v61  ;;  %14089 = vmatpush1.bf16.msra.mxu0 %v14088_v9  ;;  %v6649_v25 = vpop.f32.mrb[0].mxu1  ;;  %v6885_v61 = vld [vmem:[%s19012_s3 + $0x440] sm:$0xff]  ;;  %v6887_v9 = vld [vmem:[%s19012_s3 + $0x450] sm:$0xff] }
 0x2b5   : > { %v6651_v36 = vpop.f32.mrb[1].mxu1  ;;  %13923 = vmatprep.subr.bf16.mxu1 %v13922_v23  ;;  %14091 = vmatprep.subr.bf16.mxu0 %v14090_v27  ;;  %v6739_v35 = vadd.f32 %v16708_v17, %v6649_v25  ;;  %v12707_v23 = vld [vmem:[%s19012_s3 + $0x990] sm:$0xff]  ;;  %v6890_v27 = vld [vmem:[%s19012_s3 + $0x468] sm:$0xff]  ;;  %v13940_v12 = vpack.c.bf16 %v6887_v9, %v6885_v61  ;;  %v6889_v25 = vld [vmem:[%s19012_s3 + $0x460] sm:$0xff]  ;;  %v13956_v9 = vpack.c.bf16 %v6903_v58, %v6901_v53 }
 0x2b6   : > { %v6740_v45 = vadd.f32 %v16708_v17, %v6651_v36  ;;  %v14108_v2 = vpack.c.bf16 %v12707_v23, %v12705_v16  ;;  %v13942_v22 = vpack.c.bf16 %v6892_v4, %v6890_v27  ;;  %v6894_v36 = vld [vmem:[%s19012_s3 + $0x488] sm:$0xff]  ;;  %v12728_v61 = vld [vmem:[%s19012_s3 + $0xa38] sm:$0xff]  ;;  %v14124_v16 = vpack.c.bf16 %v12723_v51, %v12721_v19  ;;  %v6905_v23 = vld [vmem:[%s19012_s3 + $0x4e0] sm:$0xff] }
 0x2b7   : > { %v17140_v18 = vmax.f32 %v6739_v35, 0.0  ;;  %v6898_v35 = vld [vmem:[%s19012_s3 + $0x4a8] sm:$0xff]  ;;  %v6907_v27 = vld [vmem:[%s19012_s3 + $0x4f0] sm:$0xff]  ;;  %v12725_v4 = vld [vmem:[%s19012_s3 + $0xa20] sm:$0xff] }
 0x2b8   : > { %v17109_v48 = vmax.f32 %v6740_v45, 0.0  ;;  %13925 = vmatpush1.bf16.msra.mxu1 %v13924_v31  ;;  %14093 = vmatpush1.bf16.msra.mxu0 %v14092_v7  ;;  %v6891_v31 = vld [vmem:[%s19012_s3 + $0x470] sm:$0xff]  ;;  %v12709_v7 = vld [vmem:[%s19012_s3 + $0x9a0] sm:$0xff]  ;;  %v12914_v53 = vld [vmem:[%s19012_s3 + $0xff8] sm:$0xff] }
 0x2b9   : > { %13927 = vmatprep.subr.bf16.mxu1 %v13926_v42  ;;  %14095 = vmatprep.subr.bf16.mxu0 %v14094_v13  ;;  %v6896_v42 = vld [vmem:[%s19012_s3 + $0x498] sm:$0xff]  ;;  %v12714_v13 = vld [vmem:[%s19012_s3 + $0x9c8] sm:$0xff]  ;;  %v13944_v33 = vpack.c.bf16 %v6891_v31, %v6889_v25  ;;  %v14112_v24 = vpack.c.bf16 %v12711_v14, %v12709_v7  ;;  %v13960_v31 = vpack.c.bf16 %v6907_v27, %v6905_v23  ;;  %v6909_v14 = vld [vmem:[%s19012_s3 + $0x500] sm:$0xff] }
 0x2ba   : > { %7056 = vmatprep.mubr.f32.mxu1 %v17109_v48  ;;  %7438 = vmatprep.mubr.f32.mxu0 %v17109_v48  ;;  %v13946_v45 = vpack.c.bf16 %v6896_v42, %v6894_v36  ;;  %v12732_v25 = vld [vmem:[%s19012_s3 + $0xa58] sm:$0xff]  ;;  %v14128_v7 = vpack.c.bf16 %v12727_v20, %v12725_v4  ;;  %v6911_v36 = vld [vmem:[%s19012_s3 + $0x510] sm:$0xff]  ;;  %v12729_v42 = vld [vmem:[%s19012_s3 + $0xa40] sm:$0xff] }
 0x2bb   : > { %v13964_v47 = vpack.c.bf16 %v6911_v36, %v6909_v14  ;;  %v12744_v51 = vld [vmem:[%s19012_s3 + $0xab0] sm:$0xff]  ;;  %v12918_v23 = vld [vmem:[%s19012_s3 + $0x1018] sm:$0xff]  ;;  %v12746_v20 = vld [vmem:[%s19012_s3 + $0xac0] sm:$0xff] }
 0x2bc   : > { %13929 = vmatpush1.bf16.msra.mxu1 %v13928_v43  ;;  %14097 = vmatpush1.bf16.msra.mxu0 %v14096_v5  ;;  %v14114_v43 = vpack.c.bf16 %v12716_v30, %v12714_v13  ;;  %v12715_v5 = vld [vmem:[%s19012_s3 + $0x9d0] sm:$0xff] }
 0x2bd   : > { %13931 = vmatprep.subr.bf16.mxu1 %v13930_v50  ;;  %14099 = vmatprep.subr.bf16.mxu0 %v14098_v60  ;;  %v6900_v50 = vld [vmem:[%s19012_s3 + $0x4b8] sm:$0xff]  ;;  %v12718_v60 = vld [vmem:[%s19012_s3 + $0x9e8] sm:$0xff]  ;;  %v14116_v41 = vpack.c.bf16 %v12715_v5, %v12713_v10  ;;  %v12731_v30 = vld [vmem:[%s19012_s3 + $0xa50] sm:$0xff] }
 0x2be   : > { %v13950_v15 = vpack.c.bf16 %v6900_v50, %v6898_v35  ;;  %v14118_v3 = vpack.c.bf16 %v12720_v38, %v12718_v60  ;;  %v14132_v10 = vpack.c.bf16 %v12731_v30, %v12729_v42  ;;  %v6913_v5 = vld [vmem:[%s19012_s3 + $0x520] sm:$0xff]  ;;  %v6915_v35 = vld [vmem:[%s19012_s3 + $0x530] sm:$0xff] }
 0x2bf   : > { %7057 = vmatmul.mubr.f32.vlgmr.msra.gmra.mrb[2].mxu1 %v17140_v18  ;;  %7439 = vmatmul.mubr.f32.vlgmr.msra.gmra.mrb[4].mxu0 %v17140_v18  ;;  %v12733_v50 = vld [vmem:[%s19012_s3 + $0xa60] sm:$0xff]  ;;  %v12735_v38 = vld [vmem:[%s19012_s3 + $0xa70] sm:$0xff]  ;;  %v13968_v57 = vpack.c.bf16 %v6915_v35, %v6913_v5 }
 0x2c0   : > { %13933 = vmatpush1.bf16.msra.mxu1 %v13932_v44  ;;  %12568 = vmatprep.mubr.msk.f32.mxu1 %vm6917_vm1, %v17151_v26  ;;  %v6902_v44 = vld [vmem:[%s19012_s3 + $0x4c8] sm:$0xff]  ;;  %v12752_v30 = vld [vmem:[%s19012_s3 + $0xaf0] sm:$0xff] }
 0x2c1   : > { %14101 = vmatpush1.bf16.msra.mxu0 %v14100_v54  ;;  %12737 = vmatprep.mubr.msk.f32.mxu0 %vm6917_vm1, %v17151_v26  ;;  %v6904_v54 = vld [vmem:[%s19012_s3 + $0x4d8] sm:$0xff] }
 0x2c2   : > { %13935 = vmatprep.subr.bf16.mxu1 %v13934_v52  ;;  %14103 = vmatprep.subr.bf16.mxu0 %v14102_v55  ;;  %v14120_v52 = vpack.c.bf16 %v12719_v49, %v12717_v40  ;;  %v13954_v55 = vpack.c.bf16 %v6904_v54, %v6902_v44  ;;  %v6741_v40 = vadd.f32 %v16708_v17, %v16864_v32  ;;  %v12738_v44 = vld [vmem:[%s19012_s3 + $0xa80] sm:$0xff]  ;;  %v12740_v54 = vld [vmem:[%s19012_s3 + $0xa90] sm:$0xff]  ;;  %v12743_v32 = vld [vmem:[%s19012_s3 + $0xaa8] sm:$0xff] }
 0x2c3   : > { %v12909_v17 = vld [vmem:[%s19012_s3 + $0xfd0] sm:$0xff] }
 0x2c4   : > { %13937 = vmatpush1.bf16.msra.mxu1 %v13936_v59  ;;  %v6906_v59 = vld [vmem:[%s19012_s3 + $0x4e8] sm:$0xff]  ;;  %v17392_v58 = vmax.f32 %v6741_v40, 0.0  ;;  %v14308_v19 = vpack.c.bf16 %v12909_v17, %v12907_v39  ;;  %v12760_v39 = vld [vmem:[%s19012_s3 + $0xb30] sm:$0xff]  ;;  %v12927_v17 = vld [vmem:[%s19012_s3 + $0x1060] sm:$0xff] }
 0x2c5   : > { %14105 = vmatpush1.bf16.msra.mxu0 %v14104_v8  ;;  %13939 = vmatprep.subr.bf16.mxu1 %v13938_v11  ;;  %v6908_v8 = vld [vmem:[%s19012_s3 + $0x4f8] sm:$0xff]  ;;  %v12726_v11 = vld [vmem:[%s19012_s3 + $0xa28] sm:$0xff] }
 0x2c6   : > { %14107 = vmatprep.subr.bf16.mxu0 %v14106_v46  ;;  %v13958_v46 = vpack.c.bf16 %v6908_v8, %v6906_v59  ;;  %v14126_v62 = vpack.c.bf16 %v12728_v61, %v12726_v11  ;;  %v12911_v59 = vld [vmem:[%s19012_s3 + $0xfe0] sm:$0xff]  ;;  %v12913_v11 = vld [vmem:[%s19012_s3 + $0xff0] sm:$0xff]  ;;  %v12747_v61 = vld [vmem:[%s19012_s3 + $0xac8] sm:$0xff] }
 0x2c7   : > { %v14312_v4 = vpack.c.bf16 %v12913_v11, %v12911_v59  ;;  %v12928_v40 = vld [vmem:[%s19012_s3 + $0x1068] sm:$0xff]  ;;  %v12764_v11 = vld [vmem:[%s19012_s3 + $0xb50] sm:$0xff] }
 0x2c8   : > { %13941 = vmatpush1.bf16.msra.mxu1 %v13940_v12  ;;  %v6910_v12 = vld [vmem:[%s19012_s3 + $0x508] sm:$0xff] }
 0x2c9   : > { %14109 = vmatpush1.bf16.msra.mxu0 %v14108_v2  ;;  %13943 = vmatprep.subr.bf16.mxu1 %v13942_v22  ;;  %v6912_v2 = vld [vmem:[%s19012_s3 + $0x518] sm:$0xff]  ;;  %v12730_v22 = vld [vmem:[%s19012_s3 + $0xa48] sm:$0xff] }
 0x2ca   : > { %14111 = vmatprep.subr.bf16.mxu0 %v14110_v28  ;;  %v13962_v28 = vpack.c.bf16 %v6912_v2, %v6910_v12  ;;  %v14130_v13 = vpack.c.bf16 %v12732_v25, %v12730_v22  ;;  %v12748_v12 = vld [vmem:[%s19012_s3 + $0xad0] sm:$0xff]  ;;  %v12915_v2 = vld [vmem:[%s19012_s3 + $0x1000] sm:$0xff] }
 0x2cb   : > { %v12917_v25 = vld [vmem:[%s19012_s3 + $0x1010] sm:$0xff]  ;;  %v14148_v14 = vpack.c.bf16 %v12748_v12, %v12746_v20 }
 0x2cc   : > { %13945 = vmatpush1.bf16.msra.mxu1 %v13944_v33  ;;  %v6914_v33 = vld [vmem:[%s19012_s3 + $0x528] sm:$0xff]  ;;  %v14316_v36 = vpack.c.bf16 %v12917_v25, %v12915_v2  ;;  %v12766_v2 = vld [vmem:[%s19012_s3 + $0xb60] sm:$0xff] }
 0x2cd   : > { %14113 = vmatpush1.bf16.msra.mxu0 %v14112_v24  ;;  %13947 = vmatprep.subr.bf16.mxu1 %v13946_v45  ;;  %v6916_v24 = vld [vmem:[%s19012_s3 + $0x538] sm:$0xff]  ;;  %v12734_v45 = vld [vmem:[%s19012_s3 + $0xa68] sm:$0xff]  ;;  %v12935_v25 = vld [vmem:[%s19012_s3 + $0x10a0] sm:$0xff] }
 0x2ce   : > { %14115 = vmatprep.subr.bf16.mxu0 %v14114_v43  ;;  %v13966_v43 = vpack.c.bf16 %v6916_v24, %v6914_v33  ;;  %v14134_v60 = vpack.c.bf16 %v12736_v6, %v12734_v45  ;;  %v12919_v33 = vld [vmem:[%s19012_s3 + $0x1020] sm:$0xff]  ;;  %v12921_v45 = vld [vmem:[%s19012_s3 + $0x1030] sm:$0xff]  ;;  %v12755_v6 = vld [vmem:[%s19012_s3 + $0xb08] sm:$0xff] }
 0x2cf   : > { %v14320_v35 = vpack.c.bf16 %v12921_v45, %v12919_v33  ;;  %v12770_v33 = vld [vmem:[%s19012_s3 + $0xb80] sm:$0xff] }
 0x2d0   : > { %13949 = vmatpush1.bf16.msra.mxu1 %v13948_v56  ;;  %v12739_v56 = vld [vmem:[%s19012_s3 + $0xa88] sm:$0xff]  ;;  %v12939_v45 = vld [vmem:[%s19012_s3 + $0x10c0] sm:$0xff] }
 0x2d1   : > { %14117 = vmatpush1.bf16.msra.mxu0 %v14116_v41  ;;  %13951 = vmatprep.subr.bf16.mxu1 %v13950_v15  ;;  %v12741_v41 = vld [vmem:[%s19012_s3 + $0xa98] sm:$0xff]  ;;  %v12908_v15 = vld [vmem:[%s19012_s3 + $0xfc8] sm:$0xff] }
 0x2d2   : > { %14119 = vmatprep.subr.bf16.mxu0 %v14118_v3  ;;  %v14136_v3 = vpack.c.bf16 %v12735_v38, %v12733_v50  ;;  %v14138_v49 = vpack.c.bf16 %v12741_v41, %v12739_v56  ;;  %v14306_v34 = vpack.c.bf16 %v12910_v63, %v12908_v15  ;;  %v12756_v38 = vld [vmem:[%s19012_s3 + $0xb10] sm:$0xff]  ;;  %v12923_v56 = vld [vmem:[%s19012_s3 + $0x1040] sm:$0xff]  ;;  %v12759_v63 = vld [vmem:[%s19012_s3 + $0xb28] sm:$0xff] }
 0x2d3   : > { %v12925_v15 = vld [vmem:[%s19012_s3 + $0x1050] sm:$0xff] }
 0x2d4   : > { %13953 = vmatpush1.bf16.msra.mxu1 %v13952_v21  ;;  %v12745_v21 = vld [vmem:[%s19012_s3 + $0xab8] sm:$0xff] }
 0x2d5   : > { %14121 = vmatpush1.bf16.msra.mxu0 %v14120_v52  ;;  %13955 = vmatprep.subr.bf16.mxu1 %v13954_v55  ;;  %v14140_v52 = vpack.c.bf16 %v12740_v54, %v12738_v44  ;;  %v12912_v55 = vld [vmem:[%s19012_s3 + $0xfe8] sm:$0xff]  ;;  %v14142_v8 = vpack.c.bf16 %v12745_v21, %v12743_v32  ;;  %v14324_v44 = vpack.c.bf16 %v12925_v15, %v12923_v56  ;;  %v12929_v21 = vld [vmem:[%s19012_s3 + $0x1070] sm:$0xff]  ;;  %v12774_v56 = vld [vmem:[%s19012_s3 + $0xba0] sm:$0xff] }
 0x2d6   : > { %14123 = vmatprep.subr.bf16.mxu0 %v14122_v1  ;;  %v12742_v1 = vld [vmem:[%s19012_s3 + $0xaa0] sm:$0xff] }
 0x2d7   : > { %v14144_v27 = vpack.c.bf16 %v12744_v51, %v12742_v1  ;;  %v14328_v51 = vpack.c.bf16 %v12929_v21, %v12927_v17  ;;  %v12943_v15 = vld [vmem:[%s19012_s3 + $0x10e0] sm:$0xff] }
 0x2d8   : > { %13957 = vmatpush1.bf16.msra.mxu1 %v13956_v9  ;;  %v12749_v9 = vld [vmem:[%s19012_s3 + $0xad8] sm:$0xff]  ;;  %v12778_v17 = vld [vmem:[%s19012_s3 + $0xbc0] sm:$0xff] }
 0x2d9   : > { %14125 = vmatpush1.bf16.msra.mxu0 %v14124_v16  ;;  %13959 = vmatprep.subr.bf16.mxu1 %v13958_v46  ;;  %v14310_v16 = vpack.c.bf16 %v12914_v53, %v12912_v55  ;;  %v12916_v46 = vld [vmem:[%s19012_s3 + $0x1008] sm:$0xff]  ;;  %v12765_v55 = vld [vmem:[%s19012_s3 + $0xb58] sm:$0xff]  ;;  %v12947_v21 = vld [vmem:[%s19012_s3 + $0x1100] sm:$0xff] }
 0x2da   : > { %14127 = vmatprep.subr.bf16.mxu0 %v14126_v62  ;;  %v14146_v62 = vpack.c.bf16 %v12749_v9, %v12747_v61  ;;  %v14314_v22 = vpack.c.bf16 %v12918_v23, %v12916_v46  ;;  %v12932_v53 = vld [vmem:[%s19012_s3 + $0x1088] sm:$0xff]  ;;  %v12931_v61 = vld [vmem:[%s19012_s3 + $0x1080] sm:$0xff]  ;;  %v12769_v23 = vld [vmem:[%s19012_s3 + $0xb78] sm:$0xff] }
 0x2db   : > { %v12767_v46 = vld [vmem:[%s19012_s3 + $0xb68] sm:$0xff] }
 0x2dc   : > { %13961 = vmatpush1.bf16.msra.mxu1 %v13960_v31  ;;  %v12751_v31 = vld [vmem:[%s19012_s3 + $0xae8] sm:$0xff]  ;;  %v14166_v12 = vpack.c.bf16 %v12769_v23, %v12767_v46  ;;  %v12953_v23 = vld [vmem:[%s19012_s3 + $0x1130] sm:$0xff] }
 0x2dd   : > { %14129 = vmatpush1.bf16.msra.mxu0 %v14128_v7  ;;  %13963 = vmatprep.subr.bf16.mxu1 %v13962_v28  ;;  %v12753_v7 = vld [vmem:[%s19012_s3 + $0xaf8] sm:$0xff]  ;;  %v12920_v28 = vld [vmem:[%s19012_s3 + $0x1028] sm:$0xff] }
 0x2de   : > { %14131 = vmatprep.subr.bf16.mxu0 %v14130_v13  ;;  %v14150_v42 = vpack.c.bf16 %v12753_v7, %v12751_v31  ;;  %v12750_v13 = vld [vmem:[%s19012_s3 + $0xae0] sm:$0xff]  ;;  %v12937_v7 = vld [vmem:[%s19012_s3 + $0x10b0] sm:$0xff] }
 0x2df   : > { %v14152_v5 = vpack.c.bf16 %v12752_v30, %v12750_v13  ;;  %v14336_v13 = vpack.c.bf16 %v12937_v7, %v12935_v25  ;;  %v12786_v25 = vld [vmem:[%s19012_s3 + $0xc00] sm:$0xff] }
 0x2e0   : > { %13965 = vmatpush1.bf16.msra.mxu1 %v13964_v47  ;;  %v12757_v47 = vld [vmem:[%s19012_s3 + $0xb18] sm:$0xff]  ;;  %v12955_v7 = vld [vmem:[%s19012_s3 + $0x1140] sm:$0xff] }
 0x2e1   : > { %14133 = vmatpush1.bf16.msra.mxu0 %v14132_v10  ;;  %13967 = vmatprep.subr.bf16.mxu1 %v13966_v43  ;;  %v12924_v10 = vld [vmem:[%s19012_s3 + $0x1048] sm:$0xff]  ;;  %v12926_v43 = vld [vmem:[%s19012_s3 + $0x1058] sm:$0xff]  ;;  %v14154_v50 = vpack.c.bf16 %v12757_v47, %v12755_v6  ;;  %v12941_v47 = vld [vmem:[%s19012_s3 + $0x10d0] sm:$0xff] }
 0x2e2   : > { %14135 = vmatprep.subr.bf16.mxu0 %v14134_v60  ;;  %v12754_v60 = vld [vmem:[%s19012_s3 + $0xb00] sm:$0xff]  ;;  %v14322_v41 = vpack.c.bf16 %v12926_v43, %v12924_v10  ;;  %v12775_v10 = vld [vmem:[%s19012_s3 + $0xba8] sm:$0xff]  ;;  %v12777_v43 = vld [vmem:[%s19012_s3 + $0xbb8] sm:$0xff] }
 0x2e4   : > { %13969 = vmatpush1.bf16.msra.mxu1 %v13968_v57  ;;  %v12761_v57 = vld [vmem:[%s19012_s3 + $0xb38] sm:$0xff] }
 0x2e5   : > { %14137 = vmatpush1.bf16.msra.mxu0 %v14136_v3  ;;  %14139 = vmatprep.subr.bf16.mxu1 %v14138_v49  ;;  %v12930_v3 = vld [vmem:[%s19012_s3 + $0x1078] sm:$0xff]  ;;  %v14156_v49 = vpack.c.bf16 %v12756_v38, %v12754_v60  ;;  %v14158_v54 = vpack.c.bf16 %v12761_v57, %v12759_v63  ;;  %v14340_v60 = vpack.c.bf16 %v12941_v47, %v12939_v45  ;;  %v12945_v57 = vld [vmem:[%s19012_s3 + $0x10f0] sm:$0xff]  ;;  %v12790_v45 = vld [vmem:[%s19012_s3 + $0xc20] sm:$0xff] }
 0x2e6   : > { %14307 = vmatprep.subr.bf16.mxu0 %v14306_v34  ;;  %v12758_v34 = vld [vmem:[%s19012_s3 + $0xb20] sm:$0xff]  ;;  %v14326_v32 = vpack.c.bf16 %v12930_v3, %v12928_v40  ;;  %v14174_v38 = vpack.c.bf16 %v12777_v43, %v12775_v10  ;;  %v12779_v40 = vld [vmem:[%s19012_s3 + $0xbc8] sm:$0xff]  ;;  %v12781_v3 = vld [vmem:[%s19012_s3 + $0xbd8] sm:$0xff] }
 0x2e7   : > { %7128 = vmatmul.mubr.f32.vlgmr.msra.gmra.mrb[2].mxu1 %v17392_v58  ;;  %v14160_v1 = vpack.c.bf16 %v12760_v39, %v12758_v34  ;;  %v14344_v34 = vpack.c.bf16 %v12945_v57, %v12943_v15  ;;  %v14178_v39 = vpack.c.bf16 %v12781_v3, %v12779_v40  ;;  %v12959_v47 = vld [vmem:[%s19012_s3 + $0x1160] sm:$0xff]  ;;  %v12961_v43 = vld [vmem:[%s19012_s3 + $0x1170] sm:$0xff] }
 0x2e8   : > { %7510 = vmatmul.mubr.f32.vlgmr.msra.gmra.mrb[4].mxu0 %v17392_v58  ;;  %14141 = vmatpush1.bf16.msra.mxu1 %v14140_v52  ;;  %v12763_v52 = vld [vmem:[%s19012_s3 + $0xb48] sm:$0xff]  ;;  %v12794_v15 = vld [vmem:[%s19012_s3 + $0xc40] sm:$0xff]  ;;  %v12965_v3 = vld [vmem:[%s19012_s3 + $0x1190] sm:$0xff] }
 0x2e9   : > { %7751 = vmatprep.mubr.f32.mxu1 %v16736_v29  ;;  %14309 = vmatpush1.bf16.msra.mxu0 %v14308_v19  ;;  %v12934_v19 = vld [vmem:[%s19012_s3 + $0x1098] sm:$0xff]  ;;  %v14162_v59 = vpack.c.bf16 %v12765_v55, %v12763_v52  ;;  %v12949_v55 = vld [vmem:[%s19012_s3 + $0x1110] sm:$0xff]  ;;  %v12963_v57 = vld [vmem:[%s19012_s3 + $0x1180] sm:$0xff] }
 0x2ea   : > { %8135 = vmatprep.mubr.f32.mxu0 %v16736_v29  ;;  %14143 = vmatprep.subr.bf16.mxu1 %v14142_v8  ;;  %v12922_v29 = vld [vmem:[%s19012_s3 + $0x1038] sm:$0xff]  ;;  %v12762_v8 = vld [vmem:[%s19012_s3 + $0xb40] sm:$0xff]  ;;  %v14330_v9 = vpack.c.bf16 %v12934_v19, %v12932_v53  ;;  %v12783_v53 = vld [vmem:[%s19012_s3 + $0xbe8] sm:$0xff] }
 0x2eb   : > { %14311 = vmatprep.subr.bf16.mxu0 %v14310_v16  ;;  %v14318_v24 = vpack.c.bf16 %v12922_v29, %v12920_v28  ;;  %v12933_v16 = vld [vmem:[%s19012_s3 + $0x1090] sm:$0xff]  ;;  %v12771_v28 = vld [vmem:[%s19012_s3 + $0xb88] sm:$0xff]  ;;  %v12773_v29 = vld [vmem:[%s19012_s3 + $0xb98] sm:$0xff] }
 0x2ec   : > { %14145 = vmatpush1.bf16.msra.mxu1 %v14144_v27  ;;  %v12936_v27 = vld [vmem:[%s19012_s3 + $0x10a8] sm:$0xff]  ;;  %v14332_v20 = vpack.c.bf16 %v12933_v16, %v12931_v61  ;;  %v14170_v30 = vpack.c.bf16 %v12773_v29, %v12771_v28  ;;  %v12785_v19 = vld [vmem:[%s19012_s3 + $0xbf8] sm:$0xff]  ;;  %v12782_v61 = vld [vmem:[%s19012_s3 + $0xbe0] sm:$0xff] }
 0x2ed   : > { %14313 = vmatpush1.bf16.msra.mxu0 %v14312_v4  ;;  %14147 = vmatprep.subr.bf16.mxu1 %v14146_v62  ;;  %v12938_v4 = vld [vmem:[%s19012_s3 + $0x10b8] sm:$0xff]  ;;  %v14164_v62 = vpack.c.bf16 %v12764_v11, %v12762_v8  ;;  %v14348_v8 = vpack.c.bf16 %v12949_v55, %v12947_v21  ;;  %v14182_v11 = vpack.c.bf16 %v12785_v19, %v12783_v53  ;;  %v12951_v16 = vld [vmem:[%s19012_s3 + $0x1120] sm:$0xff]  ;;  %v12957_v29 = vld [vmem:[%s19012_s3 + $0x1150] sm:$0xff] }
 0x2ee   : > { %14315 = vmatprep.subr.bf16.mxu0 %v14314_v22  ;;  %v12768_v22 = vld [vmem:[%s19012_s3 + $0xb70] sm:$0xff]  ;;  %v14334_v31 = vpack.c.bf16 %v12938_v4, %v12936_v27  ;;  %v12787_v27 = vld [vmem:[%s19012_s3 + $0xc08] sm:$0xff]  ;;  %v12789_v4 = vld [vmem:[%s19012_s3 + $0xc18] sm:$0xff] }
 0x2ef   : > { %v12798_v21 = vld [vmem:[%s19012_s3 + $0xc60] sm:$0xff]  ;;  %v12969_v19 = vld [vmem:[%s19012_s3 + $0x11b0] sm:$0xff] }
 0x2f0   : > { %14149 = vmatpush1.bf16.msra.mxu1 %v14148_v14  ;;  %v12940_v14 = vld [vmem:[%s19012_s3 + $0x10c8] sm:$0xff]  ;;  %v12967_v55 = vld [vmem:[%s19012_s3 + $0x11a0] sm:$0xff] }
 0x2f1   : > { %14317 = vmatpush1.bf16.msra.mxu0 %v14316_v36  ;;  %14151 = vmatprep.subr.bf16.mxu1 %v14150_v42  ;;  %v12942_v36 = vld [vmem:[%s19012_s3 + $0x10d8] sm:$0xff]  ;;  %v14168_v42 = vpack.c.bf16 %v12768_v22, %v12766_v2  ;;  %v14352_v2 = vpack.c.bf16 %v12953_v23, %v12951_v16  ;;  %v14186_v22 = vpack.c.bf16 %v12789_v4, %v12787_v27  ;;  %v12802_v16 = vld [vmem:[%s19012_s3 + $0xc80] sm:$0xff]  ;;  %v12973_v4 = vld [vmem:[%s19012_s3 + $0x11d0] sm:$0xff] }
 0x2f2   : > { %14319 = vmatprep.subr.bf16.mxu0 %v14318_v24  ;;  %v12772_v24 = vld [vmem:[%s19012_s3 + $0xb90] sm:$0xff]  ;;  %v14338_v6 = vpack.c.bf16 %v12942_v36, %v12940_v14  ;;  %v12791_v14 = vld [vmem:[%s19012_s3 + $0xc28] sm:$0xff]  ;;  %v12793_v36 = vld [vmem:[%s19012_s3 + $0xc38] sm:$0xff] }
 0x2f3   : > { %v12971_v27 = vld [vmem:[%s19012_s3 + $0x11c0] sm:$0xff] }
 0x2f4   : > { %14153 = vmatpush1.bf16.msra.mxu1 %v14152_v5  ;;  %v12944_v5 = vld [vmem:[%s19012_s3 + $0x10e8] sm:$0xff] }
 0x2f5   : > { %14321 = vmatpush1.bf16.msra.mxu0 %v14320_v35  ;;  %14155 = vmatprep.subr.bf16.mxu1 %v14154_v50  ;;  %v12946_v35 = vld [vmem:[%s19012_s3 + $0x10f8] sm:$0xff]  ;;  %v14172_v50 = vpack.c.bf16 %v12772_v24, %v12770_v33  ;;  %v14356_v33 = vpack.c.bf16 %v12957_v29, %v12955_v7  ;;  %v14190_v24 = vpack.c.bf16 %v12793_v36, %v12791_v14  ;;  %v12808_v7 = vld [vmem:[%s19012_s3 + $0xcb0] sm:$0xff]  ;;  %v12811_v36 = vld [vmem:[%s19012_s3 + $0xcc8] sm:$0xff] }
 0x2f6   : > { %14323 = vmatprep.subr.bf16.mxu0 %v14322_v41  ;;  %v12776_v41 = vld [vmem:[%s19012_s3 + $0xbb0] sm:$0xff]  ;;  %v14342_v63 = vpack.c.bf16 %v12946_v35, %v12944_v5  ;;  %v12795_v5 = vld [vmem:[%s19012_s3 + $0xc48] sm:$0xff]  ;;  %v12797_v35 = vld [vmem:[%s19012_s3 + $0xc58] sm:$0xff] }
 0x2f7   : > { %v12977_v14 = vld [vmem:[%s19012_s3 + $0x11f0] sm:$0xff] }
 0x2f8   : > { %14157 = vmatpush1.bf16.msra.mxu1 %v14156_v49  ;;  %v12948_v49 = vld [vmem:[%s19012_s3 + $0x1108] sm:$0xff] }
 0x2f9   : > { %14325 = vmatpush1.bf16.msra.mxu0 %v14324_v44  ;;  %14159 = vmatprep.subr.bf16.mxu1 %v14158_v54  ;;  %v12950_v44 = vld [vmem:[%s19012_s3 + $0x1118] sm:$0xff]  ;;  %v14176_v54 = vpack.c.bf16 %v12776_v41, %v12774_v56  ;;  %v14360_v56 = vpack.c.bf16 %v12961_v43, %v12959_v47  ;;  %v14194_v41 = vpack.c.bf16 %v12797_v35, %v12795_v5  ;;  %v12810_v47 = vld [vmem:[%s19012_s3 + $0xcc0] sm:$0xff]  ;;  %v12981_v5 = vld [vmem:[%s19012_s3 + $0x1210] sm:$0xff] }
 0x2fa   : > { %14327 = vmatprep.subr.bf16.mxu0 %v14326_v32  ;;  %v12780_v32 = vld [vmem:[%s19012_s3 + $0xbd0] sm:$0xff]  ;;  %v14346_v52 = vpack.c.bf16 %v12950_v44, %v12948_v49  ;;  %v12799_v49 = vld [vmem:[%s19012_s3 + $0xc68] sm:$0xff]  ;;  %v12801_v44 = vld [vmem:[%s19012_s3 + $0xc78] sm:$0xff] }
 0x2fb   : > { %v12979_v43 = vld [vmem:[%s19012_s3 + $0x1200] sm:$0xff]  ;;  %v12815_v35 = vld [vmem:[%s19012_s3 + $0xce8] sm:$0xff] }
 0x2fc   : > { %14161 = vmatpush1.bf16.msra.mxu1 %v14160_v1  ;;  %v12952_v1 = vld [vmem:[%s19012_s3 + $0x1128] sm:$0xff] }
 0x2fd   : > { %14329 = vmatpush1.bf16.msra.mxu0 %v14328_v51  ;;  %14163 = vmatprep.subr.bf16.mxu1 %v14162_v59  ;;  %v12954_v51 = vld [vmem:[%s19012_s3 + $0x1138] sm:$0xff]  ;;  %v14180_v59 = vpack.c.bf16 %v12780_v32, %v12778_v17  ;;  %v14364_v17 = vpack.c.bf16 %v12965_v3, %v12963_v57  ;;  %v14198_v32 = vpack.c.bf16 %v12801_v44, %v12799_v49  ;;  %v12983_v57 = vld [vmem:[%s19012_s3 + $0x1220] sm:$0xff]  ;;  %v12985_v3 = vld [vmem:[%s19012_s3 + $0x1230] sm:$0xff] }
 0x2fe   : > { %14331 = vmatprep.subr.bf16.mxu0 %v14330_v9  ;;  %v12784_v9 = vld [vmem:[%s19012_s3 + $0xbf0] sm:$0xff]  ;;  %v14350_v46 = vpack.c.bf16 %v12954_v51, %v12952_v1  ;;  %v12803_v1 = vld [vmem:[%s19012_s3 + $0xc88] sm:$0xff]  ;;  %v12805_v51 = vld [vmem:[%s19012_s3 + $0xc98] sm:$0xff] }
 0x2ff   : > { %v12819_v49 = vld [vmem:[%s19012_s3 + $0xd08] sm:$0xff]  ;;  %v12821_v44 = vld [vmem:[%s19012_s3 + $0xd18] sm:$0xff] }
 0x300   : > { %14165 = vmatpush1.bf16.msra.mxu1 %v14164_v62  ;;  %v12956_v62 = vld [vmem:[%s19012_s3 + $0x1148] sm:$0xff] }
 0x301   : > { %14333 = vmatpush1.bf16.msra.mxu0 %v14332_v20  ;;  %14167 = vmatprep.subr.bf16.mxu1 %v14166_v12  ;;  %v12958_v20 = vld [vmem:[%s19012_s3 + $0x1158] sm:$0xff]  ;;  %v14184_v12 = vpack.c.bf16 %v12784_v9, %v12782_v61  ;;  %v14368_v61 = vpack.c.bf16 %v12969_v19, %v12967_v55  ;;  %v14202_v9 = vpack.c.bf16 %v12805_v51, %v12803_v1  ;;  %v12987_v55 = vld [vmem:[%s19012_s3 + $0x1240] sm:$0xff]  ;;  %v12989_v19 = vld [vmem:[%s19012_s3 + $0x1250] sm:$0xff] }
 0x302   : > { %14335 = vmatprep.subr.bf16.mxu0 %v14334_v31  ;;  %v12788_v31 = vld [vmem:[%s19012_s3 + $0xc10] sm:$0xff]  ;;  %v14354_v28 = vpack.c.bf16 %v12958_v20, %v12956_v62  ;;  %v12807_v62 = vld [vmem:[%s19012_s3 + $0xca8] sm:$0xff]  ;;  %v12809_v20 = vld [vmem:[%s19012_s3 + $0xcb8] sm:$0xff] }
 0x303   : > { %v14206_v29 = vpack.c.bf16 %v12809_v20, %v12807_v62  ;;  %v12823_v1 = vld [vmem:[%s19012_s3 + $0xd28] sm:$0xff]  ;;  %v12825_v51 = vld [vmem:[%s19012_s3 + $0xd38] sm:$0xff] }
 0x304   : > { %14169 = vmatpush1.bf16.msra.mxu1 %v14168_v42  ;;  %v12960_v42 = vld [vmem:[%s19012_s3 + $0x1168] sm:$0xff]  ;;  %v12829_v20 = vld [vmem:[%s19012_s3 + $0xd58] sm:$0xff] }
 0x305   : > { %14337 = vmatpush1.bf16.msra.mxu0 %v14336_v13  ;;  %14171 = vmatprep.subr.bf16.mxu1 %v14170_v30  ;;  %v12962_v13 = vld [vmem:[%s19012_s3 + $0x1178] sm:$0xff]  ;;  %v14188_v30 = vpack.c.bf16 %v12788_v31, %v12786_v25  ;;  %v14372_v25 = vpack.c.bf16 %v12973_v4, %v12971_v27  ;;  %v12806_v31 = vld [vmem:[%s19012_s3 + $0xca0] sm:$0xff]  ;;  %v12993_v4 = vld [vmem:[%s19012_s3 + $0x1270] sm:$0xff] }
 0x306   : > { %14339 = vmatprep.subr.bf16.mxu0 %v14338_v6  ;;  %v12792_v6 = vld [vmem:[%s19012_s3 + $0xc30] sm:$0xff]  ;;  %v14358_v10 = vpack.c.bf16 %v12962_v13, %v12960_v42  ;;  %v12813_v42 = vld [vmem:[%s19012_s3 + $0xcd8] sm:$0xff]  ;;  %v12827_v62 = vld [vmem:[%s19012_s3 + $0xd48] sm:$0xff] }
 0x308   : > { %14173 = vmatpush1.bf16.msra.mxu1 %v14172_v50  ;;  %v12964_v50 = vld [vmem:[%s19012_s3 + $0x1188] sm:$0xff] }
 0x309   : > { %14341 = vmatpush1.bf16.msra.mxu0 %v14340_v60  ;;  %14175 = vmatprep.subr.bf16.mxu1 %v14174_v38  ;;  %v12966_v60 = vld [vmem:[%s19012_s3 + $0x1198] sm:$0xff]  ;;  %v14192_v38 = vpack.c.bf16 %v12792_v6, %v12790_v45  ;;  %v14210_v6 = vpack.c.bf16 %v12813_v42, %v12811_v36  ;;  %v12997_v36 = vld [vmem:[%s19012_s3 + $0x1290] sm:$0xff]  ;;  %v12831_v42 = vld [vmem:[%s19012_s3 + $0xd68] sm:$0xff] }
 0x30a   : > { %14343 = vmatprep.subr.bf16.mxu0 %v14342_v63  ;;  %v12796_v63 = vld [vmem:[%s19012_s3 + $0xc50] sm:$0xff]  ;;  %v14362_v40 = vpack.c.bf16 %v12966_v60, %v12964_v50  ;;  %v12817_v50 = vld [vmem:[%s19012_s3 + $0xcf8] sm:$0xff]  ;;  %v12984_v60 = vld [vmem:[%s19012_s3 + $0x1228] sm:$0xff] }
 0x30c   : > { %14177 = vmatpush1.bf16.msra.mxu1 %v14176_v54  ;;  %v12968_v54 = vld [vmem:[%s19012_s3 + $0x11a8] sm:$0xff] }
 0x30d   : > { %14345 = vmatpush1.bf16.msra.mxu0 %v14344_v34  ;;  %14179 = vmatprep.subr.bf16.mxu1 %v14178_v39  ;;  %v12970_v34 = vld [vmem:[%s19012_s3 + $0x11b8] sm:$0xff]  ;;  %v14196_v39 = vpack.c.bf16 %v12796_v63, %v12794_v15  ;;  %v12814_v15 = vld [vmem:[%s19012_s3 + $0xce0] sm:$0xff]  ;;  %v12816_v63 = vld [vmem:[%s19012_s3 + $0xcf0] sm:$0xff] }
 0x30e   : > { %14347 = vmatprep.subr.bf16.mxu0 %v14346_v52  ;;  %v12800_v52 = vld [vmem:[%s19012_s3 + $0xc70] sm:$0xff]  ;;  %v14366_v53 = vpack.c.bf16 %v12970_v34, %v12968_v54  ;;  %v12988_v54 = vld [vmem:[%s19012_s3 + $0x1248] sm:$0xff]  ;;  %v12990_v34 = vld [vmem:[%s19012_s3 + $0x1258] sm:$0xff] }
 0x310   : > { %14181 = vmatpush1.bf16.msra.mxu1 %v14180_v59  ;;  %v12972_v59 = vld [vmem:[%s19012_s3 + $0x11c8] sm:$0xff] }
 0x311   : > { %14349 = vmatpush1.bf16.msra.mxu0 %v14348_v8  ;;  %14183 = vmatprep.subr.bf16.mxu1 %v14182_v11  ;;  %v12974_v8 = vld [vmem:[%s19012_s3 + $0x11d8] sm:$0xff]  ;;  %v14200_v11 = vpack.c.bf16 %v12800_v52, %v12798_v21  ;;  %v12818_v21 = vld [vmem:[%s19012_s3 + $0xd00] sm:$0xff]  ;;  %v12820_v52 = vld [vmem:[%s19012_s3 + $0xd10] sm:$0xff] }
 0x312   : > { %14351 = vmatprep.subr.bf16.mxu0 %v14350_v46  ;;  %v12804_v46 = vld [vmem:[%s19012_s3 + $0xc90] sm:$0xff]  ;;  %v14370_v23 = vpack.c.bf16 %v12974_v8, %v12972_v59  ;;  %v12992_v59 = vld [vmem:[%s19012_s3 + $0x1268] sm:$0xff]  ;;  %v12994_v8 = vld [vmem:[%s19012_s3 + $0x1278] sm:$0xff] }
 0x313   : > { %v14390_v27 = vpack.c.bf16 %v12994_v8, %v12992_v59  ;;  %v13012_v59 = vld [vmem:[%s19012_s3 + $0x1308] sm:$0xff]  ;;  %v13014_v8 = vld [vmem:[%s19012_s3 + $0x1318] sm:$0xff] }
 0x314   : > { %14185 = vmatpush1.bf16.msra.mxu1 %v14184_v12  ;;  %v14204_v12 = vpack.c.bf16 %v12804_v46, %v12802_v16  ;;  %v12822_v16 = vld [vmem:[%s19012_s3 + $0xd20] sm:$0xff]  ;;  %v12824_v46 = vld [vmem:[%s19012_s3 + $0xd30] sm:$0xff] }
 0x315   : > { %14353 = vmatpush1.bf16.msra.mxu0 %v14352_v2  ;;  %14187 = vmatprep.subr.bf16.mxu1 %v14186_v22  ;;  %v12976_v2 = vld [vmem:[%s19012_s3 + $0x11e8] sm:$0xff]  ;;  %v12978_v22 = vld [vmem:[%s19012_s3 + $0x11f8] sm:$0xff] }
 0x316   : > { %14355 = vmatprep.subr.bf16.mxu0 %v14354_v28  ;;  %v12975_v28 = vld [vmem:[%s19012_s3 + $0x11e0] sm:$0xff]  ;;  %v14374_v13 = vpack.c.bf16 %v12978_v22, %v12976_v2  ;;  %v12998_v2 = vld [vmem:[%s19012_s3 + $0x1298] sm:$0xff]  ;;  %v14224_v22 = vpack.c.bf16 %v12824_v46, %v12822_v16  ;;  %v12844_v46 = vld [vmem:[%s19012_s3 + $0xdd0] sm:$0xff] }
 0x317   : > { %v14376_v45 = vpack.c.bf16 %v12977_v14, %v12975_v28  ;;  %v12828_v28 = vld [vmem:[%s19012_s3 + $0xd50] sm:$0xff]  ;;  %v12842_v16 = vld [vmem:[%s19012_s3 + $0xdc0] sm:$0xff] }
 0x318   : > { %14189 = vmatpush1.bf16.msra.mxu1 %v14188_v30  ;;  %v12980_v30 = vld [vmem:[%s19012_s3 + $0x1208] sm:$0xff] }
 0x319   : > { %14357 = vmatpush1.bf16.msra.mxu0 %v14356_v33  ;;  %14191 = vmatprep.subr.bf16.mxu1 %v14190_v24  ;;  %v12982_v33 = vld [vmem:[%s19012_s3 + $0x1218] sm:$0xff]  ;;  %v14208_v24 = vpack.c.bf16 %v12808_v7, %v12806_v31  ;;  %v14226_v31 = vpack.c.bf16 %v12829_v20, %v12827_v62  ;;  %v12826_v7 = vld [vmem:[%s19012_s3 + $0xd40] sm:$0xff]  ;;  %v12847_v62 = vld [vmem:[%s19012_s3 + $0xde8] sm:$0xff] }
 0x31a   : > { %14359 = vmatprep.subr.bf16.mxu0 %v14358_v10  ;;  %v12812_v10 = vld [vmem:[%s19012_s3 + $0xcd0] sm:$0xff]  ;;  %v12849_v20 = vld [vmem:[%s19012_s3 + $0xdf8] sm:$0xff] }
 0x31c   : > { %14193 = vmatpush1.bf16.msra.mxu1 %v14192_v38  ;;  %v14212_v38 = vpack.c.bf16 %v12812_v10, %v12810_v47  ;;  %v12830_v47 = vld [vmem:[%s19012_s3 + $0xd60] sm:$0xff]  ;;  %v12832_v10 = vld [vmem:[%s19012_s3 + $0xd70] sm:$0xff] }
 0x31d   : > { %14361 = vmatpush1.bf16.msra.mxu0 %v14360_v56  ;;  %14195 = vmatprep.subr.bf16.mxu1 %v14194_v41  ;;  %v14380_v56 = vpack.c.bf16 %v12981_v5, %v12979_v43  ;;  %v14214_v41 = vpack.c.bf16 %v12817_v50, %v12815_v35  ;;  %v12999_v43 = vld [vmem:[%s19012_s3 + $0x12a0] sm:$0xff]  ;;  %v13001_v5 = vld [vmem:[%s19012_s3 + $0x12b0] sm:$0xff]  ;;  %v12835_v35 = vld [vmem:[%s19012_s3 + $0xd88] sm:$0xff] }
 0x31e   : > { %14363 = vmatprep.subr.bf16.mxu0 %v14362_v40  ;;  %v12837_v50 = vld [vmem:[%s19012_s3 + $0xd98] sm:$0xff] }
 0x320   : > { %14197 = vmatpush1.bf16.msra.mxu1 %v14196_v39  ;;  %v14216_v39 = vpack.c.bf16 %v12816_v63, %v12814_v15  ;;  %v12834_v15 = vld [vmem:[%s19012_s3 + $0xd80] sm:$0xff]  ;;  %v12836_v63 = vld [vmem:[%s19012_s3 + $0xd90] sm:$0xff] }
 0x321   : > { %14365 = vmatpush1.bf16.msra.mxu0 %v14364_v17  ;;  %14199 = vmatprep.subr.bf16.mxu1 %v14198_v32  ;;  %v14384_v17 = vpack.c.bf16 %v12985_v3, %v12983_v57  ;;  %v14218_v32 = vpack.c.bf16 %v12821_v44, %v12819_v49  ;;  %v13003_v57 = vld [vmem:[%s19012_s3 + $0x12c0] sm:$0xff]  ;;  %v13005_v3 = vld [vmem:[%s19012_s3 + $0x12d0] sm:$0xff]  ;;  %v12839_v49 = vld [vmem:[%s19012_s3 + $0xda8] sm:$0xff] }
 0x322   : > { %14367 = vmatprep.subr.bf16.mxu0 %v14366_v53  ;;  %v14386_v53 = vpack.c.bf16 %v12990_v34, %v12988_v54  ;;  %v12841_v44 = vld [vmem:[%s19012_s3 + $0xdb8] sm:$0xff]  ;;  %v13008_v54 = vld [vmem:[%s19012_s3 + $0x12e8] sm:$0xff] }
 0x323   : > { %v13010_v34 = vld [vmem:[%s19012_s3 + $0x12f8] sm:$0xff] }
 0x324   : > { %14201 = vmatpush1.bf16.msra.mxu1 %v14200_v11  ;;  %v14220_v11 = vpack.c.bf16 %v12820_v52, %v12818_v21  ;;  %v12838_v21 = vld [vmem:[%s19012_s3 + $0xda0] sm:$0xff]  ;;  %v12840_v52 = vld [vmem:[%s19012_s3 + $0xdb0] sm:$0xff] }
 0x325   : > { %14369 = vmatpush1.bf16.msra.mxu0 %v14368_v61  ;;  %14203 = vmatprep.subr.bf16.mxu1 %v14202_v9  ;;  %v14388_v61 = vpack.c.bf16 %v12989_v19, %v12987_v55  ;;  %v14222_v9 = vpack.c.bf16 %v12825_v51, %v12823_v1  ;;  %v13007_v55 = vld [vmem:[%s19012_s3 + $0x12e0] sm:$0xff]  ;;  %v13009_v19 = vld [vmem:[%s19012_s3 + $0x12f0] sm:$0xff]  ;;  %v12843_v1 = vld [vmem:[%s19012_s3 + $0xdc8] sm:$0xff] }
 0x326   : > { %14371 = vmatprep.subr.bf16.mxu0 %v14370_v23  ;;  %v12991_v23 = vld [vmem:[%s19012_s3 + $0x1260] sm:$0xff]  ;;  %v12845_v51 = vld [vmem:[%s19012_s3 + $0xdd8] sm:$0xff] }
 0x327   : > { %7752 = vmatmul.mubr.f32.vlgmr.msra.gmra.mrb[4].mxu1 %v16744_v37 }
 0x328   : > { %8136 = vmatmul.mubr.f32.vlgmr.msra.gmra.mrb[6].mxu0 %v16744_v37  ;;  %14205 = vmatpush1.bf16.msra.mxu1 %v14204_v12  ;;  %v14378_v37 = vpack.c.bf16 %v12982_v33, %v12980_v30  ;;  %v12996_v12 = vld [vmem:[%s19012_s3 + $0x1288] sm:$0xff]  ;;  %v13002_v33 = vld [vmem:[%s19012_s3 + $0x12b8] sm:$0xff] }
 0x329   : > { %7822 = vmatprep.mubr.f32.mxu1 %v17109_v48  ;;  %14373 = vmatpush1.bf16.msra.mxu0 %v14372_v25  ;;  %v14392_v25 = vpack.c.bf16 %v12993_v4, %v12991_v23  ;;  %v14394_v14 = vpack.c.bf16 %v12998_v2, %v12996_v12  ;;  %v13000_v30 = vld [vmem:[%s19012_s3 + $0x12a8] sm:$0xff]  ;;  %v13011_v23 = vld [vmem:[%s19012_s3 + $0x1300] sm:$0xff]  ;;  %v13013_v4 = vld [vmem:[%s19012_s3 + $0x1310] sm:$0xff] }
 0x32a   : > { %8206 = vmatprep.mubr.f32.mxu0 %v17109_v48  ;;  %14207 = vmatprep.subr.bf16.mxu1 %v14206_v29  ;;  %v12986_v48 = vld [vmem:[%s19012_s3 + $0x1238] sm:$0xff]  ;;  %v12995_v29 = vld [vmem:[%s19012_s3 + $0x1280] sm:$0xff]  ;;  %v13016_v12 = vld [vmem:[%s19012_s3 + $0x1328] sm:$0xff] }
 0x32b   : > { %14375 = vmatprep.subr.bf16.mxu0 %v14374_v13  ;;  %v14382_v40 = vpack.c.bf16 %v12986_v48, %v12984_v60  ;;  %v12833_v13 = vld [vmem:[%s19012_s3 + $0xd78] sm:$0xff]  ;;  %v13004_v60 = vld [vmem:[%s19012_s3 + $0x12c8] sm:$0xff] }
 0x32c   : > { %14209 = vmatpush1.bf16.msra.mxu1 %v14208_v24  ;;  %v14228_v24 = vpack.c.bf16 %v12828_v28, %v12826_v7  ;;  %v13006_v48 = vld [vmem:[%s19012_s3 + $0x12d8] sm:$0xff]  ;;  %v12846_v7 = vld [vmem:[%s19012_s3 + $0xde0] sm:$0xff]  ;;  %v12848_v28 = vld [vmem:[%s19012_s3 + $0xdf0] sm:$0xff] }
 0x32d   : > { %14377 = vmatpush1.bf16.msra.mxu0 %v14376_v45  ;;  %14211 = vmatprep.subr.bf16.mxu1 %v14210_v6  ;;  %v14396_v45 = vpack.c.bf16 %v12997_v36, %v12995_v29  ;;  %v14230_v6 = vpack.c.bf16 %v12833_v13, %v12831_v42  ;;  %v13018_v2 = vld [vmem:[%s19012_s3 + $0x1338] sm:$0xff]  ;;  %v13015_v29 = vld [vmem:[%s19012_s3 + $0x1320] sm:$0xff]  ;;  %v13017_v36 = vld [vmem:[%s19012_s3 + $0x1330] sm:$0xff] }
 0x32e   : > { %14379 = vmatprep.subr.bf16.mxu0 %v14378_v37  ;;  %v14398_v37 = vpack.c.bf16 %v13002_v33, %v13000_v30  ;;  %v12851_v42 = vld [vmem:[%s19012_s3 + $0xe08] sm:$0xff]  ;;  %v12853_v13 = vld [vmem:[%s19012_s3 + $0xe18] sm:$0xff] }
 0x32f   : > { %v13020_v30 = vld [vmem:[%s19012_s3 + $0x1348] sm:$0xff]  ;;  %v13022_v33 = vld [vmem:[%s19012_s3 + $0x1358] sm:$0xff] }
 0x330   : > { %14213 = vmatpush1.bf16.msra.mxu1 %v14212_v38  ;;  %v14232_v38 = vpack.c.bf16 %v12832_v10, %v12830_v47  ;;  %v12850_v47 = vld [vmem:[%s19012_s3 + $0xe00] sm:$0xff]  ;;  %v12852_v10 = vld [vmem:[%s19012_s3 + $0xe10] sm:$0xff] }
 0x331   : > { %14381 = vmatpush1.bf16.msra.mxu0 %v14380_v56  ;;  %14215 = vmatprep.subr.bf16.mxu1 %v14214_v41  ;;  %v14400_v56 = vpack.c.bf16 %v13001_v5, %v12999_v43  ;;  %v14234_v41 = vpack.c.bf16 %v12837_v50, %v12835_v35  ;;  %v13019_v43 = vld [vmem:[%s19012_s3 + $0x1340] sm:$0xff]  ;;  %v13021_v5 = vld [vmem:[%s19012_s3 + $0x1350] sm:$0xff]  ;;  %v12855_v35 = vld [vmem:[%s19012_s3 + $0xe28] sm:$0xff] }
 0x332   : > { %14383 = vmatprep.subr.bf16.mxu0 %v14382_v40  ;;  %v14402_v40 = vpack.c.bf16 %v13006_v48, %v13004_v60  ;;  %v12857_v50 = vld [vmem:[%s19012_s3 + $0xe38] sm:$0xff]  ;;  %v13024_v60 = vld [vmem:[%s19012_s3 + $0x1368] sm:$0xff] }
 0x333   : > { %v13026_v48 = vld [vmem:[%s19012_s3 + $0x1378] sm:$0xff] }
 0x334   : > { %14217 = vmatpush1.bf16.msra.mxu1 %v14216_v39  ;;  %v14236_v39 = vpack.c.bf16 %v12836_v63, %v12834_v15  ;;  %v12854_v15 = vld [vmem:[%s19012_s3 + $0xe20] sm:$0xff]  ;;  %v12856_v63 = vld [vmem:[%s19012_s3 + $0xe30] sm:$0xff] }
 0x335   : > { %14385 = vmatpush1.bf16.msra.mxu0 %v14384_v17  ;;  %14219 = vmatprep.subr.bf16.mxu1 %v14218_v32  ;;  %v14404_v17 = vpack.c.bf16 %v13005_v3, %v13003_v57  ;;  %v14238_v32 = vpack.c.bf16 %v12841_v44, %v12839_v49  ;;  %v13023_v57 = vld [vmem:[%s19012_s3 + $0x1360] sm:$0xff]  ;;  %v13025_v3 = vld [vmem:[%s19012_s3 + $0x1370] sm:$0xff]  ;;  %v12859_v49 = vld [vmem:[%s19012_s3 + $0xe48] sm:$0xff] }
 0x336   : > { %14387 = vmatprep.subr.bf16.mxu0 %v14386_v53  ;;  %v14406_v53 = vpack.c.bf16 %v13010_v34, %v13008_v54  ;;  %v12861_v44 = vld [vmem:[%s19012_s3 + $0xe58] sm:$0xff]  ;;  %v13028_v54 = vld [vmem:[%s19012_s3 + $0x1388] sm:$0xff] }
 0x337   : > { %v13030_v34 = vld [vmem:[%s19012_s3 + $0x1398] sm:$0xff] }
 0x338   : > { %14221 = vmatpush1.bf16.msra.mxu1 %v14220_v11  ;;  %v14240_v11 = vpack.c.bf16 %v12840_v52, %v12838_v21  ;;  %v12858_v21 = vld [vmem:[%s19012_s3 + $0xe40] sm:$0xff]  ;;  %v12860_v52 = vld [vmem:[%s19012_s3 + $0xe50] sm:$0xff] }
 0x339   : > { %14389 = vmatpush1.bf16.msra.mxu0 %v14388_v61  ;;  %14223 = vmatprep.subr.bf16.mxu1 %v14222_v9  ;;  %v14408_v61 = vpack.c.bf16 %v13009_v19, %v13007_v55  ;;  %v14242_v9 = vpack.c.bf16 %v12845_v51, %v12843_v1  ;;  %v13027_v55 = vld [vmem:[%s19012_s3 + $0x1380] sm:$0xff]  ;;  %v13029_v19 = vld [vmem:[%s19012_s3 + $0x1390] sm:$0xff]  ;;  %v12863_v1 = vld [vmem:[%s19012_s3 + $0xe68] sm:$0xff] }
 0x33a   : > { %14391 = vmatprep.subr.bf16.mxu0 %v14390_v27  ;;  %v14410_v27 = vpack.c.bf16 %v13014_v8, %v13012_v59  ;;  %v12865_v51 = vld [vmem:[%s19012_s3 + $0xe78] sm:$0xff]  ;;  %v13032_v59 = vld [vmem:[%s19012_s3 + $0x13a8] sm:$0xff] }
 0x33b   : > { %v13034_v8 = vld [vmem:[%s19012_s3 + $0x13b8] sm:$0xff] }
 0x33c   : > { %14225 = vmatpush1.bf16.msra.mxu1 %v14224_v22  ;;  %v14244_v22 = vpack.c.bf16 %v12844_v46, %v12842_v16  ;;  %v12862_v16 = vld [vmem:[%s19012_s3 + $0xe60] sm:$0xff]  ;;  %v12864_v46 = vld [vmem:[%s19012_s3 + $0xe70] sm:$0xff] }
 0x33d   : > { %14393 = vmatpush1.bf16.msra.mxu0 %v14392_v25  ;;  %14227 = vmatprep.subr.bf16.mxu1 %v14226_v31  ;;  %v14412_v25 = vpack.c.bf16 %v13013_v4, %v13011_v23  ;;  %v14246_v31 = vpack.c.bf16 %v12849_v20, %v12847_v62  ;;  %v13031_v23 = vld [vmem:[%s19012_s3 + $0x13a0] sm:$0xff]  ;;  %v13033_v4 = vld [vmem:[%s19012_s3 + $0x13b0] sm:$0xff]  ;;  %v12867_v62 = vld [vmem:[%s19012_s3 + $0xe88] sm:$0xff] }
 0x33e   : > { %14395 = vmatprep.subr.bf16.mxu0 %v14394_v14  ;;  %v14414_v14 = vpack.c.bf16 %v13018_v2, %v13016_v12  ;;  %v12869_v20 = vld [vmem:[%s19012_s3 + $0xe98] sm:$0xff]  ;;  %v13036_v12 = vld [vmem:[%s19012_s3 + $0x13c8] sm:$0xff] }
 0x33f   : > { %v13038_v2 = vld [vmem:[%s19012_s3 + $0x13d8] sm:$0xff] }
 0x340   : > { %14229 = vmatpush1.bf16.msra.mxu1 %v14228_v24  ;;  %v14248_v24 = vpack.c.bf16 %v12848_v28, %v12846_v7  ;;  %v12866_v7 = vld [vmem:[%s19012_s3 + $0xe80] sm:$0xff]  ;;  %v12868_v28 = vld [vmem:[%s19012_s3 + $0xe90] sm:$0xff] }
 0x341   : > { %14397 = vmatpush1.bf16.msra.mxu0 %v14396_v45  ;;  %14231 = vmatprep.subr.bf16.mxu1 %v14230_v6  ;;  %v14416_v45 = vpack.c.bf16 %v13017_v36, %v13015_v29  ;;  %v14250_v6 = vpack.c.bf16 %v12853_v13, %v12851_v42  ;;  %v14434_v29 = vpack.c.bf16 %v13038_v2, %v13036_v12  ;;  %v13037_v36 = vld [vmem:[%s19012_s3 + $0x13d0] sm:$0xff]  ;;  %v12871_v42 = vld [vmem:[%s19012_s3 + $0xea8] sm:$0xff]  ;;  %v12873_v13 = vld [vmem:[%s19012_s3 + $0xeb8] sm:$0xff] }
 0x342   : > { %14399 = vmatprep.subr.bf16.mxu0 %v14398_v37  ;;  %v14418_v37 = vpack.c.bf16 %v13022_v33, %v13020_v30  ;;  %v14268_v30 = vpack.c.bf16 %v12868_v28, %v12866_v7  ;;  %v13040_v33 = vld [vmem:[%s19012_s3 + $0x13e8] sm:$0xff]  ;;  %v13055_v7 = vld [vmem:[%s19012_s3 + $0x1460] sm:$0xff] }
 0x344   : > { %14233 = vmatpush1.bf16.msra.mxu1 %v14232_v38  ;;  %v14252_v38 = vpack.c.bf16 %v12852_v10, %v12850_v47  ;;  %v12872_v47 = vld [vmem:[%s19012_s3 + $0xeb0] sm:$0xff]  ;;  %v13039_v10 = vld [vmem:[%s19012_s3 + $0x13e0] sm:$0xff] }
 0x345   : > { %14401 = vmatpush1.bf16.msra.mxu0 %v14400_v56  ;;  %14235 = vmatprep.subr.bf16.mxu1 %v14234_v41  ;;  %v14420_v56 = vpack.c.bf16 %v13021_v5, %v13019_v43  ;;  %v14254_v41 = vpack.c.bf16 %v12857_v50, %v12855_v35  ;;  %v14270_v43 = vpack.c.bf16 %v12873_v13, %v12871_v42  ;;  %v12875_v5 = vld [vmem:[%s19012_s3 + $0xec8] sm:$0xff]  ;;  %v12877_v35 = vld [vmem:[%s19012_s3 + $0xed8] sm:$0xff] }
 0x346   : > { %14403 = vmatprep.subr.bf16.mxu0 %v14402_v40  ;;  %v14422_v40 = vpack.c.bf16 %v13026_v48, %v13024_v60  ;;  %v13044_v60 = vld [vmem:[%s19012_s3 + $0x1408] sm:$0xff]  ;;  %v13046_v48 = vld [vmem:[%s19012_s3 + $0x1418] sm:$0xff] }
 0x347   : > { %v13060_v42 = vld [vmem:[%s19012_s3 + $0x1488] sm:$0xff]  ;;  %v13062_v13 = vld [vmem:[%s19012_s3 + $0x1498] sm:$0xff] }
 0x348   : > { %14237 = vmatpush1.bf16.msra.mxu1 %v14236_v39  ;;  %v14256_v39 = vpack.c.bf16 %v12856_v63, %v12854_v15  ;;  %v12874_v15 = vld [vmem:[%s19012_s3 + $0xec0] sm:$0xff]  ;;  %v12876_v63 = vld [vmem:[%s19012_s3 + $0xed0] sm:$0xff] }
 0x349   : > { %14405 = vmatpush1.bf16.msra.mxu0 %v14404_v17  ;;  %14239 = vmatprep.subr.bf16.mxu1 %v14238_v32  ;;  %v14424_v17 = vpack.c.bf16 %v13025_v3, %v13023_v57  ;;  %v14258_v32 = vpack.c.bf16 %v12861_v44, %v12859_v49  ;;  %v14442_v57 = vpack.c.bf16 %v13046_v48, %v13044_v60  ;;  %v12879_v3 = vld [vmem:[%s19012_s3 + $0xee8] sm:$0xff]  ;;  %v12881_v49 = vld [vmem:[%s19012_s3 + $0xef8] sm:$0xff] }
 0x34a   : > { %14407 = vmatprep.subr.bf16.mxu0 %v14406_v53  ;;  %v14426_v53 = vpack.c.bf16 %v13030_v34, %v13028_v54  ;;  %v13048_v44 = vld [vmem:[%s19012_s3 + $0x1428] sm:$0xff]  ;;  %v14276_v54 = vpack.c.bf16 %v12876_v63, %v12874_v15  ;;  %v13063_v15 = vld [vmem:[%s19012_s3 + $0x14a0] sm:$0xff] }
 0x34c   : > { %14241 = vmatpush1.bf16.msra.mxu1 %v14240_v11  ;;  %v14260_v11 = vpack.c.bf16 %v12860_v52, %v12858_v21  ;;  %v13047_v21 = vld [vmem:[%s19012_s3 + $0x1420] sm:$0xff] }
 0x34d   : > { %14409 = vmatpush1.bf16.msra.mxu0 %v14408_v61  ;;  %14243 = vmatprep.subr.bf16.mxu1 %v14242_v9  ;;  %v14428_v61 = vpack.c.bf16 %v13029_v19, %v13027_v55  ;;  %v14262_v9 = vpack.c.bf16 %v12865_v51, %v12863_v1  ;;  %v13049_v55 = vld [vmem:[%s19012_s3 + $0x1430] sm:$0xff]  ;;  %v12885_v19 = vld [vmem:[%s19012_s3 + $0xf18] sm:$0xff]  ;;  %v13052_v1 = vld [vmem:[%s19012_s3 + $0x1448] sm:$0xff] }
 0x34e   : > { %14411 = vmatprep.subr.bf16.mxu0 %v14410_v27  ;;  %v14430_v27 = vpack.c.bf16 %v13034_v8, %v13032_v59  ;;  %v13054_v51 = vld [vmem:[%s19012_s3 + $0x1458] sm:$0xff]  ;;  %v14448_v8 = vpack.c.bf16 %v13049_v55, %v13047_v21  ;;  %v13069_v21 = vld [vmem:[%s19012_s3 + $0x14d0] sm:$0xff] }
 0x34f   : > { %v12905_v55 = vld [vmem:[%s19012_s3 + $0xfb8] sm:$0xff] }
 0x350   : > { %14245 = vmatpush1.bf16.msra.mxu1 %v14244_v22  ;;  %v14264_v22 = vpack.c.bf16 %v12864_v46, %v12862_v16  ;;  %v13051_v16 = vld [vmem:[%s19012_s3 + $0x1440] sm:$0xff]  ;;  %v14450_v46 = vpack.c.bf16 %v13054_v51, %v13052_v1 }
 0x351   : > { %14413 = vmatpush1.bf16.msra.mxu0 %v14412_v25  ;;  %14247 = vmatprep.subr.bf16.mxu1 %v14246_v31  ;;  %v14432_v25 = vpack.c.bf16 %v13033_v4, %v13031_v23  ;;  %v14266_v31 = vpack.c.bf16 %v12869_v20, %v12867_v62  ;;  %v13053_v23 = vld [vmem:[%s19012_s3 + $0x1450] sm:$0xff]  ;;  %v12889_v4 = vld [vmem:[%s19012_s3 + $0xf38] sm:$0xff]  ;;  %v13056_v62 = vld [vmem:[%s19012_s3 + $0x1468] sm:$0xff] }
 0x352   : > { %14415 = vmatprep.subr.bf16.mxu0 %v14414_v14  ;;  %v13035_v14 = vld [vmem:[%s19012_s3 + $0x13c0] sm:$0xff]  ;;  %v13058_v20 = vld [vmem:[%s19012_s3 + $0x1478] sm:$0xff]  ;;  %v14452_v2 = vpack.c.bf16 %v13053_v23, %v13051_v16  ;;  %v13073_v16 = vld [vmem:[%s19012_s3 + $0x14f0] sm:$0xff] }
 0x353   : > { %v14454_v28 = vpack.c.bf16 %v13058_v20, %v13056_v62 }
 0x354   : > { %14249 = vmatpush1.bf16.msra.mxu1 %v14248_v24  ;;  %v13042_v24 = vld [vmem:[%s19012_s3 + $0x13f8] sm:$0xff] }
 0x355   : > { %14417 = vmatpush1.bf16.msra.mxu0 %v14416_v45  ;;  %14251 = vmatprep.subr.bf16.mxu1 %v14250_v6  ;;  %v14436_v45 = vpack.c.bf16 %v13037_v36, %v13035_v14  ;;  %v12870_v6 = vld [vmem:[%s19012_s3 + $0xea0] sm:$0xff]  ;;  %v14438_v50 = vpack.c.bf16 %v13042_v24, %v13040_v33  ;;  %v12891_v14 = vld [vmem:[%s19012_s3 + $0xf48] sm:$0xff]  ;;  %v12893_v36 = vld [vmem:[%s19012_s3 + $0xf58] sm:$0xff] }
 0x356   : > { %14419 = vmatprep.subr.bf16.mxu0 %v14418_v37  ;;  %v13041_v37 = vld [vmem:[%s19012_s3 + $0x13f0] sm:$0xff]  ;;  %v14290_v24 = vpack.c.bf16 %v12893_v36, %v12891_v14 }
 0x358   : > { %14253 = vmatpush1.bf16.msra.mxu1 %v14252_v38  ;;  %v14272_v38 = vpack.c.bf16 %v12872_v47, %v12870_v6  ;;  %v12892_v6 = vld [vmem:[%s19012_s3 + $0xf50] sm:$0xff]  ;;  %v13059_v47 = vld [vmem:[%s19012_s3 + $0x1480] sm:$0xff] }
 0x359   : > { %14421 = vmatpush1.bf16.msra.mxu0 %v14420_v56  ;;  %14255 = vmatprep.subr.bf16.mxu1 %v14254_v41  ;;  %v14440_v56 = vpack.c.bf16 %v13041_v37, %v13039_v10  ;;  %v14274_v41 = vpack.c.bf16 %v12877_v35, %v12875_v5  ;;  %v14458_v10 = vpack.c.bf16 %v13062_v13, %v13060_v42  ;;  %v12895_v37 = vld [vmem:[%s19012_s3 + $0xf68] sm:$0xff]  ;;  %v12897_v5 = vld [vmem:[%s19012_s3 + $0xf78] sm:$0xff] }
 0x35a   : > { %14423 = vmatprep.subr.bf16.mxu0 %v14422_v40  ;;  %v13045_v40 = vld [vmem:[%s19012_s3 + $0x1410] sm:$0xff]  ;;  %v13064_v35 = vld [vmem:[%s19012_s3 + $0x14a8] sm:$0xff] }
 0x35b   : > { %v10547_v42 = vld [vmem:[%s19014_s5 + $0x8] sm:$0xff] }
 0x35c   : > { %14257 = vmatpush1.bf16.msra.mxu1 %v14256_v39  ;;  %v14278_v39 = vpack.c.bf16 %v12881_v49, %v12879_v3  ;;  %v13068_v3 = vld [vmem:[%s19012_s3 + $0x14c8] sm:$0xff]  ;;  %v13070_v49 = vld [vmem:[%s19012_s3 + $0x14d8] sm:$0xff] }
 0x35d   : > { %14425 = vmatpush1.bf16.msra.mxu0 %v14424_v17  ;;  %14259 = vmatprep.subr.bf16.mxu1 %v14258_v32  ;;  %v12878_v17 = vld [vmem:[%s19012_s3 + $0xee0] sm:$0xff]  ;;  %v12880_v32 = vld [vmem:[%s19012_s3 + $0xef0] sm:$0xff] }
 0x35e   : > { %14427 = vmatprep.subr.bf16.mxu0 %v14426_v53  ;;  %v12883_v53 = vld [vmem:[%s19012_s3 + $0xf08] sm:$0xff]  ;;  %v14280_v59 = vpack.c.bf16 %v12880_v32, %v12878_v17  ;;  %v13067_v17 = vld [vmem:[%s19012_s3 + $0x14c0] sm:$0xff]  ;;  %v14466_v32 = vpack.c.bf16 %v13070_v49, %v13068_v3 }
 0x35f   : > { %v14468_v51 = vpack.c.bf16 %v13069_v21, %v13067_v17  ;;  %v13106_v3 = vld [vmem:[%s19013_s4 + $0x80] sm:$0xff]  ;;  %v10564_v21 = vld [vmem:[%s19015_s6 + $0x10] sm:$0xff] }
 0x360   : > { %14261 = vmatpush1.bf16.msra.mxu1 %v14260_v11  ;;  %v14282_v11 = vpack.c.bf16 %v12885_v19, %v12883_v53  ;;  %v13072_v53 = vld [vmem:[%s19012_s3 + $0x14e8] sm:$0xff]  ;;  %v13074_v19 = vld [vmem:[%s19012_s3 + $0x14f8] sm:$0xff] }
 0x361   : > { %14429 = vmatpush1.bf16.msra.mxu0 %v14428_v61  ;;  %14263 = vmatprep.subr.bf16.mxu1 %v14262_v9  ;;  %v12882_v61 = vld [vmem:[%s19012_s3 + $0xf00] sm:$0xff]  ;;  %v12884_v9 = vld [vmem:[%s19012_s3 + $0xf10] sm:$0xff] }
 0x362   : > { %14431 = vmatprep.subr.bf16.mxu0 %v14430_v27  ;;  %v12887_v27 = vld [vmem:[%s19012_s3 + $0xf28] sm:$0xff]  ;;  %v14284_v12 = vpack.c.bf16 %v12884_v9, %v12882_v61  ;;  %v14470_v61 = vpack.c.bf16 %v13074_v19, %v13072_v53  ;;  %v13071_v9 = vld [vmem:[%s19012_s3 + $0x14e0] sm:$0xff]  ;;  %v13111_v53 = vld [vmem:[%s19013_s4 + $0x98] sm:$0xff] }
 0x363   : > { %v14472_v23 = vpack.c.bf16 %v13073_v16, %v13071_v9  ;;  %v10566_v19 = vld [vmem:[%s19015_s6 + $0x20] sm:$0xff]  ;;  %v13115_v16 = vld [vmem:[%s19013_s4 + $0xa8] sm:$0xff] }
 0x364   : > { %14265 = vmatpush1.bf16.msra.mxu1 %v14264_v22  ;;  %v14286_v22 = vpack.c.bf16 %v12889_v4, %v12887_v27 }
 0x365   : > { %14433 = vmatpush1.bf16.msra.mxu0 %v14432_v25  ;;  %14267 = vmatprep.subr.bf16.mxu1 %v14266_v31  ;;  %v12886_v25 = vld [vmem:[%s19012_s3 + $0xf20] sm:$0xff]  ;;  %v12888_v31 = vld [vmem:[%s19012_s3 + $0xf30] sm:$0xff] }
 0x366   : > { %14435 = vmatprep.subr.bf16.mxu0 %v14434_v29  ;;  %v13057_v29 = vld [vmem:[%s19012_s3 + $0x1470] sm:$0xff] }
 0x367   : > { %7823 = vmatmul.mubr.f32.vlgmr.msra.gmra.mrb[4].mxu1 %v17140_v18  ;;  %v14456_v33 = vpack.c.bf16 %v13057_v29, %v13055_v7 }
 0x368   : > { %8207 = vmatmul.mubr.f32.vlgmr.msra.gmra.mrb[6].mxu0 %v17140_v18  ;;  %14269 = vmatpush1.bf16.msra.mxu1 %v14268_v30  ;;  %v13043_v18 = vld [vmem:[%s19012_s3 + $0x1400] sm:$0xff]  ;;  %v14288_v30 = vpack.c.bf16 %v12888_v31, %v12886_v25 }
 0x369   : > { %12906 = vmatprep.mubr.msk.f32.mxu1 %vm6917_vm1, %v17151_v26  ;;  %14437 = vmatpush1.bf16.msra.mxu0 %v14436_v45  ;;  %v14444_v34 = vpack.c.bf16 %v13045_v40, %v13043_v18  ;;  %v12890_v45 = vld [vmem:[%s19012_s3 + $0xf40] sm:$0xff]  ;;  %v13065_v18 = vld [vmem:[%s19012_s3 + $0x14b0] sm:$0xff]  ;;  %v12901_v40 = vld [vmem:[%s19012_s3 + $0xf98] sm:$0xff] }
 0x36a   : > { %13075 = vmatprep.mubr.msk.f32.mxu0 %vm6917_vm1, %v17151_v26  ;;  %14271 = vmatprep.subr.bf16.mxu1 %v14270_v43  ;;  %v13050_v26 = vld [vmem:[%s19012_s3 + $0x1438] sm:$0xff]  ;;  %v13061_v43 = vld [vmem:[%s19012_s3 + $0x1490] sm:$0xff]  ;;  %v14292_v60 = vpack.c.bf16 %v12892_v6, %v12890_v45  ;;  %v8287_v45 = vld [vmem:[%s19013_s4 + $0x8] sm:$0xff] }
 0x36b   : > { %14439 = vmatprep.subr.bf16.mxu0 %v14438_v50  ;;  %v14446_v52 = vpack.c.bf16 %v13050_v26, %v13048_v44  ;;  %v13066_v50 = vld [vmem:[%s19012_s3 + $0x14b8] sm:$0xff]  ;;  %v14460_v48 = vpack.c.bf16 %v13061_v43, %v13059_v47  ;;  %v14464_v26 = vpack.c.bf16 %v13065_v18, %v13063_v15  ;;  %v13082_v6 = vld [vmem:[%s19013_s4 + $0x20] sm:$0xff]  ;;  %v13086_v43 = vld [vmem:[%s19013_s4 + $0x30] sm:$0xff] }
 0x36c   : > { %14273 = vmatpush1.bf16.msra.mxu1 %v14272_v38  ;;  %v14294_v38 = vpack.c.bf16 %v12897_v5, %v12895_v37  ;;  %v14462_v63 = vpack.c.bf16 %v13066_v50, %v13064_v35  ;;  %v13087_v5 = vld [vmem:[%s19013_s4 + $0x38] sm:$0xff]  ;;  %v13090_v35 = vld [vmem:[%s19013_s4 + $0x40] sm:$0xff]  ;;  %v13102_v18 = vld [vmem:[%s19013_s4 + $0x70] sm:$0xff] }
 0x36d   : > { %14441 = vmatpush1.bf16.msra.mxu0 %v14440_v56  ;;  %14275 = vmatprep.subr.bf16.mxu1 %v14274_v41  ;;  %v12894_v56 = vld [vmem:[%s19012_s3 + $0xf60] sm:$0xff]  ;;  %v12896_v41 = vld [vmem:[%s19012_s3 + $0xf70] sm:$0xff] }
 0x36e   : > { %14443 = vmatprep.subr.bf16.mxu0 %v14442_v57  ;;  %v12899_v57 = vld [vmem:[%s19012_s3 + $0xf88] sm:$0xff]  ;;  %v14296_v44 = vpack.c.bf16 %v12896_v41, %v12894_v56  ;;  %v13095_v56 = vld [vmem:[%s19013_s4 + $0x58] sm:$0xff]  ;;  %v13098_v41 = vld [vmem:[%s19013_s4 + $0x60] sm:$0xff] }
 0x370   : > { %14277 = vmatpush1.bf16.msra.mxu1 %v14276_v54  ;;  %v14298_v54 = vpack.c.bf16 %v12901_v40, %v12899_v57  ;;  %v13103_v40 = vld [vmem:[%s19013_s4 + $0x78] sm:$0xff] }
 0x371   : > { %14445 = vmatpush1.bf16.msra.mxu0 %v14444_v34  ;;  %14279 = vmatprep.subr.bf16.mxu1 %v14278_v39  ;;  %v12898_v34 = vld [vmem:[%s19012_s3 + $0xf80] sm:$0xff]  ;;  %v12900_v39 = vld [vmem:[%s19012_s3 + $0xf90] sm:$0xff] }
 0x372   : > { %14447 = vmatprep.subr.bf16.mxu0 %v14446_v52  ;;  %v12903_v52 = vld [vmem:[%s19012_s3 + $0xfa8] sm:$0xff]  ;;  %v14300_v1 = vpack.c.bf16 %v12900_v39, %v12898_v34  ;;  %v10562_v34 = vld [vmem:[%s19015_s6] sm:$0xff] }
 0x373   : > { %v10563_v39 = vld [vmem:[%s19015_s6 + $0x8] sm:$0xff] }
 0x374   : > { %14281 = vmatpush1.bf16.msra.mxu1 %v14280_v59  ;;  %v14302_v59 = vpack.c.bf16 %v12905_v55, %v12903_v52  ;;  %v10565_v52 = vld [vmem:[%s19015_s6 + $0x18] sm:$0xff] }
 0x375   : > { %14449 = vmatpush1.bf16.msra.mxu0 %v14448_v8  ;;  %14283 = vmatprep.subr.bf16.mxu1 %v14282_v11  ;;  %v12902_v8 = vld [vmem:[%s19012_s3 + $0xfa0] sm:$0xff]  ;;  %v12904_v11 = vld [vmem:[%s19012_s3 + $0xfb0] sm:$0xff]  ;;  %v14478_v55 = vpack.c.bf16 %v10565_v52, %v10564_v21  ;;  %v13159_v52 = vld [vmem:[%s19013_s4 + $0x158] sm:$0xff] }
 0x376   : > { %14451 = vmatprep.subr.bf16.mxu0 %v14450_v46  ;;  %v14304_v46 = vpack.c.bf16 %v12904_v11, %v12902_v8  ;;  %v10568_v11 = vld [vmem:[%s19015_s6 + $0x30] sm:$0xff] }
 0x378   : > { %14285 = vmatpush1.bf16.msra.mxu1 %v14284_v12 }
 0x379   : > { %14453 = vmatpush1.bf16.msra.mxu0 %v14452_v2  ;;  %14287 = vmatprep.subr.bf16.mxu1 %v14286_v22  ;;  %v13076_v22 = vld [vmem:[%s19013_s4 + $0x10] sm:$0xff] }
 0x37a   : > { %14455 = vmatprep.subr.bf16.mxu0 %v14454_v28 }
 0x37c   : > { %14289 = vmatpush1.bf16.msra.mxu1 %v14288_v30  ;;  %v13077_v30 = vld [vmem:[%s19013_s4 + $0x18] sm:$0xff] }
 0x37d   : > { %14457 = vmatpush1.bf16.msra.mxu0 %v14456_v33  ;;  %14291 = vmatprep.subr.bf16.mxu1 %v14290_v24  ;;  %v8286_v33 = vld [vmem:[%s19013_s4] sm:$0xff] }
 0x37e   : > { %14459 = vmatprep.subr.bf16.mxu0 %v14458_v10  ;;  %v13083_v10 = vld [vmem:[%s19013_s4 + $0x28] sm:$0xff] }
 0x380   : > { %14293 = vmatpush1.bf16.msra.mxu1 %v14292_v60  ;;  %v13091_v60 = vld [vmem:[%s19013_s4 + $0x48] sm:$0xff] }
 0x381   : > { %14461 = vmatpush1.bf16.msra.mxu0 %v14460_v48  ;;  %14295 = vmatprep.subr.bf16.mxu1 %v14294_v38  ;;  %v13094_v48 = vld [vmem:[%s19013_s4 + $0x50] sm:$0xff] }
 0x382   : > { %14463 = vmatprep.subr.bf16.mxu0 %v14462_v63  ;;  %v13099_v63 = vld [vmem:[%s19013_s4 + $0x68] sm:$0xff] }
 0x384   : > { %14297 = vmatpush1.bf16.msra.mxu1 %v14296_v44  ;;  %v13107_v44 = vld [vmem:[%s19013_s4 + $0x88] sm:$0xff] }
 0x385   : > { %14465 = vmatpush1.bf16.msra.mxu0 %v14464_v26  ;;  %14299 = vmatprep.subr.bf16.mxu1 %v14298_v54  ;;  %v13110_v26 = vld [vmem:[%s19013_s4 + $0x90] sm:$0xff]  ;;  %v10546_v54 = vld [vmem:[%s19014_s5] sm:$0xff] }
 0x386   : > { %14467 = vmatprep.subr.bf16.mxu0 %v14466_v32  ;;  %v14474_v32 = vpack.c.bf16 %v10563_v39, %v10562_v34  ;;  %v13155_v34 = vld [vmem:[%s19013_s4 + $0x148] sm:$0xff] }
 0x388   : > { %14301 = vmatpush1.bf16.msra.mxu1 %v14300_v1  ;;  %v10567_v1 = vld [vmem:[%s19015_s6 + $0x28] sm:$0xff] }
 0x389   : > { %14469 = vmatpush1.bf16.msra.mxu0 %v14468_v51  ;;  %14303 = vmatprep.subr.bf16.mxu1 %v14302_v59  ;;  %v13114_v51 = vld [vmem:[%s19013_s4 + $0xa0] sm:$0xff]  ;;  %v14482_v59 = vpack.c.bf16 %v10567_v1, %v10566_v19 }
 0x38a   : > { %14471 = vmatprep.subr.bf16.mxu0 %v14470_v61  ;;  %v10569_v61 = vld [vmem:[%s19015_s6 + $0x38] sm:$0xff]  ;;  %v13162_v19 = vld [vmem:[%s19013_s4 + $0x160] sm:$0xff] }
 0x38b   : > { %v14486_v9 = vpack.c.bf16 %v10569_v61, %v10568_v11  ;;  %v13166_v11 = vld [vmem:[%s19013_s4 + $0x170] sm:$0xff] }
 0x38c   : > { %14305 = vmatpush1.bf16.msra.mxu1 %v14304_v46  ;;  %v10570_v46 = vld [vmem:[%s19015_s6 + $0x40] sm:$0xff] }
 0x38d   : > { %14473 = vmatpush1.bf16.msra.mxu0 %v14472_v23  ;;  %v10571_v23 = vld [vmem:[%s19015_s6 + $0x48] sm:$0xff] }
 0x38e   : > { %14475 = vmatprep.subr.bf16.mxu0 %v14474_v32 }
 0x38f   : > { %7894 = vmatmul.mubr.f32.vlgmr.msra.gmra.mrb[4].mxu1 %v17392_v58 }
 0x390   : > { %8278 = vmatmul.mubr.f32.vlgmr.msra.gmra.mrb[6].mxu0 %v17392_v58  ;;  %13452 = vmatprep.mubr.msk.f32.mxu1 %vm8295_vm2, %v13076_v22  ;;  %v13123_v22 = vld [vmem:[%s19013_s4 + $0xc8] sm:$0xff] }
 0x391   : > { %14477 = vmatpush3.bf16.msra.mxu0 %v14474_v32  ;;  %v13158_v32 = vld [vmem:[%s19013_s4 + $0x150] sm:$0xff] }
 0x392   : > { %14479 = vmatprep.subr.bf16.mxu0 %v14478_v55 }
 0x395   : > { %14481 = vmatpush3.bf16.msra.mxu0 %v14478_v55 }
 0x396   : > { %14483 = vmatprep.subr.bf16.mxu0 %v14482_v59 }
 0x399   : > { %14485 = vmatpush3.bf16.msra.mxu0 %v14482_v59 }
 0x39a   : > { %14487 = vmatprep.subr.bf16.mxu0 %v14486_v9 }
 0x39d   : > { %14489 = vmatpush3.bf16.msra.mxu0 %v14486_v9  ;;  %v13176_v9 = vld [vmem:[%s19015_s6 + $0x60] sm:$0xff] }
 0x3ba   : > { %v7129_v27 = vpop.f32.mrb[2].mxu1 }
 0x3bb   : > { %v7511_v4 = vpop.f32.mrb[4].mxu0  ;;  %v7131_v62 = vpop.f32.mrb[3].mxu1 }
 0x3bc   : > { %v7516_v20 = vmax.f32 %v7129_v27, %v7511_v4  ;;  %v7513_v12 = vpop.f32.mrb[5].mxu0  ;;  %v13118_v27 = vld [vmem:[%s19013_s4 + $0xb0] sm:$0xff]  ;;  %v14490_v4 = vpack.c.bf16 %v10571_v23, %v10570_v46  ;;  %v13167_v46 = vld [vmem:[%s19013_s4 + $0x178] sm:$0xff]  ;;  %v13170_v23 = vld [vmem:[%s19013_s4 + $0x180] sm:$0xff] }
 0x3bd   : > { %v7517_v2 = vmax.f32 %v7131_v62, %v7513_v12  ;;  %v13122_v12 = vld [vmem:[%s19013_s4 + $0xc0] sm:$0xff] }
 0x3be   : > { %14491 = vmatprep.subr.bf16.mxu0 %v14490_v4 }
 0x3bf   : > { %14493 = vmatpush3.bf16.msra.mxu0 %v14490_v4  ;;  %v13178_v4 = vld [vmem:[%s19015_s6 + $0x70] sm:$0xff] }
 0x462   : > { %v7895_v25 = vpop.f32.mrb[4].mxu1 }
 0x463   : > { %v7900_v31 = vmax.f32 %v7516_v20, %v7895_v25  ;;  %v8279_v7 = vpop.f32.mrb[6].mxu0  ;;  %v7897_v28 = vpop.f32.mrb[5].mxu1  ;;  %v13119_v20 = vld [vmem:[%s19013_s4 + $0xb8] sm:$0xff]  ;;  %v13126_v25 = vld [vmem:[%s19013_s4 + $0xd0] sm:$0xff] }
 0x464   : > { %v7901_v29 = vmax.f32 %v7517_v2, %v7897_v28  ;;  %v8281_v14 = vpop.f32.mrb[7].mxu0 }
 0x465   : > { %v18386_v58 = vmax.f32 %v7900_v31, %v8279_v7  ;;  %v13127_v7 = vld [vmem:[%s19013_s4 + $0xd8] sm:$0xff] }
 0x466   : > { %v8285_v36 = vmax.f32 %v7901_v29, %v8281_v14  ;;  %v13130_v14 = vld [vmem:[%s19013_s4 + $0xe0] sm:$0xff] }
 0x467   : > { %8461 = vrot.lane.b32.xlu1 %v18386_v58, %s19040_s13  ;;  %8292 = vrot.lane.b32.xlu0 %v18386_v58, %s19041_s12  ;;  %s19044_s13 = smov 100   ;;  %s15024_s12 = smov 101  }
 0x46b   : > { %8639 = vrot.lane.b32.xlu1 %v18386_v58, %s19042_s30  ;;  %8550 = vrot.lane.b32.xlu0 %v18386_v58, %s19043_s22  ;;  %s15025_s30 = smov 92   ;;  %s15026_s22 = smov 91  }
 0x46f   : > { %8817 = vrot.lane.b32.xlu1 %v18386_v58, %s15016_s14  ;;  %8728 = vrot.lane.b32.xlu0 %v18386_v58, %s15017_s29  ;;  %s15027_s14 = smov 90   ;;  %s15028_s29 = smov 89  }
 0x473   : > { %8995 = vrot.lane.b32.xlu1 %v18386_v58, %s15018_s16  ;;  %8906 = vrot.lane.b32.xlu0 %v18386_v58, %s15019_s15  ;;  %s15029_s16 = smov 88   ;;  %s15030_s15 = smov 80  }
 0x477   : > { %9173 = vrot.lane.b32.xlu1 %v18386_v58, %s15020_s25  ;;  %9084 = vrot.lane.b32.xlu0 %v18386_v58, %s15021_s24  ;;  %s15031_s25 = smov 79   ;;  %s15032_s24 = smov 78  }
 0x47b   : > { %9351 = vrot.lane.b32.xlu1 %v18386_v58, %s15022_s0  ;;  %9262 = vrot.lane.b32.xlu0 %v18386_v58, %s15023_s1  ;;  %s15033_s0 = smov 77   ;;  %s15034_s1 = smov 76  }
 0x47f   : > { %9529 = vrot.lane.b32.xlu1 %v18386_v58, %s19044_s13  ;;  %9440 = vrot.lane.b32.xlu0 %v18386_v58, %s15024_s12 }
 0x483   : > { %9619 = vrot.lane.b32.xlu0 %v18386_v58, %s15025_s30  ;;  %9621 = vrot.lane.b32.xlu1 %v8285_v36, %s15025_s30 }
 0x487   : > { %9712 = vrot.lane.b32.xlu0 %v18386_v58, %s15026_s22  ;;  %9714 = vrot.lane.b32.xlu1 %v8285_v36, %s15026_s22 }
 0x48b   : > { %9805 = vrot.lane.b32.xlu0 %v18386_v58, %s15027_s14  ;;  %9807 = vrot.lane.b32.xlu1 %v8285_v36, %s15027_s14 }
 0x48f   : > { %9898 = vrot.lane.b32.xlu0 %v18386_v58, %s15028_s29  ;;  %9900 = vrot.lane.b32.xlu1 %v8285_v36, %s15028_s29 }
 0x493   : > { %9991 = vrot.lane.b32.xlu0 %v18386_v58, %s15029_s16  ;;  %9993 = vrot.lane.b32.xlu1 %v8285_v36, %s15029_s16  ;;  %s377_s16 = sand.u32 1, %s14980_s18  }
 0x494   : > { %s12247_s12 = scalar_lea.sflag [#allocation3], %s377_s16 }
 0x497   : > { %10084 = vrot.lane.b32.xlu0 %v18386_v58, %s15030_s15  ;;  %10086 = vrot.lane.b32.xlu1 %v8285_v36, %s15030_s15  ;;  %s13265_s15 = sshll.u32 %s15119_s21, 4  ;;  %s15037_s21 = smov [#allocation2]  }
 0x498   : > { %s18966_s13 = scalar_lea.hbm %s19020_s11, %s13265_s15  ;;  %s14930_s22 = sshll.u32 %s15037_s21, 4  ;;  %s14931_s22 = int_to_ptr.vmem [resolvable:$false] %s14930_s22 }
 0x499   : > { %s14932_s14 = scalar_lea.vmem %s14931_s22, 32 }
 0x49b   : > { %10177 = vrot.lane.b32.xlu0 %v18386_v58, %s15031_s25  ;;  %10179 = vrot.lane.b32.xlu1 %v8285_v36, %s15031_s25  ;;  %s378_s25 = scalar_lea.vmem [#allocation2], %s377_s16 }
 0x49f   : > { %10270 = vrot.lane.b32.xlu0 %v18386_v58, %s15032_s24  ;;  %10272 = vrot.lane.b32.xlu1 %v8285_v36, %s15032_s24  ;;  %s12259_s24 = sshll.u32 %s378_s25, 4  ;;  %s18968_s24 = int_to_ptr.vmem [resolvable:$true] %s12259_s24 }
 0x4a0   : > { %s14926_s30 = scalar_lea.vmem %s18968_s24, 16  ;;  %p14933_p0 = scmp.lt.s32.totalorder %s18968_s24, %s14931_s22 }
 0x4a1   : > { %p14927_p11 = scmp.ne.s32.totalorder %s18968_s24, %s14926_s30  ;;  %p14934_p1 = scmp.lt.s32.totalorder %s14932_s14, %s14926_s30 }
 0x4a3   : > { %10363 = vrot.lane.b32.xlu0 %v18386_v58, %s15033_s0  ;;  %10365 = vrot.lane.b32.xlu1 %v8285_v36, %s15033_s0  ;;  %p14928_p12 = pnand %p14927_p11, %p15136_p5  ;;  %p14935_p2 = por %p14934_p1, %p14933_p0 }
 0x4a5   : > { %p14929_p13 = pneg %p14928_p12 }
 0x4a7   : > { %10456 = vrot.lane.b32.xlu0 %v18386_v58, %s15034_s1  ;;  %10458 = vrot.lane.b32.xlu1 %v8285_v36, %s15034_s1  ;;  %v13131_v36 = vld [vmem:[%s19013_s4 + $0xe8] sm:$0xff]  ;;  %p14936_p3 = pnand %p14935_p2, %p14929_p13 }
 0x4ab   : > { %10555 = vperm.xlu1 %14916, %v10547_v42   ;;  %10550 = vperm.xlu0 %14917, %v10546_v54  }
 0x4d9   : > { %v8293_v13 = vpop.permute.xlu0 %8292  ;;  %v8462_v24 = vpop.permute.xlu1 %8461 }
 0x4da   : > { %13450 = vmatprep.subr.mxu1 %v8293_v13 }
 0x4db   : > { %13451 = vmatpush3.msra.mxu1 %v8293_v13 }
 0x4dc   : > { %13453 = vmatmul.mubr.msk.f32.vlgmr.msra.gmra.mrb[6].mxu1 %vm8295_vm2, %v13077_v30  ;;  %13455 = vmatprep.subr.mxu1 %v18386_v58  ;;  %v13134_v30 = vld [vmem:[%s19013_s4 + $0xf0] sm:$0xff] }
 0x4dd   : > { %13456 = vmatpush3.msra.mxu1 %v18386_v58  ;;  %13457 = vmatprep.mubr.msk.f32.mxu1 %vm8295_vm2, %v8286_v33  ;;  %v8551_v47 = vpop.permute.xlu0 %8550  ;;  %v8640_v37 = vpop.permute.xlu1 %8639 }
 0x4de   : > { %13460 = vmatprep.subr.mxu1 %v8462_v24 }
 0x4e1   : > { %v8729_v50 = vpop.permute.xlu0 %8728  ;;  %v8818_v38 = vpop.permute.xlu1 %8817 }
 0x4e4   : > { %13458 = vmatmul.mubr.msk.f32.vlgmr.msra.gmra.mrb[6].mxu1 %vm8295_vm2, %v8287_v45 }
 0x4e5   : > { %13461 = vmatpush3.msra.mxu1 %v8462_v24  ;;  %13462 = vmatprep.mubr.msk.f32.mxu1 %vm8295_vm2, %v13082_v6  ;;  %v8907_v15 = vpop.permute.xlu0 %8906  ;;  %v8996_v57 = vpop.permute.xlu1 %8995  ;;  %v13135_v24 = vld [vmem:[%s19013_s4 + $0xf8] sm:$0xff] }
 0x4e6   : > { %13465 = vmatprep.subr.mxu1 %v8551_v47 }
 0x4e9   : > { %v9085_v49 = vpop.permute.xlu0 %9084  ;;  %v9174_v17 = vpop.permute.xlu1 %9173 }
 0x4ec   : > { %13463 = vmatmul.mubr.msk.f32.vlgmr.msra.gmra.mrb[6].mxu1 %vm8295_vm2, %v13083_v10 }
 0x4ed   : > { %13466 = vmatpush3.msra.mxu1 %v8551_v47  ;;  %13467 = vmatprep.mubr.msk.f32.mxu1 %vm8295_vm2, %v13086_v43  ;;  %v9263_v8 = vpop.permute.xlu0 %9262  ;;  %v9352_v62 = vpop.permute.xlu1 %9351  ;;  %v13138_v47 = vld [vmem:[%s19013_s4 + $0x100] sm:$0xff]  ;;  %v13139_v43 = vld [vmem:[%s19013_s4 + $0x108] sm:$0xff] }
 0x4ee   : > { %13470 = vmatprep.subr.mxu1 %v8640_v37 }
 0x4f1   : > { %v9441_v2 = vpop.permute.xlu0 %9440  ;;  %v9530_v31 = vpop.permute.xlu1 %9529 }
 0x4f4   : > { %13468 = vmatmul.mubr.msk.f32.vlgmr.msra.gmra.mrb[6].mxu1 %vm8295_vm2, %v13087_v5 }
 0x4f5   : > { %13471 = vmatpush3.msra.mxu1 %v8640_v37  ;;  %13472 = vmatprep.mubr.msk.f32.mxu1 %vm8295_vm2, %v13090_v35  ;;  %v9620_v28 = vpop.permute.xlu0 %9619  ;;  %v9622_v29 = vpop.permute.xlu1 %9621  ;;  %v13142_v35 = vld [vmem:[%s19013_s4 + $0x110] sm:$0xff] }
 0x4f6   : > { %13475 = vmatprep.subr.mxu1 %v8729_v50  ;;  %v9624_v58 = vsel %vm9623_vm13, %v9620_v28, %v9622_v29  ;;  %v13184_v29 = vld [vmem:[%s19015_s6 + $0xa0] sm:$0xff] }
 0x4f9   : > { %v9713_v42 = vpop.permute.xlu0 %9712  ;;  %v9715_v13 = vpop.permute.xlu1 %9714 }
 0x4fa   : > { %v9717_v33 = vsel %vm9716_vm14, %v9713_v42, %v9715_v13  ;;  %v10573_v42 = vld [vmem:[%s19015_s6 + $0x58] sm:$0xff]  ;;  %v13186_v13 = vld [vmem:[%s19015_s6 + $0xb0] sm:$0xff] }
 0x4fc   : > { %13473 = vmatmul.mubr.msk.f32.vlgmr.msra.gmra.mrb[6].mxu1 %vm8295_vm2, %v13091_v60  ;;  %v13143_v60 = vld [vmem:[%s19013_s4 + $0x118] sm:$0xff] }
 0x4fd   : > { %13476 = vmatpush3.msra.mxu1 %v8729_v50  ;;  %13477 = vmatprep.mubr.msk.f32.mxu1 %vm8295_vm2, %v13094_v48  ;;  %v9806_v45 = vpop.permute.xlu0 %9805  ;;  %v9808_v6 = vpop.permute.xlu1 %9807 }
 0x4fe   : > { %13480 = vmatprep.subr.mxu1 %v8818_v38  ;;  %v9810_v10 = vsel %vm9809_vm15, %v9806_v45, %v9808_v6  ;;  %v13190_v45 = vld [vmem:[%s19015_s6 + $0xc0] sm:$0xff]  ;;  %v13191_v6 = vld [vmem:[%s19015_s6 + $0xc8] sm:$0xff] }
 0x501   : > { %v9899_v37 = vpop.permute.xlu0 %9898  ;;  %v9901_v5 = vpop.permute.xlu1 %9900 }
 0x502   : > { %v9903_v50 = vsel %vm9902_vm0, %v9899_v37, %v9901_v5 }
 0x504   : > { %13478 = vmatmul.mubr.msk.f32.vlgmr.msra.gmra.mrb[6].mxu1 %vm8295_vm2, %v13095_v56  ;;  %v13146_v56 = vld [vmem:[%s19013_s4 + $0x120] sm:$0xff] }
 0x505   : > { %13481 = vmatpush3.msra.mxu1 %v8818_v38  ;;  %13482 = vmatprep.mubr.msk.f32.mxu1 %vm8295_vm2, %v13098_v41  ;;  %v9992_v48 = vpop.permute.xlu0 %9991  ;;  %v9994_v38 = vpop.permute.xlu1 %9993 }
 0x506   : > { %13485 = vmatprep.subr.mxu1 %v8907_v15  ;;  %v9996_v41 = vsel %vm9995_vm3, %v9992_v48, %v9994_v38 }
 0x50c   : > { %13483 = vmatmul.mubr.msk.f32.vlgmr.msra.gmra.mrb[6].mxu1 %vm8295_vm2, %v13099_v63  ;;  %v10085_v63 = vpop.permute.xlu0 %10084 }
 0x50d   : > { %13486 = vmatpush3.msra.mxu1 %v8907_v15  ;;  %13487 = vmatprep.mubr.msk.f32.mxu1 %vm8295_vm2, %v13102_v18  ;;  %v13147_v15 = vld [vmem:[%s19013_s4 + $0x128] sm:$0xff]  ;;  %v10087_v18 = vpop.permute.xlu1 %10086 }
 0x50e   : > { %13490 = vmatprep.subr.mxu1 %v8996_v57 }
 0x514   : > { %13488 = vmatmul.mubr.msk.f32.vlgmr.msra.gmra.mrb[6].mxu1 %vm8295_vm2, %v13103_v40  ;;  %v10089_v40 = vsel %vm10088_vm4, %v10085_v63, %v10087_v18  ;;  %v13207_v63 = vld [vmem:[%s19015_s6 + $0x138] sm:$0xff] }
 0x515   : > { %13491 = vmatpush3.msra.mxu1 %v8996_v57  ;;  %13492 = vmatprep.mubr.msk.f32.mxu1 %vm8295_vm2, %v13106_v3  ;;  %v13150_v57 = vld [vmem:[%s19013_s4 + $0x130] sm:$0xff]  ;;  %v13151_v3 = vld [vmem:[%s19013_s4 + $0x138] sm:$0xff] }
 0x516   : > { %13495 = vmatprep.subr.mxu1 %v9085_v49 }
 0x51c   : > { %13493 = vmatmul.mubr.msk.f32.vlgmr.msra.gmra.mrb[6].mxu1 %vm8295_vm2, %v13107_v44  ;;  %v10180_v44 = vpop.permute.xlu1 %10179 }
 0x51d   : > { %13496 = vmatpush3.msra.mxu1 %v9085_v49  ;;  %13497 = vmatprep.mubr.msk.f32.mxu1 %vm8295_vm2, %v13110_v26  ;;  %v10178_v49 = vpop.permute.xlu0 %10177  ;;  %v13154_v26 = vld [vmem:[%s19013_s4 + $0x140] sm:$0xff] }
 0x51e   : > { %13500 = vmatprep.subr.mxu1 %v9174_v17  ;;  %v10182_v54 = vsel %vm10181_vm5, %v10178_v49, %v10180_v44  ;;  %v13195_v44 = vld [vmem:[%s19015_s6 + $0xe8] sm:$0xff] }
 0x521   : > { %v10271_v39 = vpop.permute.xlu0 %10270 }
 0x524   : > { %13498 = vmatmul.mubr.msk.f32.vlgmr.msra.gmra.mrb[6].mxu1 %vm8295_vm2, %v13111_v53 }
 0x525   : > { %13501 = vmatpush3.msra.mxu1 %v9174_v17  ;;  %13502 = vmatprep.mubr.msk.f32.mxu1 %vm8295_vm2, %v13114_v51  ;;  %v10273_v17 = vpop.permute.xlu1 %10272  ;;  %v10364_v55 = vpop.permute.xlu0 %10363  ;;  %v13163_v51 = vld [vmem:[%s19013_s4 + $0x168] sm:$0xff] }
 0x526   : > { %13505 = vmatprep.subr.mxu1 %v9263_v8  ;;  %v10275_v21 = vsel %vm10274_vm6, %v10271_v39, %v10273_v17  ;;  %v13196_v17 = vld [vmem:[%s19015_s6 + $0xf0] sm:$0xff] }
 0x529   : > { %v10366_v53 = vpop.permute.xlu1 %10365  ;;  %v10457_v59 = vpop.permute.xlu0 %10456 }
 0x52a   : > { %v10368_v1 = vsel %vm10367_vm8, %v10364_v55, %v10366_v53 }
 0x52c   : > { %13503 = vmatmul.mubr.msk.f32.vlgmr.msra.gmra.mrb[6].mxu1 %vm8295_vm2, %v13115_v16  ;;  %v13177_v16 = vld [vmem:[%s19015_s6 + $0x68] sm:$0xff] }
 0x52d   : > { %13506 = vmatpush3.msra.mxu1 %v9263_v8  ;;  %13507 = vmatprep.mubr.msk.f32.mxu1 %vm8295_vm2, %v13118_v27  ;;  %v10459_v8 = vpop.permute.xlu1 %10458  ;;  %v14498_v27 = vpack.c.bf16 %v13177_v16, %v13176_v9  ;;  %v10551_v5 = vpop.permute.xlu0 %10550  ;;  %v13201_v9 = vld [vmem:[%s19015_s6 + $0x118] sm:$0xff]  ;;  %v13214_v16 = vld [vmem:[%s19015_s6 + $0x170] sm:$0xff] }
 0x52e   : > { %13510 = vmatprep.subr.mxu1 %v9352_v62  ;;  %v10461_v61 = vsel %vm10460_vm9, %v10457_v59, %v10459_v8  ;;  %v13213_v59 = vld [vmem:[%s19015_s6 + $0x168] sm:$0xff] }
 0x534   : > { %13508 = vmatmul.mubr.msk.f32.vlgmr.msra.gmra.mrb[6].mxu1 %vm8295_vm2, %v13119_v20  ;;  %v13171_v20 = vld [vmem:[%s19013_s4 + $0x188] sm:$0xff] }
 0x535   : > { %13511 = vmatpush3.msra.mxu1 %v9352_v62  ;;  %13512 = vmatprep.mubr.msk.f32.mxu1 %vm8295_vm2, %v13122_v12  ;;  %v13179_v62 = vld [vmem:[%s19015_s6 + $0x78] sm:$0xff] }
 0x536   : > { %13515 = vmatprep.subr.mxu1 %v9441_v2  ;;  %v14502_v12 = vpack.c.bf16 %v13179_v62, %v13178_v4  ;;  %v10925_v4 = vld [vmem:[%s19016_s7] sm:$0xff]  ;;  %v10926_v62 = vld [vmem:[%s19016_s7 + $0x8] sm:$0xff] }
 0x53c   : > { %13513 = vmatmul.mubr.msk.f32.vlgmr.msra.gmra.mrb[6].mxu1 %vm8295_vm2, %v13123_v22  ;;  %v13181_v22 = vld [vmem:[%s19015_s6 + $0x88] sm:$0xff] }
 0x53d   : > { %13516 = vmatpush3.msra.mxu1 %v9441_v2  ;;  %13517 = vmatprep.mubr.msk.f32.mxu1 %vm8295_vm2, %v13126_v25  ;;  %v13180_v2 = vld [vmem:[%s19015_s6 + $0x80] sm:$0xff] }
 0x53e   : > { %13520 = vmatprep.subr.mxu1 %v9530_v31  ;;  %v14506_v25 = vpack.c.bf16 %v13181_v22, %v13180_v2  ;;  %v13218_v2 = vld [vmem:[%s19016_s7 + $0x10] sm:$0xff]  ;;  %v13219_v22 = vld [vmem:[%s19016_s7 + $0x18] sm:$0xff] }
 0x544   : > { %13518 = vmatmul.mubr.msk.f32.vlgmr.msra.gmra.mrb[6].mxu1 %vm8295_vm2, %v13127_v7  ;;  %v13183_v7 = vld [vmem:[%s19015_s6 + $0x98] sm:$0xff] }
 0x545   : > { %13521 = vmatpush3.msra.mxu1 %v9530_v31  ;;  %13522 = vmatprep.mubr.msk.f32.mxu1 %vm8295_vm2, %v13130_v14  ;;  %v13182_v31 = vld [vmem:[%s19015_s6 + $0x90] sm:$0xff]  ;;  %v13185_v14 = vld [vmem:[%s19015_s6 + $0xa8] sm:$0xff] }
 0x546   : > { %13525 = vmatprep.subr.mxu1 %v9624_v58  ;;  %v14510_v28 = vpack.c.bf16 %v13183_v7, %v13182_v31 }
 0x54c   : > { %13523 = vmatmul.mubr.msk.f32.vlgmr.msra.gmra.mrb[6].mxu1 %vm8295_vm2, %v13131_v36  ;;  %v10572_v36 = vld [vmem:[%s19015_s6 + $0x50] sm:$0xff] }
 0x54d   : > { %13526 = vmatpush3.msra.mxu1 %v9624_v58  ;;  %13527 = vmatprep.mubr.msk.f32.mxu1 %vm8295_vm2, %v13134_v30  ;;  %v14514_v58 = vpack.c.bf16 %v13185_v14, %v13184_v29  ;;  %v14494_v30 = vpack.c.bf16 %v10573_v42, %v10572_v36 }
 0x54e   : > { %13530 = vmatprep.subr.mxu1 %v9717_v33 }
 0x54f   : > { %14495 = vmatprep.subr.bf16.mxu0 %v14494_v30 }
 0x550   : > { %14497 = vmatpush3.bf16.msra.mxu0 %v14494_v30  ;;  %v13226_v30 = vld [vmem:[%s19016_s7 + $0x38] sm:$0xff] }
 0x554   : > { %13528 = vmatmul.mubr.msk.f32.vlgmr.msra.gmra.mrb[6].mxu1 %vm8295_vm2, %v13135_v24 }
 0x555   : > { %13531 = vmatpush3.msra.mxu1 %v9717_v33  ;;  %13532 = vmatprep.mubr.msk.f32.mxu1 %vm8295_vm2, %v13138_v47  ;;  %v13187_v33 = vld [vmem:[%s19015_s6 + $0xb8] sm:$0xff]  ;;  %v13204_v47 = vld [vmem:[%s19015_s6 + $0x120] sm:$0xff] }
 0x556   : > { %13535 = vmatprep.subr.mxu1 %v9810_v10  ;;  %v14518_v24 = vpack.c.bf16 %v13187_v33, %v13186_v13  ;;  %v13225_v13 = vld [vmem:[%s19016_s7 + $0x30] sm:$0xff] }
 0x55c   : > { %13533 = vmatmul.mubr.msk.f32.vlgmr.msra.gmra.mrb[6].mxu1 %vm8295_vm2, %v13139_v43  ;;  %v13205_v43 = vld [vmem:[%s19015_s6 + $0x128] sm:$0xff] }
 0x55d   : > { %13536 = vmatpush3.msra.mxu1 %v9810_v10  ;;  %13537 = vmatprep.mubr.msk.f32.mxu1 %vm8295_vm2, %v13142_v35  ;;  %v14522_v10 = vpack.c.bf16 %v13191_v6, %v13190_v45  ;;  %v14546_v37 = vpack.c.bf16 %v13205_v43, %v13204_v47  ;;  %v10556_v35 = vpop.permute.xlu1 %10555  ;;  %v13222_v47 = vld [vmem:[%s19016_s7 + $0x20] sm:$0xff] }
 0x55e   : > { %13540 = vmatprep.subr.mxu1 %v9903_v50 }
 0x55f   : > { %14523 = vmatprep.subr.bf16.mxu0 %v14522_v10 }
 0x564   : > { %13538 = vmatmul.mubr.msk.f32.vlgmr.msra.gmra.mrb[6].mxu1 %vm8295_vm2, %v13143_v60 }
 0x565   : > { %13541 = vmatpush3.msra.mxu1 %v9903_v50  ;;  %13542 = vmatprep.mubr.msk.f32.mxu1 %vm8295_vm2, %v13146_v56  ;;  %v13192_v56 = vld [vmem:[%s19015_s6 + $0xd0] sm:$0xff] }
 0x566   : > { %13545 = vmatprep.subr.mxu1 %v9996_v41 }
 0x56c   : > { %13543 = vmatmul.mubr.msk.f32.vlgmr.msra.gmra.mrb[6].mxu1 %vm8295_vm2, %v13147_v15  ;;  %v13206_v15 = vld [vmem:[%s19015_s6 + $0x130] sm:$0xff] }
 0x56d   : > { %13546 = vmatpush3.msra.mxu1 %v9996_v41  ;;  %13547 = vmatprep.mubr.msk.f32.mxu1 %vm8295_vm2, %v13150_v57  ;;  %v13193_v41 = vld [vmem:[%s19015_s6 + $0xd8] sm:$0xff]  ;;  %v14550_v49 = vpack.c.bf16 %v13207_v63, %v13206_v15  ;;  %v13237_v63 = vld [vmem:[%s19016_s7 + $0x70] sm:$0xff] }
 0x56e   : > { %13550 = vmatprep.subr.mxu1 %v10089_v40 }
 0x574   : > { %13548 = vmatmul.mubr.msk.f32.vlgmr.msra.gmra.mrb[6].mxu1 %vm8295_vm2, %v13151_v3  ;;  %v14526_v3 = vpack.c.bf16 %v13193_v41, %v13192_v56  ;;  %v13229_v56 = vld [vmem:[%s19016_s7 + $0x48] sm:$0xff] }
 0x575   : > { %13551 = vmatpush3.msra.mxu1 %v10089_v40  ;;  %13552 = vmatprep.mubr.msk.f32.mxu1 %vm8295_vm2, %v13154_v26  ;;  %v13194_v40 = vld [vmem:[%s19015_s6 + $0xe0] sm:$0xff] }
 0x576   : > { %13555 = vmatprep.subr.mxu1 %v10182_v54  ;;  %v13208_v26 = vld [vmem:[%s19015_s6 + $0x140] sm:$0xff] }
 0x57c   : > { %13553 = vmatmul.mubr.msk.f32.vlgmr.msra.gmra.mrb[6].mxu1 %vm8295_vm2, %v13155_v34  ;;  %v14530_v34 = vpack.c.bf16 %v13195_v44, %v13194_v40 }
 0x57d   : > { %13556 = vmatpush3.msra.mxu1 %v10182_v54  ;;  %13557 = vmatprep.mubr.msk.f32.mxu1 %vm8295_vm2, %v13158_v32  ;;  %v13209_v54 = vld [vmem:[%s19015_s6 + $0x148] sm:$0xff]  ;;  %v13197_v32 = vld [vmem:[%s19015_s6 + $0xf8] sm:$0xff] }
 0x57e   : > { %13560 = vmatprep.subr.mxu1 %v10275_v21  ;;  %v14554_v39 = vpack.c.bf16 %v13209_v54, %v13208_v26  ;;  %v14534_v55 = vpack.c.bf16 %v13197_v32, %v13196_v17  ;;  %v13243_v54 = vld [vmem:[%s19016_s7 + $0x90] sm:$0xff]  ;;  %v13240_v32 = vld [vmem:[%s19016_s7 + $0x80] sm:$0xff] }
 0x584   : > { %13558 = vmatmul.mubr.msk.f32.vlgmr.msra.gmra.mrb[6].mxu1 %vm8295_vm2, %v13159_v52  ;;  %v13211_v52 = vld [vmem:[%s19015_s6 + $0x158] sm:$0xff] }
 0x585   : > { %13561 = vmatpush3.msra.mxu1 %v10275_v21  ;;  %13562 = vmatprep.mubr.msk.f32.mxu1 %vm8295_vm2, %v13162_v19  ;;  %v13210_v21 = vld [vmem:[%s19015_s6 + $0x150] sm:$0xff]  ;;  %v13198_v19 = vld [vmem:[%s19015_s6 + $0x100] sm:$0xff] }
 0x586   : > { %13565 = vmatprep.subr.mxu1 %v10368_v1  ;;  %v14558_v53 = vpack.c.bf16 %v13211_v52, %v13210_v21  ;;  %v13241_v21 = vld [vmem:[%s19016_s7 + $0x88] sm:$0xff] }
 0x58c   : > { %13563 = vmatmul.mubr.msk.f32.vlgmr.msra.gmra.mrb[6].mxu1 %vm8295_vm2, %v13163_v51  ;;  %v13212_v51 = vld [vmem:[%s19015_s6 + $0x160] sm:$0xff] }
 0x58d   : > { %13566 = vmatpush3.msra.mxu1 %v10368_v1  ;;  %13567 = vmatprep.mubr.msk.f32.mxu1 %vm8295_vm2, %v13166_v11  ;;  %v13199_v1 = vld [vmem:[%s19015_s6 + $0x108] sm:$0xff]  ;;  %v14562_v11 = vpack.c.bf16 %v13213_v59, %v13212_v51  ;;  %v13246_v59 = vld [vmem:[%s19016_s7 + $0xa0] sm:$0xff] }
 0x58e   : > { %13570 = vmatprep.subr.mxu1 %v10461_v61  ;;  %v14538_v8 = vpack.c.bf16 %v13199_v1, %v13198_v19  ;;  %v13250_v19 = vld [vmem:[%s19016_s7 + $0xb8] sm:$0xff]  ;;  %v14595_v1 = vpack.c.bf16 %v13241_v21, %v13240_v32 }
 0x594   : > { %13568 = vmatmul.mubr.msk.f32.vlgmr.msra.gmra.mrb[6].mxu1 %vm8295_vm2, %v13167_v46  ;;  %v13215_v46 = vld [vmem:[%s19015_s6 + $0x178] sm:$0xff] }
 0x595   : > { %13571 = vmatpush3.msra.mxu1 %v10461_v61  ;;  %13572 = vmatprep.mubr.msk.f32.mxu1 %vm8295_vm2, %v13170_v23  ;;  %v13200_v61 = vld [vmem:[%s19015_s6 + $0x110] sm:$0xff] }
 0x596   : > { %14499 = vmatprep.subr.bf16.mxu1 %v14498_v27  ;;  %v14542_v23 = vpack.c.bf16 %v13201_v9, %v13200_v61  ;;  %v13255_v9 = vld [vmem:[%s19016_s7 + $0xd0] sm:$0xff] }
 0x59c   : > { %13573 = vmatmul.mubr.msk.f32.vlgmr.msra.gmra.mrb[6].mxu1 %vm8295_vm2, %v13171_v20  ;;  %v14574_v20 = vpack.c.bf16 %v10926_v62, %v10925_v4 }
 0x59d   : > { %14501 = vmatpush3.bf16.msra.mxu1 %v14498_v27  ;;  %v14566_v27 = vpack.c.bf16 %v13215_v46, %v13214_v16  ;;  %v13256_v16 = vld [vmem:[%s19016_s7 + $0xd8] sm:$0xff] }
 0x59e   : > { %14503 = vmatprep.subr.bf16.mxu1 %v14502_v12  ;;  %v14610_v4 = vpack.c.bf16 %v13256_v16, %v13255_v9 }
 0x5a1   : > { %14505 = vmatpush3.bf16.msra.mxu1 %v14502_v12  ;;  %v15035_v12 = vmov 0.0|0.0  }
 0x5a2   : > { %14507 = vmatprep.subr.bf16.mxu1 %v14506_v25 }
 0x5a5   : > { %14509 = vmatpush3.bf16.msra.mxu1 %v14506_v25  ;;  %v14571_v25 = vpack.c.bf16 %v13219_v22, %v13218_v2  ;;  %v13262_v2 = vld [vmem:[%s19016_s7 + $0xf8] sm:$0xff] }
 0x5a6   : > { %14511 = vmatprep.subr.bf16.mxu1 %v14510_v28 }
 0x5a9   : > { %14513 = vmatpush3.bf16.msra.mxu1 %v14510_v28 }
 0x5aa   : > { %14515 = vmatprep.subr.bf16.mxu1 %v14514_v58 }
 0x5ad   : > { %14517 = vmatpush3.bf16.msra.mxu1 %v14514_v58 }
 0x5ae   : > { %14519 = vmatprep.subr.bf16.mxu1 %v14518_v24 }
 0x5b1   : > { %14521 = vmatpush3.bf16.msra.mxu1 %v14518_v24 }
 0x5b2   : > { %14547 = vmatprep.subr.bf16.mxu1 %v14546_v37 }
 0x66f   : > { %v13574_v50 = vpop.f32.mrb[6].mxu1 }
 0x670   : > { %v10559_v60 = vadd.f32 %v13574_v50, %v10556_v35  ;;  %v10535_v48 = vpop.f32.mrb[7].mxu1  ;;  %v13231_v35 = vld [vmem:[%s19016_s7 + $0x50] sm:$0xff]  ;;  %v13232_v50 = vld [vmem:[%s19016_s7 + $0x58] sm:$0xff] }
 0x671   : > { %v10558_v38 = vadd.f32 %v10551_v5, %v10535_v48  ;;  %v14586_v41 = vpack.c.bf16 %v13232_v50, %v13231_v35 }
 0x672   : > { %v10561_v57 = vmax.f32 %v10559_v60, 0.0 }
 0x673   : > { %v10560_v18 = vmax.f32 %v10558_v38, 0.0  ;;  %v13228_v38 = vld [vmem:[%s19016_s7 + $0x40] sm:$0xff] }
 0x675   : > { %13599 = vmatprep.mubr.msk.f32.mxu0 %vm2665_vm10, %v10560_v18  ;;  %13626 = vmatprep.mubr.msk.f32.mxu1 %vm2665_vm10, %v10560_v18 }
 0x676   : > { %13600 = vmatmul.mubr.msk.f32.vlgmr.msra.gmra.mrb[8].mxu0 %vm2665_vm10, %v10561_v57  ;;  %13627 = vmatmul.mubr.msk.f32.vlgmr.msra.gmra.mrb[8].mxu1 %vm2665_vm10, %v10561_v57 }
 0x677   : > { %14525 = vmatpush3.bf16.msra.mxu0 %v14522_v10  ;;  %14549 = vmatpush3.bf16.msra.mxu1 %v14546_v37  ;;  %v13223_v10 = vld [vmem:[%s19016_s7 + $0x28] sm:$0xff]  ;;  %v14580_v37 = vpack.c.bf16 %v13226_v30, %v13225_v13  ;;  %v12157_v13 = vld [vmem:[%s19018_s9] sm:$0xff] }
 0x678   : > { %13653 = vmatprep.mubr.msk.f32.mxu0 %vm2665_vm10, %v10560_v18  ;;  %13680 = vmatprep.mubr.msk.f32.mxu1 %vm2665_vm10, %v10560_v18  ;;  %v14577_v60 = vpack.c.bf16 %v13223_v10, %v13222_v47  ;;  %v13238_v18 = vld [vmem:[%s19016_s7 + $0x78] sm:$0xff]  ;;  %v12158_v30 = vld [vmem:[%s19018_s9 + $0x8] sm:$0xff] }
 0x679   : > { %14527 = vmatprep.subr.bf16.mxu0 %v14526_v3  ;;  %14551 = vmatprep.subr.bf16.mxu1 %v14550_v49  ;;  %v14592_v44 = vpack.c.bf16 %v13238_v18, %v13237_v63 }
 0x67b   : > { %14529 = vmatpush3.bf16.msra.mxu0 %v14526_v3  ;;  %14553 = vmatpush3.bf16.msra.mxu1 %v14550_v49  ;;  %v13234_v3 = vld [vmem:[%s19016_s7 + $0x60] sm:$0xff]  ;;  %v13235_v49 = vld [vmem:[%s19016_s7 + $0x68] sm:$0xff] }
 0x67c   : > { %14531 = vmatprep.subr.bf16.mxu0 %v14530_v34  ;;  %14555 = vmatprep.subr.bf16.mxu1 %v14554_v39 }
 0x67f   : > { %14533 = vmatpush3.bf16.msra.mxu0 %v14530_v34  ;;  %14557 = vmatpush3.bf16.msra.mxu1 %v14554_v39  ;;  %v13244_v34 = vld [vmem:[%s19016_s7 + $0x98] sm:$0xff]  ;;  %v14589_v39 = vpack.c.bf16 %v13235_v49, %v13234_v3 }
 0x680   : > { %14535 = vmatprep.subr.bf16.mxu0 %v14534_v55  ;;  %14559 = vmatprep.subr.bf16.mxu1 %v14558_v53  ;;  %v14598_v52 = vpack.c.bf16 %v13244_v34, %v13243_v54 }
 0x683   : > { %14537 = vmatpush3.bf16.msra.mxu0 %v14534_v55  ;;  %14561 = vmatpush3.bf16.msra.mxu1 %v14558_v53  ;;  %v13249_v53 = vld [vmem:[%s19016_s7 + $0xb0] sm:$0xff] }
 0x684   : > { %14539 = vmatprep.subr.bf16.mxu0 %v14538_v8  ;;  %14563 = vmatprep.subr.bf16.mxu1 %v14562_v11 }
 0x687   : > { %14541 = vmatpush3.bf16.msra.mxu0 %v14538_v8  ;;  %14565 = vmatpush3.bf16.msra.mxu1 %v14562_v11  ;;  %v13247_v8 = vld [vmem:[%s19016_s7 + $0xa8] sm:$0xff]  ;;  %v14604_v11 = vpack.c.bf16 %v13250_v19, %v13249_v53 }
 0x688   : > { %14543 = vmatprep.subr.bf16.mxu0 %v14542_v23  ;;  %14567 = vmatprep.subr.bf16.mxu1 %v14566_v27  ;;  %v14601_v46 = vpack.c.bf16 %v13247_v8, %v13246_v59 }
 0x68b   : > { %14545 = vmatpush3.bf16.msra.mxu0 %v14542_v23  ;;  %14569 = vmatpush3.bf16.msra.mxu1 %v14566_v27  ;;  %v13252_v23 = vld [vmem:[%s19016_s7 + $0xc0] sm:$0xff]  ;;  %v13253_v27 = vld [vmem:[%s19016_s7 + $0xc8] sm:$0xff] }
 0x68c   : > { %14573 = vmatprep.subr.bf16.mxu1 %v15035_v12  ;;  %14570 = vmatprep.subr.bf16.mxu0 %v15035_v12  ;;  %v14607_v22 = vpack.c.bf16 %v13253_v27, %v13252_v23  ;;  %v12154_v27 = vld [vmem:[%s19017_s8] sm:$0x1] }
 0x68e   : > { %13654 = vmatmul.mubr.msk.f32.vlgmr.msra.gmra.mrb[10].mxu0 %vm2665_vm10, %v10561_v57  ;;  %13681 = vmatmul.mubr.msk.f32.vlgmr.msra.gmra.mrb[10].mxu1 %vm2665_vm10, %v10561_v57  ;;  %vm15036_vm10 = vmmov 0   ;;  %v14583_v57 = vpack.c.bf16 %v13229_v56, %v13228_v38 }
 0x68f   : > { %14575 = vmatpush3.bf16.msra.mxu1 %v14574_v20  ;;  %13694 = vmatprep.mubr.msk.f32.mxu1 %vm15036_vm10, %v14990_v0  ;;  %v13261_v20 = vld [vmem:[%s19016_s7 + $0xf0] sm:$0xff] }
 0x690   : > { %14579 = vmatprep.subr.bf16.mxu1 %v15035_v12  ;;  %14572 = vmatpush3.bf16.msra.mxu0 %v14571_v25 }
 0x691   : > { %13687 = vmatprep.mubr.msk.f32.mxu0 %vm15036_vm10, %v14990_v0  ;;  %14576 = vmatprep.subr.bf16.mxu0 %v15035_v12 }
 0x749   : > { %v13601_v31 = vpop.f32.mrb[8].mxu0  ;;  %v13628_v7 = vpop.f32.mrb[8].mxu1 }
 0x74a   : > { %v10744_v28 = vmax.f32 %v13601_v31, %v13628_v7  ;;  %v10646_v29 = vpop.f32.mrb[9].mxu0  ;;  %v10734_v14 = vpop.f32.mrb[9].mxu1  ;;  %v13258_v31 = vld [vmem:[%s19016_s7 + $0xe0] sm:$0xff]  ;;  %v13259_v7 = vld [vmem:[%s19016_s7 + $0xe8] sm:$0xff] }
 0x74b   : > { %v10743_v58 = vmax.f32 %v10646_v29, %v10734_v14  ;;  %v14613_v14 = vpack.c.bf16 %v13259_v7, %v13258_v31 }
 0x761   : > { %v13655_v36 = vpop.f32.mrb[10].mxu0  ;;  %v13682_v42 = vpop.f32.mrb[10].mxu1 }
 0x762   : > { %v10834_v33 = vmax.f32 %v10744_v28, %v13655_v36  ;;  %v10824_v24 = vpop.f32.mrb[11].mxu0  ;;  %v10914_v45 = vpop.f32.mrb[11].mxu1  ;;  %v14616_v28 = vpack.c.bf16 %v13262_v2, %v13261_v20  ;;  %v12159_v2 = vld [vmem:[%s19019_s10] sm:$0x1] }
 0x763   : > { %v10833_v6 = vmax.f32 %v10743_v58, %v10824_v24 }
 0x764   : > { %v18805_v43 = vmax.f32 %v10834_v33, %v13682_v42  ;;  %v14619_v33 = vpack.c.bf16 %v12158_v30, %v12157_v13 }
 0x765   : > { %v10923_v5 = vmax.f32 %v10833_v6, %v10914_v45 }
 0x766   : > { %v11618_v61 = vrot.slane %v18805_v43, 1  ;;  %v11772_v62 = vrot.slane %v18805_v43, 3  ;;  %v11695_v25 = vrot.slane %v18805_v43, 2  ;;  %v11926_v29 = vrot.slane %v18805_v43, 5 }
 0x767   : > { %13695 = vmatmul.mubr.msk.f32.vlgmr.msra.gmra.mrb[12].mxu1 %vm5462_vm7, %v10923_v5  ;;  %v10931_v48 = vrot.slane %v10923_v5, 1  ;;  %v11156_v15 = vrot.slane %v10923_v5, 3  ;;  %v11079_v40 = vrot.slane %v10923_v5, 2  ;;  %v11310_v26 = vrot.slane %v10923_v5, 5 }
 0x768   : > { %14581 = vmatpush3.bf16.msra.mxu1 %v14580_v37  ;;  %13708 = vmatprep.mubr.msk.f32.mxu1 %vm15036_vm10, %v14990_v0  ;;  %v11233_v17 = vrot.slane %v10923_v5, 4  ;;  %v11464_v55 = vrot.slane %v10923_v5, 7  ;;  %v11387_v51 = vrot.slane %v10923_v5, 6  ;;  %v11849_v58 = vrot.slane %v18805_v43, 4 }
 0x769   : > { %13688 = vmatmul.mubr.msk.f32.vlgmr.msra.gmra.mrb[12].mxu0 %vm5462_vm7, %v10931_v48  ;;  %14585 = vmatprep.subr.bf16.mxu1 %v15035_v12  ;;  %v12080_v36 = vrot.slane %v18805_v43, 7  ;;  %v12003_v42 = vrot.slane %v18805_v43, 6 }
 0x76a   : > { %14578 = vmatpush3.bf16.msra.mxu0 %v14577_v60  ;;  %13701 = vmatprep.mubr.msk.f32.mxu0 %vm15036_vm10, %v14990_v0 }
 0x76b   : > { %13709 = vmatmul.mubr.msk.f32.vlgmr.msra.gmra.mrb[14].mxu1 %vm5462_vm7, %v11156_v15  ;;  %14582 = vmatprep.subr.bf16.mxu0 %v15035_v12 }
 0x76c   : > { %14587 = vmatpush3.bf16.msra.mxu1 %v14586_v41  ;;  %13722 = vmatprep.mubr.msk.f32.mxu1 %vm15036_vm10, %v14990_v0 }
 0x76d   : > { %13702 = vmatmul.mubr.msk.f32.vlgmr.msra.gmra.mrb[14].mxu0 %vm5462_vm7, %v11079_v40  ;;  %14591 = vmatprep.subr.bf16.mxu1 %v15035_v12 }
 0x76e   : > { %14584 = vmatpush3.bf16.msra.mxu0 %v14583_v57  ;;  %13715 = vmatprep.mubr.msk.f32.mxu0 %vm15036_vm10, %v14990_v0 }
 0x76f   : > { %13723 = vmatmul.mubr.msk.f32.vlgmr.msra.gmra.mrb[16].mxu1 %vm5462_vm7, %v11310_v26  ;;  %14588 = vmatprep.subr.bf16.mxu0 %v15035_v12 }
 0x770   : > { %14593 = vmatpush3.bf16.msra.mxu1 %v14592_v44  ;;  %13736 = vmatprep.mubr.msk.f32.mxu1 %vm15036_vm10, %v14990_v0 }
 0x771   : > { %13716 = vmatmul.mubr.msk.f32.vlgmr.msra.gmra.mrb[16].mxu0 %vm5462_vm7, %v11233_v17  ;;  %14597 = vmatprep.subr.bf16.mxu1 %v15035_v12 }
 0x772   : > { %14590 = vmatpush3.bf16.msra.mxu0 %v14589_v39  ;;  %13729 = vmatprep.mubr.msk.f32.mxu0 %vm15036_vm10, %v14990_v0 }
 0x773   : > { %13737 = vmatmul.mubr.msk.f32.vlgmr.msra.gmra.mrb[18].mxu1 %vm5462_vm7, %v11464_v55  ;;  %14594 = vmatprep.subr.bf16.mxu0 %v15035_v12 }
 0x774   : > { %14599 = vmatpush3.bf16.msra.mxu1 %v14598_v52  ;;  %13750 = vmatprep.mubr.msk.f32.mxu1 %vm15036_vm10, %v14990_v0 }
 0x775   : > { %13730 = vmatmul.mubr.msk.f32.vlgmr.msra.gmra.mrb[18].mxu0 %vm5462_vm7, %v11387_v51  ;;  %14603 = vmatprep.subr.bf16.mxu1 %v15035_v12 }
 0x776   : > { %14596 = vmatpush3.bf16.msra.mxu0 %v14595_v1  ;;  %13743 = vmatprep.mubr.msk.f32.mxu0 %vm15036_vm10, %v14990_v0 }
 0x777   : > { %13751 = vmatmul.mubr.msk.f32.vlgmr.msra.gmra.mrb[20].mxu1 %vm5462_vm7, %v11618_v61  ;;  %14600 = vmatprep.subr.bf16.mxu0 %v15035_v12 }
 0x778   : > { %14605 = vmatpush3.bf16.msra.mxu1 %v14604_v11  ;;  %13764 = vmatprep.mubr.msk.f32.mxu1 %vm15036_vm10, %v14990_v0 }
 0x779   : > { %13744 = vmatmul.mubr.msk.f32.vlgmr.msra.gmra.mrb[20].mxu0 %vm5462_vm7, %v18805_v43  ;;  %14609 = vmatprep.subr.bf16.mxu1 %v15035_v12 }
 0x77a   : > { %14602 = vmatpush3.bf16.msra.mxu0 %v14601_v46  ;;  %13757 = vmatprep.mubr.msk.f32.mxu0 %vm15036_vm10, %v14990_v0 }
 0x77b   : > { %13765 = vmatmul.mubr.msk.f32.vlgmr.msra.gmra.mrb[22].mxu1 %vm5462_vm7, %v11772_v62  ;;  %14606 = vmatprep.subr.bf16.mxu0 %v15035_v12 }
 0x77c   : > { %14611 = vmatpush3.bf16.msra.mxu1 %v14610_v4  ;;  %13778 = vmatprep.mubr.msk.f32.mxu1 %vm15036_vm10, %v14990_v0 }
 0x77d   : > { %13758 = vmatmul.mubr.msk.f32.vlgmr.msra.gmra.mrb[22].mxu0 %vm5462_vm7, %v11695_v25  ;;  %14615 = vmatprep.subr.bf16.mxu1 %v15035_v12 }
 0x77e   : > { %14608 = vmatpush3.bf16.msra.mxu0 %v14607_v22  ;;  %13771 = vmatprep.mubr.msk.f32.mxu0 %vm15036_vm10, %v14990_v0 }
 0x77f   : > { %13779 = vmatmul.mubr.msk.f32.vlgmr.msra.gmra.mrb[24].mxu1 %vm5462_vm7, %v11926_v29  ;;  %14612 = vmatprep.subr.bf16.mxu0 %v15035_v12 }
 0x780   : > { %14617 = vmatpush3.bf16.msra.mxu1 %v14616_v28  ;;  %13792 = vmatprep.mubr.msk.f32.mxu1 %vm15036_vm10, %v14990_v0 }
 0x781   : > { %13772 = vmatmul.mubr.msk.f32.vlgmr.msra.gmra.mrb[24].mxu0 %vm5462_vm7, %v11849_v58 }
 0x782   : > { %14614 = vmatpush3.bf16.msra.mxu0 %v14613_v14  ;;  %13785 = vmatprep.mubr.msk.f32.mxu0 %vm15036_vm10, %v14990_v0 }
 0x783   : > { %13793 = vmatmul.mubr.msk.f32.vlgmr.msra.gmra.mrb[26].mxu1 %vm5462_vm7, %v12080_v36  ;;  %14618 = vmatprep.subr.bf16.mxu0 %v15035_v12 }
 0x785   : > { %13786 = vmatmul.mubr.msk.f32.vlgmr.msra.gmra.mrb[26].mxu0 %vm5462_vm7, %v12003_v42 }
 0x786   : > { %13799 = vmatprep.mubr.msk.f32.mxu0 %vm15036_vm10, %v14990_v0  ;;  %14620 = vmatpush3.bf16.msra.mxu0 %v14619_v33 }
 0x83a   : > { %v11072_v24 = vpop.f32.mrb[12].mxu1 }
 0x83b   : > { %v13696_v45 = vpop.f32.mrb[13].mxu1 }
 0x83c   : > { %v11000_v6 = vpop.f32.mrb[12].mxu0 }
 0x83d   : > { %v11073_v47 = vadd.f32 %v11072_v24, %v11000_v6  ;;  %v13689_v12 = vpop.f32.mrb[13].mxu0 }
 0x83e   : > { %v11225_v10 = vpop.f32.mrb[14].mxu1 }
 0x83f   : > { %v13710_v43 = vpop.f32.mrb[15].mxu1 }
 0x840   : > { %v11148_v37 = vpop.f32.mrb[14].mxu0 }
 0x841   : > { %v11152_v5 = vadd.f32 %v11148_v37, %v11073_v47  ;;  %v13703_v0 = vpop.f32.mrb[15].mxu0 }
 0x842   : > { %v11379_v35 = vpop.f32.mrb[16].mxu1 }
 0x843   : > { %v13724_v50 = vpop.f32.mrb[17].mxu1  ;;  %v11229_v60 = vadd.f32 %v11225_v10, %v11152_v5 }
 0x844   : > { %v11302_v48 = vpop.f32.mrb[16].mxu0 }
 0x845   : > { %v11306_v38 = vadd.f32 %v11302_v48, %v11229_v60  ;;  %v13717_v56 = vpop.f32.mrb[17].mxu0 }
 0x846   : > { %v11533_v41 = vpop.f32.mrb[18].mxu1 }
 0x847   : > { %v13738_v15 = vpop.f32.mrb[19].mxu1  ;;  %v11383_v63 = vadd.f32 %v11379_v35, %v11306_v38 }
 0x848   : > { %v11456_v18 = vpop.f32.mrb[18].mxu0 }
 0x849   : > { %v11460_v57 = vadd.f32 %v11456_v18, %v11383_v63  ;;  %v13731_v40 = vpop.f32.mrb[19].mxu0 }
 0x84a   : > { %v11687_v3 = vpop.f32.mrb[20].mxu1 }
 0x84b   : > { %v13752_v49 = vpop.f32.mrb[21].mxu1  ;;  %v11537_v44 = vadd.f32 %v11533_v41, %v11460_v57 }
 0x84c   : > { %v11610_v26 = vpop.f32.mrb[20].mxu0 }
 0x84d   : > { %v11614_v54 = vadd.f32 %v11610_v26, %v11537_v44  ;;  %v13745_v34 = vpop.f32.mrb[21].mxu0 }
 0x84e   : > { %v11841_v39 = vpop.f32.mrb[22].mxu1 }
 0x84f   : > { %v13766_v17 = vpop.f32.mrb[23].mxu1  ;;  %v11691_v32 = vadd.f32 %v11687_v3, %v11614_v54 }
 0x850   : > { %v11764_v21 = vpop.f32.mrb[22].mxu0 }
 0x851   : > { %v11768_v52 = vadd.f32 %v11764_v21, %v11691_v32  ;;  %v13759_v55 = vpop.f32.mrb[23].mxu0 }
 0x852   : > { %v11995_v53 = vpop.f32.mrb[24].mxu1 }
 0x853   : > { %v13780_v19 = vpop.f32.mrb[25].mxu1  ;;  %v11845_v1 = vadd.f32 %v11841_v39, %v11768_v52 }
 0x854   : > { %v11918_v51 = vpop.f32.mrb[24].mxu0 }
 0x855   : > { %v11922_v59 = vadd.f32 %v11918_v51, %v11845_v1  ;;  %v13773_v8 = vpop.f32.mrb[25].mxu0 }
 0x856   : > { %v12149_v11 = vpop.f32.mrb[26].mxu1 }
 0x857   : > { %v13794_v61 = vpop.f32.mrb[27].mxu1  ;;  %v11999_v9 = vadd.f32 %v11995_v53, %v11922_v59 }
 0x858   : > { %v12072_v16 = vpop.f32.mrb[26].mxu0 }
 0x859   : > { %v12076_v46 = vadd.f32 %v12072_v16, %v11999_v9  ;;  %v13787_v23 = vpop.f32.mrb[27].mxu0 }
 0x85b   : > { %v12153_v4 = vadd.f32 %v12149_v11, %v12076_v46 }
 0x85d   : > { %v12155_v62 = vadd.f32 %v12154_v27, %v12153_v4 }
 0x85f   : > { %v12156_v20 = vmax.f32 %v12155_v62, 0.0 }
 0x861   : > { %13800 = vmatmul.mubr.msk.f32.vlgmr.msra.gmra.mrb[28].mxu0 %vm5462_vm7, %v12156_v20 }
 0x934   : > { %v12229_v22 = vpop.f32.mrb[28].mxu0 }
 0x935   : > { %v12230_v25 = vadd.f32 %v12229_v22, %v12159_v2  ;;  %v13801_v31 = vpop.f32.mrb[29].mxu0 }
 0x937   : > { %v12234_v7 = vsel %vm12233_vm11, %v12230_v25, -inf }
 0x938   : > { %12235 = vmax.xlane.f32.xlu1 %v12234_v7 }
 0x9c5   : > { %v12236_v28 = vpop.xlane.xlu1 %12235 }
 0x9c6   : > { %v12237_v29 = vsub.f32 %v12230_v25, %v12236_v28 }
 0x9c8   : > { %v12238_v14 = vmul.f32 1.442695, %v12237_v29 }
 0x9ca   : > { %14921 = vpow2.f32 %v12238_v14 }
 0x9d4   : > { %v14922_v58 = vpop.eup %14921 }
 0x9d5   : > { %v12240_v36 = vsel %vm12233_vm11, %v14922_v58, 0.0 }
 0x9d6   : > { %12241 = vadd.xlane.f32.xlu0 %v12240_v36 }
 0xa63   : > { %v12242_v42 = vpop.xlane.xlu0 %12241 }
 0xa64   : > { %14923 = vrcp.f32 %v12242_v42 }
 0xa6e   : > { %v14924_v13 = vpop.eup %14923 }
 0xa6f   : > { %v12244_v30 = vmul.f32 %v14924_v13, %v14922_v58 }
 0xa71   : > { %12245 = vst.msk [vmem:[%s378_s25] sm:$0x1] %vm12233_vm11, %v12244_v30 }
 0xa72   : > { %14939 = shalt.err (!%p14936_p3)
}
 0xa73   : > { %s14940_s29 = scalar_lea.hbm %s18966_s13, 16  ;;  %s14944_s25 = scalar_lea.hbm %s19020_s11, 32 }
 0xa74   : > { %p14941_p4 = scmp.ne.s32.totalorder %s18966_s13, %s14940_s29  ;;  %p14945_p9 = scmp.lt.u32.totalorder %s18966_s13, %s19020_s11 }
 0xa75   : > { %p14946_p10 = scmp.lt.u32.totalorder %s14944_s25, %s14940_s29  ;;  %p14948_p12 = scmp.lt.u32.totalorder %s14940_s29, %s18966_s13 }
 0xa76   : > { %p14942_p7 = pnand %p14941_p4, %p15136_p5 }
 0xa77   : > { %p14947_p11 = por %p14946_p10, %p14945_p9 }
 0xa78   : > { %p14943_p8 = pneg %p14942_p7 }
 0xa79   : > { %p14949_p13 = por %p14948_p12, %p14947_p11 }
 0xa7b   : > { %p14950_p0 = pnand %p14949_p13, %p14943_p8 }
 0xa7d   : > { %14953 = shalt.err (!%p14950_p0)
}
 0xa7e   : > { %14830 = dma.vmem_to_hbm [thread:$0]  (%p15136_p5), %s18968_s24, 16, %s18966_s13, %s12247_s12  }
 0xa7f PF: > { %p14836_p1 = scmp.ge.s32.totalorder %s14988_s20, 2  ;;  %s12271_s30 = sand.u32 1, %s14976_s17  }
 0xa80   : > { %s12272_s21 = scalar_lea.sflag [#allocation3], %s12271_s30 }
 0xa81   : > { %p14833_p2 = pnand %p14836_p1, %p15140_p6 }
 0xa83   : > { %14971 = dma.done.wait (!%p14833_p2), %s12272_s21, 16  }
 0xa84   : > { %14973 = vsyncadd (!%p14833_p2), %s12272_s21, 4294967280  ;;  %p21_p3 = scmp.ge.s32.totalorder %s15123_s23, 4   ;;  %s19045_s17 = smov %s14980_s18 }
 0xa85   : > { %s19046_s18 = smov %s14984_s19  ;;  %s19047_s19 = smov %s15134_s26 }
 0xa86   : > { %s19048_s20 = smov %s15123_s23  ;;  %23 = sbr.rel (!%p21_p3) target bundleno = 6 (0x6), region = 168 }
 0xa8d   :  { %12276 = vsyncpa [#allocation3], 1 }
 0xa8e   :  { %12278 = vsyncpa [#allocation3 + $0x1], 1 }

</bundles_post_ra>
